<compile_context>
chip_gen: v7x
topology: tpu7x:2x2x1
jax: 0.10.0
libtpu: 0.0.40
codegen_flags: <defaults>
</compile_context>

<pallas_src>
import math
from functools import partial

import jax
import jax.numpy as jnp
from jax.experimental import pallas as pl
from jax.experimental.pallas import tpu as pltpu

D_MODEL = 64
N_HEADS = 4
D_HEAD = D_MODEL // N_HEADS
Q_PROJ = D_MODEL // 2             # 32
KV_PROJ = (2 * D_MODEL) // 3      # 42
D_FF = 4 * D_MODEL
LN_EPS = 1e-5                     # torch.nn.LayerNorm default
PACK_W = 128                      # lane-dense packed output width (>= D_MODEL + KV_PROJ)


def _layernorm(v, g, b, eps=LN_EPS):
    mean = jnp.mean(v, axis=-1, keepdims=True)
    var = jnp.mean((v - mean) ** 2, axis=-1, keepdims=True)
    return (v - mean) * jax.lax.rsqrt(var + eps) * g + b


def decoder_block_kernel(
    x_ref,
    ln1_g_ref, ln1_b_ref,
    w_down_ref, qln_g_ref, qln_b_ref, kvln_g_ref, kvln_b_ref,
    w_uq_ref, w_uk_ref, w_uv_ref, w_o_ref,
    ln2_g_ref, ln2_b_ref,
    w_fc1_ref, b_fc1_ref, w_fc2_ref, b_fc2_ref,
    out_ref,
    *, seq_len, n_heads, d_head, past_length,
):
    x = x_ref[...]                              # (M, D), M = block_b * S
    M = x.shape[0]
    d_model = n_heads * d_head
    n_b = M // seq_len                          # batch elements in this block
    G = n_b * n_heads                           # (head, batch) pairs

    # ---- norm1 ----
    normed = _layernorm(x, ln1_g_ref[0], ln1_b_ref[0])

    # ---- fused low-rank down-projection: [W_dq | W_dkv] in one MXU matmul ----
    c = jnp.dot(normed, w_down_ref[...], preferred_element_type=jnp.float32)   # (M, 74)
    cq = _layernorm(c[:, :Q_PROJ], qln_g_ref[0], qln_b_ref[0])                  # (M, 32)
    ckv = c[:, Q_PROJ:Q_PROJ + KV_PROJ]         # compressed kv cache (pre-LN)   (M, 42)
    ckv_n = _layernorm(ckv, kvln_g_ref[0], kvln_b_ref[0])

    # ---- head-batched up-projections (1/sqrt(d_head) folded into W_uq) ----
    cq_h = jnp.broadcast_to(cq[None], (n_heads, M, cq.shape[-1]))
    ckv_h = jnp.broadcast_to(ckv_n[None], (n_heads, M, ckv_n.shape[-1]))
    q = jnp.einsum('hmk,hkd->hmd', cq_h, w_uq_ref[...],
                   preferred_element_type=jnp.float32)                          # (H, M, dh)
    k = jnp.einsum('hmk,hkd->hmd', ckv_h, w_uk_ref[...],
                   preferred_element_type=jnp.float32)
    v = jnp.einsum('hmk,hkd->hmd', ckv_h, w_uv_ref[...],
                   preferred_element_type=jnp.float32)

    # (H, n_b*S, dh) -> (H*n_b, S, dh): sublane-aligned split (S % 8 == 0)
    q = q.reshape(G, seq_len, d_head)
    k = k.reshape(G, seq_len, d_head)
    v = v.reshape(G, seq_len, d_head)

    # ---- causal attention, batched over (head, batch) ----
    row = jax.lax.broadcasted_iota(jnp.int32, (seq_len, seq_len), 0)
    col = jax.lax.broadcasted_iota(jnp.int32, (seq_len, seq_len), 1)
    neg_mask = jnp.where(col <= row + past_length, 0.0, -1e30).astype(jnp.float32)

    s = jnp.einsum('gqd,gkd->gqk', q, k, preferred_element_type=jnp.float32)    # (G, S, S)
    s = s + neg_mask[None]
    s = s - jnp.max(s, axis=-1, keepdims=True)
    p = jnp.exp(s)
    p = p * pl.reciprocal(jnp.sum(p, axis=-1, keepdims=True), approx=True)
    o = jnp.einsum('gqk,gkd->gqd', p, v, preferred_element_type=jnp.float32)    # (G, S, dh)

    # ---- output projection: per-head contributions with pre-split W_o^T, then sum ----
    o = o.reshape(n_heads, M, d_head)
    mh_x = jnp.sum(
        jnp.einsum('hmd,hdn->hmn', o, w_o_ref[...],
                   preferred_element_type=jnp.float32),
        axis=0)                                                                  # (M, D)

    # ---- residual + MLP (Dropout(0.1) in eval mode == identity) ----
    x1 = x + mh_x
    n2 = _layernorm(x1, ln2_g_ref[0], ln2_b_ref[0])
    h1 = jnp.maximum(
        jnp.dot(n2, w_fc1_ref[...], preferred_element_type=jnp.float32) + b_fc1_ref[0],
        0.0)
    y = x1 + jnp.dot(h1, w_fc2_ref[...], preferred_element_type=jnp.float32) + b_fc2_ref[0]

    # ---- lane-dense packed store: [ y | ckv | zero-pad ] fills all 128 lanes ----
    pad = jnp.zeros((M, out_ref.shape[-1] - d_model - KV_PROJ), jnp.float32)
    out_ref[...] = jnp.concatenate([y, ckv, pad], axis=-1)


def make_params(key):
    """Parameters in the original PyTorch layout."""
    ks = jax.random.split(key, 8)
    return {
        "ln1_g": jnp.ones((1, D_MODEL), jnp.float32),
        "ln1_b": jnp.zeros((1, D_MODEL), jnp.float32),
        "w_dq": 0.01 * jax.random.normal(ks[0], (D_MODEL, Q_PROJ), jnp.float32),
        "qln_g": jnp.ones((1, Q_PROJ), jnp.float32),
        "qln_b": jnp.zeros((1, Q_PROJ), jnp.float32),
        "w_uq": 0.01 * jax.random.normal(ks[1], (Q_PROJ, D_MODEL), jnp.float32),
        "w_dkv": 0.01 * jax.random.normal(ks[2], (D_MODEL, KV_PROJ), jnp.float32),
        "kvln_g": jnp.ones((1, KV_PROJ), jnp.float32),
        "kvln_b": jnp.zeros((1, KV_PROJ), jnp.float32),
        "w_ukv": 0.01 * jax.random.normal(ks[3], (KV_PROJ, 2 * D_MODEL), jnp.float32),
        "w_o": 0.01 * jax.random.normal(ks[4], (D_MODEL, D_MODEL), jnp.float32),
        "ln2_g": jnp.ones((1, D_MODEL), jnp.float32),
        "ln2_b": jnp.zeros((1, D_MODEL), jnp.float32),
        "w_fc1": 0.02 * jax.random.normal(ks[5], (D_MODEL, D_FF), jnp.float32),
        "b_fc1": jnp.zeros((1, D_FF), jnp.float32),
        "w_fc2": 0.02 * jax.random.normal(ks[6], (D_FF, D_MODEL), jnp.float32),
        "b_fc2": jnp.zeros((1, D_MODEL), jnp.float32),
    }


def prepare_params(p):
    """One-time re-layout of weights into the kernel-friendly form.

    * fuse W_dq | W_dkv into one down-projection weight
    * fold 1/sqrt(d_head) into W_uq
    * split W_uq / W_uk / W_uv / W_o^T into per-head (H, K, d_head) slabs so the
      kernel uses head-batched einsums with no in-kernel transposes.
    """
    scale = 1.0 / math.sqrt(D_HEAD)
    w_uq = (p["w_uq"] * scale).reshape(Q_PROJ, N_HEADS, D_HEAD).transpose(1, 0, 2)
    w_uk = p["w_ukv"][:, :D_MODEL].reshape(KV_PROJ, N_HEADS, D_HEAD).transpose(1, 0, 2)
    w_uv = p["w_ukv"][:, D_MODEL:].reshape(KV_PROJ, N_HEADS, D_HEAD).transpose(1, 0, 2)
    w_o_h = p["w_o"].T.reshape(N_HEADS, D_HEAD, D_MODEL)
    w_down = jnp.concatenate([p["w_dq"], p["w_dkv"]], axis=1)          # (D, Q_PROJ+KV_PROJ)
    return {
        "ln1_g": p["ln1_g"], "ln1_b": p["ln1_b"],
        "w_down": w_down,
        "qln_g": p["qln_g"], "qln_b": p["qln_b"],
        "kvln_g": p["kvln_g"], "kvln_b": p["kvln_b"],
        "w_uq_h": w_uq, "w_uk_h": w_uk, "w_uv_h": w_uv, "w_o_h": w_o_h,
        "ln2_g": p["ln2_g"], "ln2_b": p["ln2_b"],
        "w_fc1": p["w_fc1"], "b_fc1": p["b_fc1"],
        "w_fc2": p["w_fc2"], "b_fc2": p["b_fc2"],
    }


KP_ORDER = ["ln1_g", "ln1_b", "w_down", "qln_g", "qln_b", "kvln_g", "kvln_b",
            "w_uq_h", "w_uk_h", "w_uv_h", "w_o_h", "ln2_g", "ln2_b",
            "w_fc1", "b_fc1", "w_fc2", "b_fc2"]


def _pick_block_b(batch, seq, target_rows=512):
    """Largest divisor of `batch` keeping block rows (block_b*seq) <= target_rows.

    On v7x one may pass block_b = batch // 2 explicitly to keep >= 2 grid steps
    and shard across both TensorCores; for small batches (like the test below)
    collapsing the whole batch into one program is the right call.
    """
    cap = max(1, target_rows // seq)
    bb = 1
    for d in range(1, batch + 1):
        if batch % d == 0 and d <= cap:
            bb = d
    return bb


@partial(jax.jit, static_argnames=("past_length", "block_b"))
def transformer_decoder_block(x, kparams, past_length=0, block_b=None):
    B, S, D = x.shape
    assert D == D_MODEL
    assert S % 8 == 0, "seq_len must be a multiple of 8 (sublane-aligned reshapes)"
    if block_b is None:
        block_b = _pick_block_b(B, S)
    assert B % block_b == 0
    m_blk = block_b * S
    grid = (B // block_b,)

    x2 = x.reshape(B * S, D)                    # layout-free: lane dim unchanged
    param_list = [kparams[k] for k in KP_ORDER]

    def full_spec(arr):
        nd = arr.ndim
        return pl.BlockSpec(arr.shape, lambda i, nd=nd: (0,) * nd)  # weight resident

    in_specs = [pl.BlockSpec((m_blk, D), lambda i: (i, 0))]
    in_specs += [full_spec(a) for a in param_list]
    out_specs = pl.BlockSpec((m_blk, PACK_W), lambda i: (i, 0))
    out_shape = jax.ShapeDtypeStruct((B * S, PACK_W), jnp.float32)

    kernel = partial(decoder_block_kernel, seq_len=S, n_heads=N_HEADS,
                     d_head=D_HEAD, past_length=past_length)

    packed = pl.pallas_call(
        kernel,
        out_shape=out_shape,
        grid_spec=pltpu.PrefetchScalarGridSpec(
            num_scalar_prefetch=0,
            grid=grid,
            in_specs=in_specs,
            out_specs=out_specs,
        ),
        compiler_params=pltpu.CompilerParams(
            dimension_semantics=("parallel",),
            vmem_limit_bytes=64 << 20),
    )(x2, *param_list)

    out = packed[:, :D].reshape(B, S, D)
    kv = packed[:, D:D + KV_PROJ].reshape(B, S, KV_PROJ)
    return out, kv


def reference(x, p, past_length=0):
    """Pure-JAX mirror of the PyTorch forward (original parameter layout)."""
    def ln(v, g, b):
        m = jnp.mean(v, -1, keepdims=True)
        var = jnp.mean((v - m) ** 2, -1, keepdims=True)
        return (v - m) * jax.lax.rsqrt(var + LN_EPS) * g[0] + b[0]

    B, S, D = x.shape
    normed = ln(x, p["ln1_g"], p["ln1_b"])
    cq = ln(normed @ p["w_dq"], p["qln_g"], p["qln_b"])
    q = cq @ p["w_uq"]
    ckv = normed @ p["w_dkv"]
    kv = ln(ckv, p["kvln_g"], p["kvln_b"]) @ p["w_ukv"]
    k, v = kv[..., :D], kv[..., D:]
    qh = q.reshape(B, S, N_HEADS, D_HEAD).transpose(0, 2, 1, 3)
    kh = k.reshape(B, S, N_HEADS, D_HEAD).transpose(0, 2, 1, 3)
    vh = v.reshape(B, S, N_HEADS, D_HEAD).transpose(0, 2, 1, 3)
    s = jnp.einsum("bhqd,bhkd->bhqk", qh, kh) / math.sqrt(D_HEAD)
    mask = jnp.tril(jnp.ones((S, S), bool), k=past_length)
    s = jnp.where(mask[None, None], s, -1e30)
    pattn = jax.nn.softmax(s, axis=-1)
    o = jnp.einsum("bhqk,bhkd->bhqd", pattn, vh).transpose(0, 2, 1, 3).reshape(B, S, D)
    mh_x = o @ p["w_o"].T
    x1 = x + mh_x
    n2 = ln(x1, p["ln2_g"], p["ln2_b"])
    ffn = jnp.maximum(n2 @ p["w_fc1"] + p["b_fc1"][0], 0.0) @ p["w_fc2"] + p["b_fc2"][0]
    return x1 + ffn, ckv


if __name__ == "__main__":
    B, S = 2, 16
    key = jax.random.PRNGKey(0)
    k_x, k_p = jax.random.split(key)
    x = jax.random.normal(k_x, (B, S, D_MODEL), jnp.float32)
    params = make_params(k_p)
    kparams = prepare_params(params)   # one-time weight re-layout (outside the hot path)

    out, kv = transformer_decoder_block(x, kparams, past_length=0)
    out, kv = jax.block_until_ready(out), jax.block_until_ready(kv)

    ref_out, ref_kv = reference(x, params)
    assert out.shape == (B, S, D_MODEL) and kv.shape == (B, S, KV_PROJ)
    assert jnp.allclose(out, ref_out, atol=1e-3, rtol=1e-3), (
        float(jnp.max(jnp.abs(out - ref_out))))
    assert jnp.allclose(kv, ref_kv, atol=1e-3, rtol=1e-3), (
        float(jnp.max(jnp.abs(kv - ref_kv))))

    print("KERNEL_OK")
</pallas_src>

<mosaic_0001>
module attributes {stable_mosaic.version = 11 : i64} {
  func.func @decoder_block_kernel(%arg0: i32, %arg1: memref<32x64xf32, #tpu.memory_space<vmem>>, %arg2: memref<1x64xf32, #tpu.memory_space<vmem>>, %arg3: memref<1x64xf32, #tpu.memory_space<vmem>>, %arg4: memref<64x74xf32, #tpu.memory_space<vmem>>, %arg5: memref<1x32xf32, #tpu.memory_space<vmem>>, %arg6: memref<1x32xf32, #tpu.memory_space<vmem>>, %arg7: memref<1x42xf32, #tpu.memory_space<vmem>>, %arg8: memref<1x42xf32, #tpu.memory_space<vmem>>, %arg9: memref<4x32x16xf32, #tpu.memory_space<vmem>>, %arg10: memref<4x42x16xf32, #tpu.memory_space<vmem>>, %arg11: memref<4x42x16xf32, #tpu.memory_space<vmem>>, %arg12: memref<4x16x64xf32, #tpu.memory_space<vmem>>, %arg13: memref<1x64xf32, #tpu.memory_space<vmem>>, %arg14: memref<1x64xf32, #tpu.memory_space<vmem>>, %arg15: memref<64x256xf32, #tpu.memory_space<vmem>>, %arg16: memref<1x256xf32, #tpu.memory_space<vmem>>, %arg17: memref<256x64xf32, #tpu.memory_space<vmem>>, %arg18: memref<1x64xf32, #tpu.memory_space<vmem>>, %arg19: memref<32x128xf32, #tpu.memory_space<vmem>>) attributes {dimension_semantics = [#tpu.dimension_semantics<parallel>], iteration_bounds = array<i64: 1>, scalar_prefetch = 0 : i64, scratch_operands = 0 : i64, tpu.core_type = #tpu.core_type<tc>, window_params = [{transform_indices = @transform_0, window_bounds = array<i64: 32, 64>}, {pipeline_mode = #tpu.pipeline_mode<synchronous>, transform_indices = @transform_1, window_bounds = array<i64: 1, 64>}, {pipeline_mode = #tpu.pipeline_mode<synchronous>, transform_indices = @transform_2, window_bounds = array<i64: 1, 64>}, {pipeline_mode = #tpu.pipeline_mode<synchronous>, transform_indices = @transform_3, window_bounds = array<i64: 64, 74>}, {pipeline_mode = #tpu.pipeline_mode<synchronous>, transform_indices = @transform_4, window_bounds = array<i64: 1, 32>}, {pipeline_mode = #tpu.pipeline_mode<synchronous>, transform_indices = @transform_5, window_bounds = array<i64: 1, 32>}, {pipeline_mode = #tpu.pipeline_mode<synchronous>, transform_indices = @transform_6, window_bounds = array<i64: 1, 42>}, {pipeline_mode = #tpu.pipeline_mode<synchronous>, transform_indices = @transform_7, window_bounds = array<i64: 1, 42>}, {pipeline_mode = #tpu.pipeline_mode<synchronous>, transform_indices = @transform_8, window_bounds = array<i64: 4, 32, 16>}, {pipeline_mode = #tpu.pipeline_mode<synchronous>, transform_indices = @transform_9, window_bounds = array<i64: 4, 42, 16>}, {pipeline_mode = #tpu.pipeline_mode<synchronous>, transform_indices = @transform_10, window_bounds = array<i64: 4, 42, 16>}, {pipeline_mode = #tpu.pipeline_mode<synchronous>, transform_indices = @transform_11, window_bounds = array<i64: 4, 16, 64>}, {pipeline_mode = #tpu.pipeline_mode<synchronous>, transform_indices = @transform_12, window_bounds = array<i64: 1, 64>}, {pipeline_mode = #tpu.pipeline_mode<synchronous>, transform_indices = @transform_13, window_bounds = array<i64: 1, 64>}, {pipeline_mode = #tpu.pipeline_mode<synchronous>, transform_indices = @transform_14, window_bounds = array<i64: 64, 256>}, {pipeline_mode = #tpu.pipeline_mode<synchronous>, transform_indices = @transform_15, window_bounds = array<i64: 1, 256>}, {pipeline_mode = #tpu.pipeline_mode<synchronous>, transform_indices = @transform_16, window_bounds = array<i64: 256, 64>}, {pipeline_mode = #tpu.pipeline_mode<synchronous>, transform_indices = @transform_17, window_bounds = array<i64: 1, 64>}, {transform_indices = @transform_18, window_bounds = array<i64: 32, 128>}]} {
    %c0 = arith.constant 0 : index
    %c0_0 = arith.constant 0 : index
    %0 = vector.load %arg1[%c0, %c0_0] : memref<32x64xf32, #tpu.memory_space<vmem>>, vector<32x64xf32>
    %c0_1 = arith.constant 0 : index
    %c0_2 = arith.constant 0 : index
    %1 = vector.load %arg2[%c0_1, %c0_2] : memref<1x64xf32, #tpu.memory_space<vmem>>, vector<1x64xf32>
    %2 = vector.shape_cast %1 : vector<1x64xf32> to vector<64xf32>
    %c0_3 = arith.constant 0 : index
    %c0_4 = arith.constant 0 : index
    %3 = vector.load %arg3[%c0_3, %c0_4] : memref<1x64xf32, #tpu.memory_space<vmem>>, vector<1x64xf32>
    %4 = vector.shape_cast %3 : vector<1x64xf32> to vector<64xf32>
    %cst = arith.constant dense<0.000000e+00> : vector<32xf32>
    %5 = vector.multi_reduction <add>, %0, %cst [1] : vector<32x64xf32> to vector<32xf32>
    %6 = vector.shape_cast %5 : vector<32xf32> to vector<32x1xf32>
    %cst_5 = arith.constant 6.400000e+01 : f32
    %7 = vector.broadcast %cst_5 : f32 to vector<32x1xf32>
    %8 = arith.divf %6, %7 : vector<32x1xf32>
    %9 = vector.broadcast %8 : vector<32x1xf32> to vector<32x64xf32>
    %10 = arith.subf %0, %9 : vector<32x64xf32>
    %11 = arith.mulf %10, %10 : vector<32x64xf32>
    %cst_6 = arith.constant dense<0.000000e+00> : vector<32xf32>
    %12 = vector.multi_reduction <add>, %11, %cst_6 [1] : vector<32x64xf32> to vector<32xf32>
    %13 = vector.shape_cast %12 : vector<32xf32> to vector<32x1xf32>
    %cst_7 = arith.constant 6.400000e+01 : f32
    %14 = vector.broadcast %cst_7 : f32 to vector<32x1xf32>
    %15 = arith.divf %13, %14 : vector<32x1xf32>
    %16 = vector.broadcast %8 : vector<32x1xf32> to vector<32x64xf32>
    %17 = arith.subf %0, %16 : vector<32x64xf32>
    %cst_8 = arith.constant 9.99999974E-6 : f32
    %18 = vector.broadcast %cst_8 : f32 to vector<32x1xf32>
    %19 = arith.addf %15, %18 : vector<32x1xf32>
    %20 = math.rsqrt %19 : vector<32x1xf32>
    %21 = vector.broadcast %20 : vector<32x1xf32> to vector<32x64xf32>
    %22 = arith.mulf %17, %21 : vector<32x64xf32>
    %23 = vector.shape_cast %2 : vector<64xf32> to vector<1x64xf32>
    %24 = vector.broadcast %23 : vector<1x64xf32> to vector<32x64xf32>
    %25 = arith.mulf %22, %24 : vector<32x64xf32>
    %26 = vector.shape_cast %4 : vector<64xf32> to vector<1x64xf32>
    %27 = vector.broadcast %26 : vector<1x64xf32> to vector<32x64xf32>
    %28 = arith.addf %25, %27 : vector<32x64xf32>
    %c0_9 = arith.constant 0 : index
    %c0_10 = arith.constant 0 : index
    %29 = vector.load %arg4[%c0_9, %c0_10] : memref<64x74xf32, #tpu.memory_space<vmem>>, vector<64x74xf32>
    %cst_11 = arith.constant dense<0.000000e+00> : vector<32x74xf32>
    %30 = tpu.matmul %28, %29, %cst_11 {dimension_numbers = #tpu.dot_dimension_numbers<[1], [0], [0], [1], [0, 0, 1, 1], [], []>} : vector<32x64xf32>, vector<64x74xf32>, vector<32x74xf32> -> vector<32x74xf32>
    %31 = vector.extract_strided_slice %30 {offsets = [0, 0], sizes = [32, 32], strides = [1, 1]} : vector<32x74xf32> to vector<32x32xf32>
    %c0_12 = arith.constant 0 : index
    %c0_13 = arith.constant 0 : index
    %32 = vector.load %arg5[%c0_12, %c0_13] : memref<1x32xf32, #tpu.memory_space<vmem>>, vector<1x32xf32>
    %33 = vector.shape_cast %32 : vector<1x32xf32> to vector<32xf32>
    %c0_14 = arith.constant 0 : index
    %c0_15 = arith.constant 0 : index
    %34 = vector.load %arg6[%c0_14, %c0_15] : memref<1x32xf32, #tpu.memory_space<vmem>>, vector<1x32xf32>
    %35 = vector.shape_cast %34 : vector<1x32xf32> to vector<32xf32>
    %cst_16 = arith.constant dense<0.000000e+00> : vector<32xf32>
    %36 = vector.multi_reduction <add>, %31, %cst_16 [1] : vector<32x32xf32> to vector<32xf32>
    %37 = vector.shape_cast %36 : vector<32xf32> to vector<32x1xf32>
    %cst_17 = arith.constant 3.200000e+01 : f32
    %38 = vector.broadcast %cst_17 : f32 to vector<32x1xf32>
    %39 = arith.divf %37, %38 : vector<32x1xf32>
    %40 = vector.broadcast %39 : vector<32x1xf32> to vector<32x32xf32>
    %41 = arith.subf %31, %40 : vector<32x32xf32>
    %42 = arith.mulf %41, %41 : vector<32x32xf32>
    %cst_18 = arith.constant dense<0.000000e+00> : vector<32xf32>
    %43 = vector.multi_reduction <add>, %42, %cst_18 [1] : vector<32x32xf32> to vector<32xf32>
    %44 = vector.shape_cast %43 : vector<32xf32> to vector<32x1xf32>
    %cst_19 = arith.constant 3.200000e+01 : f32
    %45 = vector.broadcast %cst_19 : f32 to vector<32x1xf32>
    %46 = arith.divf %44, %45 : vector<32x1xf32>
    %47 = vector.broadcast %39 : vector<32x1xf32> to vector<32x32xf32>
    %48 = arith.subf %31, %47 : vector<32x32xf32>
    %cst_20 = arith.constant 9.99999974E-6 : f32
    %49 = vector.broadcast %cst_20 : f32 to vector<32x1xf32>
    %50 = arith.addf %46, %49 : vector<32x1xf32>
    %51 = math.rsqrt %50 : vector<32x1xf32>
    %52 = vector.broadcast %51 : vector<32x1xf32> to vector<32x32xf32>
    %53 = arith.mulf %48, %52 : vector<32x32xf32>
    %54 = vector.shape_cast %33 : vector<32xf32> to vector<1x32xf32>
    %55 = vector.broadcast %54 : vector<1x32xf32> to vector<32x32xf32>
    %56 = arith.mulf %53, %55 : vector<32x32xf32>
    %57 = vector.shape_cast %35 : vector<32xf32> to vector<1x32xf32>
    %58 = vector.broadcast %57 : vector<1x32xf32> to vector<32x32xf32>
    %59 = arith.addf %56, %58 : vector<32x32xf32>
    %60 = vector.extract_strided_slice %30 {offsets = [0, 32], sizes = [32, 42], strides = [1, 1]} : vector<32x74xf32> to vector<32x42xf32>
    %c0_21 = arith.constant 0 : index
    %c0_22 = arith.constant 0 : index
    %61 = vector.load %arg7[%c0_21, %c0_22] : memref<1x42xf32, #tpu.memory_space<vmem>>, vector<1x42xf32>
    %62 = vector.shape_cast %61 : vector<1x42xf32> to vector<42xf32>
    %c0_23 = arith.constant 0 : index
    %c0_24 = arith.constant 0 : index
    %63 = vector.load %arg8[%c0_23, %c0_24] : memref<1x42xf32, #tpu.memory_space<vmem>>, vector<1x42xf32>
    %64 = vector.shape_cast %63 : vector<1x42xf32> to vector<42xf32>
    %cst_25 = arith.constant dense<0.000000e+00> : vector<32xf32>
    %65 = vector.multi_reduction <add>, %60, %cst_25 [1] : vector<32x42xf32> to vector<32xf32>
    %66 = vector.shape_cast %65 : vector<32xf32> to vector<32x1xf32>
    %cst_26 = arith.constant 4.200000e+01 : f32
    %67 = vector.broadcast %cst_26 : f32 to vector<32x1xf32>
    %68 = arith.divf %66, %67 : vector<32x1xf32>
    %69 = vector.broadcast %68 : vector<32x1xf32> to vector<32x42xf32>
    %70 = arith.subf %60, %69 : vector<32x42xf32>
    %71 = arith.mulf %70, %70 : vector<32x42xf32>
    %cst_27 = arith.constant dense<0.000000e+00> : vector<32xf32>
    %72 = vector.multi_reduction <add>, %71, %cst_27 [1] : vector<32x42xf32> to vector<32xf32>
    %73 = vector.shape_cast %72 : vector<32xf32> to vector<32x1xf32>
    %cst_28 = arith.constant 4.200000e+01 : f32
    %74 = vector.broadcast %cst_28 : f32 to vector<32x1xf32>
    %75 = arith.divf %73, %74 : vector<32x1xf32>
    %76 = vector.broadcast %68 : vector<32x1xf32> to vector<32x42xf32>
    %77 = arith.subf %60, %76 : vector<32x42xf32>
    %cst_29 = arith.constant 9.99999974E-6 : f32
    %78 = vector.broadcast %cst_29 : f32 to vector<32x1xf32>
    %79 = arith.addf %75, %78 : vector<32x1xf32>
    %80 = math.rsqrt %79 : vector<32x1xf32>
    %81 = vector.broadcast %80 : vector<32x1xf32> to vector<32x42xf32>
    %82 = arith.mulf %77, %81 : vector<32x42xf32>
    %83 = vector.shape_cast %62 : vector<42xf32> to vector<1x42xf32>
    %84 = vector.broadcast %83 : vector<1x42xf32> to vector<32x42xf32>
    %85 = arith.mulf %82, %84 : vector<32x42xf32>
    %86 = vector.shape_cast %64 : vector<42xf32> to vector<1x42xf32>
    %87 = vector.broadcast %86 : vector<1x42xf32> to vector<32x42xf32>
    %88 = arith.addf %85, %87 : vector<32x42xf32>
    %89 = vector.shape_cast %59 : vector<32x32xf32> to vector<1x32x32xf32>
    %90 = vector.shape_cast %89 : vector<1x32x32xf32> to vector<1x32x32xf32>
    %91 = vector.broadcast %90 : vector<1x32x32xf32> to vector<4x32x32xf32>
    %92 = vector.shape_cast %88 : vector<32x42xf32> to vector<1x32x42xf32>
    %93 = vector.shape_cast %92 : vector<1x32x42xf32> to vector<1x32x42xf32>
    %94 = vector.broadcast %93 : vector<1x32x42xf32> to vector<4x32x42xf32>
    %c0_30 = arith.constant 0 : index
    %c0_31 = arith.constant 0 : index
    %c0_32 = arith.constant 0 : index
    %95 = vector.load %arg9[%c0_30, %c0_31, %c0_32] : memref<4x32x16xf32, #tpu.memory_space<vmem>>, vector<4x32x16xf32>
    "tpu.trace_start"() <{level = 10 : i32, message = "hmk,hkd->hmd"}> : () -> ()
    %cst_33 = arith.constant dense<0.000000e+00> : vector<4x32x16xf32>
    %96 = tpu.matmul %91, %95, %cst_33 {dimension_numbers = #tpu.dot_dimension_numbers<[2], [1], [1], [2], [0, 0, 0, 1, 1, 2], [0], [0]>} : vector<4x32x32xf32>, vector<4x32x16xf32>, vector<4x32x16xf32> -> vector<4x32x16xf32>
    "tpu.trace_stop"() : () -> ()
    %c0_34 = arith.constant 0 : index
    %c0_35 = arith.constant 0 : index
    %c0_36 = arith.constant 0 : index
    %97 = vector.load %arg10[%c0_34, %c0_35, %c0_36] : memref<4x42x16xf32, #tpu.memory_space<vmem>>, vector<4x42x16xf32>
    "tpu.trace_start"() <{level = 10 : i32, message = "hmk,hkd->hmd"}> : () -> ()
    %cst_37 = arith.constant dense<0.000000e+00> : vector<4x32x16xf32>
    %98 = tpu.matmul %94, %97, %cst_37 {dimension_numbers = #tpu.dot_dimension_numbers<[2], [1], [1], [2], [0, 0, 0, 1, 1, 2], [0], [0]>} : vector<4x32x42xf32>, vector<4x42x16xf32>, vector<4x32x16xf32> -> vector<4x32x16xf32>
    "tpu.trace_stop"() : () -> ()
    %c0_38 = arith.constant 0 : index
    %c0_39 = arith.constant 0 : index
    %c0_40 = arith.constant 0 : index
    %99 = vector.load %arg11[%c0_38, %c0_39, %c0_40] : memref<4x42x16xf32, #tpu.memory_space<vmem>>, vector<4x42x16xf32>
    "tpu.trace_start"() <{level = 10 : i32, message = "hmk,hkd->hmd"}> : () -> ()
    %cst_41 = arith.constant dense<0.000000e+00> : vector<4x32x16xf32>
    %100 = tpu.matmul %94, %99, %cst_41 {dimension_numbers = #tpu.dot_dimension_numbers<[2], [1], [1], [2], [0, 0, 0, 1, 1, 2], [0], [0]>} : vector<4x32x42xf32>, vector<4x42x16xf32>, vector<4x32x16xf32> -> vector<4x32x16xf32>
    "tpu.trace_stop"() : () -> ()
    %101 = vector.shape_cast %96 : vector<4x32x16xf32> to vector<8x16x16xf32>
    %102 = vector.shape_cast %98 : vector<4x32x16xf32> to vector<8x16x16xf32>
    %103 = vector.shape_cast %100 : vector<4x32x16xf32> to vector<8x16x16xf32>
    %104 = tpu.iota {dimensions = array<i32: 0>} : vector<16x16xi32>
    %105 = tpu.iota {dimensions = array<i32: 1>} : vector<16x16xi32>
    %c0_i32 = arith.constant 0 : i32
    %106 = vector.broadcast %c0_i32 : i32 to vector<16x16xi32>
    %107 = arith.addi %104, %106 : vector<16x16xi32>
    %108 = arith.cmpi sle, %105, %107 : vector<16x16xi32>
    %cst_42 = arith.constant 0.000000e+00 : f32
    %cst_43 = arith.constant -1.000000e+30 : f32
    %109 = vector.broadcast %cst_42 : f32 to vector<16x16xf32>
    %110 = vector.broadcast %cst_43 : f32 to vector<16x16xf32>
    %111 = arith.select %108, %109, %110 : vector<16x16xi1>, vector<16x16xf32>
    "tpu.trace_start"() <{level = 10 : i32, message = "gqd,gkd->gqk"}> : () -> ()
    %cst_44 = arith.constant dense<0.000000e+00> : vector<8x16x16xf32>
    %112 = tpu.matmul %101, %102, %cst_44 {dimension_numbers = #tpu.dot_dimension_numbers<[2], [2], [1], [1], [0, 0, 0, 1, 1, 1], [0], [0]>} : vector<8x16x16xf32>, vector<8x16x16xf32>, vector<8x16x16xf32> -> vector<8x16x16xf32>
    "tpu.trace_stop"() : () -> ()
    %113 = vector.shape_cast %111 : vector<16x16xf32> to vector<1x16x16xf32>
    %114 = vector.broadcast %113 : vector<1x16x16xf32> to vector<8x16x16xf32>
    %115 = arith.addf %112, %114 : vector<8x16x16xf32>
    %cst_45 = arith.constant dense<0xFF800000> : vector<8x16xf32>
    %116 = vector.multi_reduction <maximumf>, %115, %cst_45 [2] : vector<8x16x16xf32> to vector<8x16xf32>
    %117 = vector.shape_cast %116 : vector<8x16xf32> to vector<8x16x1xf32>
    %118 = vector.broadcast %117 : vector<8x16x1xf32> to vector<8x16x16xf32>
    %119 = arith.subf %115, %118 : vector<8x16x16xf32>
    %120 = math.exp %119 : vector<8x16x16xf32>
    %cst_46 = arith.constant dense<0.000000e+00> : vector<8x16xf32>
    %121 = vector.multi_reduction <add>, %120, %cst_46 [2] : vector<8x16x16xf32> to vector<8x16xf32>
    %122 = vector.shape_cast %121 : vector<8x16xf32> to vector<8x16x1xf32>
    %123 = tpu.reciprocal %122 {approx = true} : vector<8x16x1xf32> -> vector<8x16x1xf32>
    %124 = vector.broadcast %123 : vector<8x16x1xf32> to vector<8x16x16xf32>
    %125 = arith.mulf %120, %124 : vector<8x16x16xf32>
    "tpu.trace_start"() <{level = 10 : i32, message = "gqk,gkd->gqd"}> : () -> ()
    %cst_47 = arith.constant dense<0.000000e+00> : vector<8x16x16xf32>
    %126 = tpu.matmul %125, %103, %cst_47 {dimension_numbers = #tpu.dot_dimension_numbers<[2], [1], [1], [2], [0, 0, 0, 1, 1, 2], [0], [0]>} : vector<8x16x16xf32>, vector<8x16x16xf32>, vector<8x16x16xf32> -> vector<8x16x16xf32>
    "tpu.trace_stop"() : () -> ()
    %127 = vector.shape_cast %126 : vector<8x16x16xf32> to vector<4x32x16xf32>
    %c0_48 = arith.constant 0 : index
    %c0_49 = arith.constant 0 : index
    %c0_50 = arith.constant 0 : index
    %128 = vector.load %arg12[%c0_48, %c0_49, %c0_50] : memref<4x16x64xf32, #tpu.memory_space<vmem>>, vector<4x16x64xf32>
    "tpu.trace_start"() <{level = 10 : i32, message = "hmd,hdn->hmn"}> : () -> ()
    %cst_51 = arith.constant dense<0.000000e+00> : vector<4x32x64xf32>
    %129 = tpu.matmul %127, %128, %cst_51 {dimension_numbers = #tpu.dot_dimension_numbers<[2], [1], [1], [2], [0, 0, 0, 1, 1, 2], [0], [0]>} : vector<4x32x16xf32>, vector<4x16x64xf32>, vector<4x32x64xf32> -> vector<4x32x64xf32>
    "tpu.trace_stop"() : () -> ()
    %cst_52 = arith.constant dense<0.000000e+00> : vector<32x64xf32>
    %130 = vector.multi_reduction <add>, %129, %cst_52 [0] : vector<4x32x64xf32> to vector<32x64xf32>
    %131 = arith.addf %0, %130 : vector<32x64xf32>
    %c0_53 = arith.constant 0 : index
    %c0_54 = arith.constant 0 : index
    %132 = vector.load %arg13[%c0_53, %c0_54] : memref<1x64xf32, #tpu.memory_space<vmem>>, vector<1x64xf32>
    %133 = vector.shape_cast %132 : vector<1x64xf32> to vector<64xf32>
    %c0_55 = arith.constant 0 : index
    %c0_56 = arith.constant 0 : index
    %134 = vector.load %arg14[%c0_55, %c0_56] : memref<1x64xf32, #tpu.memory_space<vmem>>, vector<1x64xf32>
    %135 = vector.shape_cast %134 : vector<1x64xf32> to vector<64xf32>
    %cst_57 = arith.constant dense<0.000000e+00> : vector<32xf32>
    %136 = vector.multi_reduction <add>, %131, %cst_57 [1] : vector<32x64xf32> to vector<32xf32>
    %137 = vector.shape_cast %136 : vector<32xf32> to vector<32x1xf32>
    %cst_58 = arith.constant 6.400000e+01 : f32
    %138 = vector.broadcast %cst_58 : f32 to vector<32x1xf32>
    %139 = arith.divf %137, %138 : vector<32x1xf32>
    %140 = vector.broadcast %139 : vector<32x1xf32> to vector<32x64xf32>
    %141 = arith.subf %131, %140 : vector<32x64xf32>
    %142 = arith.mulf %141, %141 : vector<32x64xf32>
    %cst_59 = arith.constant dense<0.000000e+00> : vector<32xf32>
    %143 = vector.multi_reduction <add>, %142, %cst_59 [1] : vector<32x64xf32> to vector<32xf32>
    %144 = vector.shape_cast %143 : vector<32xf32> to vector<32x1xf32>
    %cst_60 = arith.constant 6.400000e+01 : f32
    %145 = vector.broadcast %cst_60 : f32 to vector<32x1xf32>
    %146 = arith.divf %144, %145 : vector<32x1xf32>
    %147 = vector.broadcast %139 : vector<32x1xf32> to vector<32x64xf32>
    %148 = arith.subf %131, %147 : vector<32x64xf32>
    %cst_61 = arith.constant 9.99999974E-6 : f32
    %149 = vector.broadcast %cst_61 : f32 to vector<32x1xf32>
    %150 = arith.addf %146, %149 : vector<32x1xf32>
    %151 = math.rsqrt %150 : vector<32x1xf32>
    %152 = vector.broadcast %151 : vector<32x1xf32> to vector<32x64xf32>
    %153 = arith.mulf %148, %152 : vector<32x64xf32>
    %154 = vector.shape_cast %133 : vector<64xf32> to vector<1x64xf32>
    %155 = vector.broadcast %154 : vector<1x64xf32> to vector<32x64xf32>
    %156 = arith.mulf %153, %155 : vector<32x64xf32>
    %157 = vector.shape_cast %135 : vector<64xf32> to vector<1x64xf32>
    %158 = vector.broadcast %157 : vector<1x64xf32> to vector<32x64xf32>
    %159 = arith.addf %156, %158 : vector<32x64xf32>
    %c0_62 = arith.constant 0 : index
    %c0_63 = arith.constant 0 : index
    %160 = vector.load %arg15[%c0_62, %c0_63] : memref<64x256xf32, #tpu.memory_space<vmem>>, vector<64x256xf32>
    %cst_64 = arith.constant dense<0.000000e+00> : vector<32x256xf32>
    %161 = tpu.matmul %159, %160, %cst_64 {dimension_numbers = #tpu.dot_dimension_numbers<[1], [0], [0], [1], [0, 0, 1, 1], [], []>} : vector<32x64xf32>, vector<64x256xf32>, vector<32x256xf32> -> vector<32x256xf32>
    %c0_65 = arith.constant 0 : index
    %c0_66 = arith.constant 0 : index
    %162 = vector.load %arg16[%c0_65, %c0_66] : memref<1x256xf32, #tpu.memory_space<vmem>>, vector<1x256xf32>
    %163 = vector.shape_cast %162 : vector<1x256xf32> to vector<256xf32>
    %164 = vector.shape_cast %163 : vector<256xf32> to vector<1x256xf32>
    %165 = vector.broadcast %164 : vector<1x256xf32> to vector<32x256xf32>
    %166 = arith.addf %161, %165 : vector<32x256xf32>
    %cst_67 = arith.constant 0.000000e+00 : f32
    %167 = vector.broadcast %cst_67 : f32 to vector<32x256xf32>
    %168 = arith.maximumf %166, %167 : vector<32x256xf32>
    %c0_68 = arith.constant 0 : index
    %c0_69 = arith.constant 0 : index
    %169 = vector.load %arg17[%c0_68, %c0_69] : memref<256x64xf32, #tpu.memory_space<vmem>>, vector<256x64xf32>
    %cst_70 = arith.constant dense<0.000000e+00> : vector<32x64xf32>
    %170 = tpu.matmul %168, %169, %cst_70 {dimension_numbers = #tpu.dot_dimension_numbers<[1], [0], [0], [1], [0, 0, 1, 1], [], []>} : vector<32x256xf32>, vector<256x64xf32>, vector<32x64xf32> -> vector<32x64xf32>
    %171 = arith.addf %131, %170 : vector<32x64xf32>
    %c0_71 = arith.constant 0 : index
    %c0_72 = arith.constant 0 : index
    %172 = vector.load %arg18[%c0_71, %c0_72] : memref<1x64xf32, #tpu.memory_space<vmem>>, vector<1x64xf32>
    %173 = vector.shape_cast %172 : vector<1x64xf32> to vector<64xf32>
    %174 = vector.shape_cast %173 : vector<64xf32> to vector<1x64xf32>
    %175 = vector.broadcast %174 : vector<1x64xf32> to vector<32x64xf32>
    %176 = arith.addf %171, %175 : vector<32x64xf32>
    %cst_73 = arith.constant 0.000000e+00 : f32
    %177 = vector.broadcast %cst_73 : f32 to vector<32x22xf32>
    %178 = tpu.concatenate %176, %60, %177 in 1 : vector<32x64xf32>, vector<32x42xf32>, vector<32x22xf32> -> vector<32x128xf32>
    %c0_74 = arith.constant 0 : index
    %c0_75 = arith.constant 0 : index
    %179 = vector.load %arg19[%c0_74, %c0_75] : memref<32x128xf32, #tpu.memory_space<vmem>>, vector<32x128xf32>
    tpu.vector_store %arg19[%c0_74, %c0_75], %178 {strides = array<i32>} : memref<32x128xf32, #tpu.memory_space<vmem>>, vector<32x128xf32>,
    return
  }
  func.func @transform_0(%arg0: i32) -> (i32, i32) {
    %c0_i32 = arith.constant 0 : i32
    %c0_i32_0 = arith.constant 0 : i32
    return %arg0, %c0_i32 : i32, i32
  }
  func.func @transform_1(%arg0: i32) -> (i32, i32) {
    %c0_i32 = arith.constant 0 : i32
    %c0_i32_0 = arith.constant 0 : i32
    %c0_i32_1 = arith.constant 0 : i32
    return %c0_i32, %c0_i32_0 : i32, i32
  }
  func.func @transform_2(%arg0: i32) -> (i32, i32) {
    %c0_i32 = arith.constant 0 : i32
    %c0_i32_0 = arith.constant 0 : i32
    %c0_i32_1 = arith.constant 0 : i32
    return %c0_i32, %c0_i32_0 : i32, i32
  }
  func.func @transform_3(%arg0: i32) -> (i32, i32) {
    %c0_i32 = arith.constant 0 : i32
    %c0_i32_0 = arith.constant 0 : i32
    %c0_i32_1 = arith.constant 0 : i32
    return %c0_i32, %c0_i32_0 : i32, i32
  }
  func.func @transform_4(%arg0: i32) -> (i32, i32) {
    %c0_i32 = arith.constant 0 : i32
    %c0_i32_0 = arith.constant 0 : i32
    %c0_i32_1 = arith.constant 0 : i32
    return %c0_i32, %c0_i32_0 : i32, i32
  }
  func.func @transform_5(%arg0: i32) -> (i32, i32) {
    %c0_i32 = arith.constant 0 : i32
    %c0_i32_0 = arith.constant 0 : i32
    %c0_i32_1 = arith.constant 0 : i32
    return %c0_i32, %c0_i32_0 : i32, i32
  }
  func.func @transform_6(%arg0: i32) -> (i32, i32) {
    %c0_i32 = arith.constant 0 : i32
    %c0_i32_0 = arith.constant 0 : i32
    %c0_i32_1 = arith.constant 0 : i32
    return %c0_i32, %c0_i32_0 : i32, i32
  }
  func.func @transform_7(%arg0: i32) -> (i32, i32) {
    %c0_i32 = arith.constant 0 : i32
    %c0_i32_0 = arith.constant 0 : i32
    %c0_i32_1 = arith.constant 0 : i32
    return %c0_i32, %c0_i32_0 : i32, i32
  }
  func.func @transform_8(%arg0: i32) -> (i32, i32, i32) {
    %c0_i32 = arith.constant 0 : i32
    %c0_i32_0 = arith.constant 0 : i32
    %c0_i32_1 = arith.constant 0 : i32
    %c0_i32_2 = arith.constant 0 : i32
    return %c0_i32, %c0_i32_0, %c0_i32_1 : i32, i32, i32
  }
  func.func @transform_9(%arg0: i32) -> (i32, i32, i32) {
    %c0_i32 = arith.constant 0 : i32
    %c0_i32_0 = arith.constant 0 : i32
    %c0_i32_1 = arith.constant 0 : i32
    %c0_i32_2 = arith.constant 0 : i32
    return %c0_i32, %c0_i32_0, %c0_i32_1 : i32, i32, i32
  }
  func.func @transform_10(%arg0: i32) -> (i32, i32, i32) {
    %c0_i32 = arith.constant 0 : i32
    %c0_i32_0 = arith.constant 0 : i32
    %c0_i32_1 = arith.constant 0 : i32
    %c0_i32_2 = arith.constant 0 : i32
    return %c0_i32, %c0_i32_0, %c0_i32_1 : i32, i32, i32
  }
  func.func @transform_11(%arg0: i32) -> (i32, i32, i32) {
    %c0_i32 = arith.constant 0 : i32
    %c0_i32_0 = arith.constant 0 : i32
    %c0_i32_1 = arith.constant 0 : i32
    %c0_i32_2 = arith.constant 0 : i32
    return %c0_i32, %c0_i32_0, %c0_i32_1 : i32, i32, i32
  }
  func.func @transform_12(%arg0: i32) -> (i32, i32) {
    %c0_i32 = arith.constant 0 : i32
    %c0_i32_0 = arith.constant 0 : i32
    %c0_i32_1 = arith.constant 0 : i32
    return %c0_i32, %c0_i32_0 : i32, i32
  }
  func.func @transform_13(%arg0: i32) -> (i32, i32) {
    %c0_i32 = arith.constant 0 : i32
    %c0_i32_0 = arith.constant 0 : i32
    %c0_i32_1 = arith.constant 0 : i32
    return %c0_i32, %c0_i32_0 : i32, i32
  }
  func.func @transform_14(%arg0: i32) -> (i32, i32) {
    %c0_i32 = arith.constant 0 : i32
    %c0_i32_0 = arith.constant 0 : i32
    %c0_i32_1 = arith.constant 0 : i32
    return %c0_i32, %c0_i32_0 : i32, i32
  }
  func.func @transform_15(%arg0: i32) -> (i32, i32) {
    %c0_i32 = arith.constant 0 : i32
    %c0_i32_0 = arith.constant 0 : i32
    %c0_i32_1 = arith.constant 0 : i32
    return %c0_i32, %c0_i32_0 : i32, i32
  }
  func.func @transform_16(%arg0: i32) -> (i32, i32) {
    %c0_i32 = arith.constant 0 : i32
    %c0_i32_0 = arith.constant 0 : i32
    %c0_i32_1 = arith.constant 0 : i32
    return %c0_i32, %c0_i32_0 : i32, i32
  }
  func.func @transform_17(%arg0: i32) -> (i32, i32) {
    %c0_i32 = arith.constant 0 : i32
    %c0_i32_0 = arith.constant 0 : i32
    %c0_i32_1 = arith.constant 0 : i32
    return %c0_i32, %c0_i32_0 : i32, i32
  }
  func.func @transform_18(%arg0: i32) -> (i32, i32) {
    %c0_i32 = arith.constant 0 : i32
    %c0_i32_0 = arith.constant 0 : i32
    return %arg0, %c0_i32 : i32, i32
  }
}

</mosaic_0001>

<bundles_post_ra>
// kernel: transformer_decoder_block.1
= control target key start
LH: loop header
LB: loop body
LE: loop exit
PB: predicated region body
PF: predicated region fallthrough
CT: control target
= control target key end

     0   :  { %s6786_s0 = inlined_call_operand.hbm [shape: f32[32,64], index: 0, kind: input, shape index: {}]   ;;  %s6787_s1 = inlined_call_operand.hbm [shape: f32[1,64], index: 1, kind: input, shape index: {}]   ;;  %s6788_s2 = inlined_call_operand.hbm [shape: f32[1,64], index: 2, kind: input, shape index: {}]   ;;  %s6789_s3 = inlined_call_operand.hbm [shape: f32[64,74], index: 3, kind: input, shape index: {}]   ;;  %s6790_s4 = inlined_call_operand.hbm [shape: f32[1,32], index: 4, kind: input, shape index: {}]   ;;  %s6791_s5 = inlined_call_operand.hbm [shape: f32[1,32], index: 5, kind: input, shape index: {}]   ;;  %s6792_s6 = inlined_call_operand.hbm [shape: f32[1,42], index: 6, kind: input, shape index: {}]   ;;  %s6793_s7 = inlined_call_operand.hbm [shape: f32[1,42], index: 7, kind: input, shape index: {}]   ;;  %s6794_s8 = inlined_call_operand.hbm [shape: f32[4,32,16], index: 8, kind: input, shape index: {}]   ;;  %s6795_s9 = inlined_call_operand.hbm [shape: f32[4,42,16], index: 9, kind: input, shape index: {}]   ;;  %s6796_s10 = inlined_call_operand.hbm [shape: f32[4,42,16], index: 10, kind: input, shape index: {}]   ;;  %s6797_s11 = inlined_call_operand.hbm [shape: f32[4,16,64], index: 11, kind: input, shape index: {}]   ;;  %s6798_s12 = inlined_call_operand.hbm [shape: f32[1,64], index: 12, kind: input, shape index: {}]   ;;  %s6799_s13 = inlined_call_operand.hbm [shape: f32[1,64], index: 13, kind: input, shape index: {}]   ;;  %s6800_s14 = inlined_call_operand.hbm [shape: f32[64,256], index: 14, kind: input, shape index: {}]   ;;  %s6801_s15 = inlined_call_operand.hbm [shape: f32[1,256], index: 15, kind: input, shape index: {}]   ;;  %s6802_s16 = inlined_call_operand.hbm [shape: f32[256,64], index: 16, kind: input, shape index: {}]   ;;  %s6803_s17 = inlined_call_operand.hbm [shape: f32[1,64], index: 17, kind: input, shape index: {}]   ;;  %s6804_s18 = inlined_call_operand.hbm [shape: f32[32,128], index: 18, kind: output, shape index: {}]  }
   0x1   :  { %6808 = sst [smem:[#allocation43_spill]] %s6786_s0 }
   0x2   :  { %6809 = sst [smem:[#allocation44_spill]] %s6787_s1 }
   0x3   :  { %6810 = sst [smem:[#allocation45_spill]] %s6788_s2 }
   0x4   :  { %23 = vsyncpa [#allocation3], 0 }
   0x5   :  { %24 = vsyncpa [#allocation6], 0 }
   0x6   :  { %25 = vsyncpa [#allocation9], 0 }
   0x7   :  { %26 = vsyncpa [#allocation12], 0 }
   0x8   :  { %27 = vsyncpa [#allocation15], 0 }
   0x9   :  { %28 = vsyncpa [#allocation18], 0 }
   0xa   :  { %29 = vsyncpa [#allocation21], 0 }
   0xb   :  { %30 = vsyncpa [#allocation24], 0 }
   0xc   :  { %31 = vsyncpa [#allocation27], 0 }
   0xd   :  { %32 = vsyncpa [#allocation30], 0 }
   0xe   :  { %33 = vsyncpa [#allocation4], 0  ;;  %s5789_s27 = smov [#allocation5]   ;;  %s6811_s0 = sld [smem:[#allocation44_spill]] }
   0xf   :  { %s52_s28 = sshll.u32 %s5789_s27, 4  ;;  %s53_s28 = int_to_ptr.vmem [resolvable:$true] %s52_s28 }
  0x14   :  { %s5349_s19 = scalar_lea.hbm %s6811_s0, 16 }
  0x15   :  { %p5350_p0 = scmp.ne.s32.totalorder %s6811_s0, %s5349_s19  ;;  %p5353_p1 = scmp.lt.u32.totalorder %s5349_s19, %s6811_s0 }
  0x17   :  { %p5355_p2 = pnand %p5353_p1, %p5350_p0 }
  0x19   :  { %5358 = shalt.err (!%p5355_p2)
}
  0x1a   :  { %s5359_s2 = scalar_lea.vmem %s53_s28, 16  ;;  %s5363_s23 = scalar_lea.vmem %s53_s28, 32 }
  0x1b   :  { %p5360_p3 = scmp.ne.s32.totalorder %s53_s28, %s5359_s2  ;;  %p5364_p4 = scmp.lt.s32.totalorder %s53_s28, %s53_s28 }
  0x1c   :  { %p5365_p5 = scmp.lt.s32.totalorder %s5363_s23, %s5359_s2 }
  0x1e   :  { %p5366_p6 = por %p5365_p5, %p5364_p4 }
  0x20   :  { %p5367_p7 = pnand %p5366_p6, %p5360_p3 }
  0x22   :  { %5370 = shalt.err (!%p5367_p7)
}
  0x23   :  { %55 = dma.hbm_to_vmem [thread:$0]  %s6811_s0, 16, %s53_s28, [#allocation6]  }
  0x24   :  { %s5790_s26 = smov [#allocation8]   ;;  %s5791_s29 = smov [#allocation11]  }
  0x25   :  { %s71_s27 = sshll.u32 %s5790_s26, 4  ;;  %s94_s30 = sshll.u32 %s5791_s29, 4  ;;  %s72_s27 = int_to_ptr.vmem [resolvable:$true] %s71_s27  ;;  %s95_s30 = int_to_ptr.vmem [resolvable:$true] %s94_s30 }
  0x26   :  { %s5371_s20 = scalar_lea.hbm %s6789_s3, 1024 }
  0x27   :  { %p5372_p8 = scmp.ne.s32.totalorder %s6789_s3, %s5371_s20  ;;  %p5375_p9 = scmp.lt.u32.totalorder %s5371_s20, %s6789_s3 }
  0x29   :  { %p5377_p10 = pnand %p5375_p9, %p5372_p8 }
  0x2b   :  { %5380 = shalt.err (!%p5377_p10)
}
  0x2c   :  { %s5381_s28 = scalar_lea.vmem %s72_s27, 1024  ;;  %p5386_p12 = scmp.lt.s32.totalorder %s72_s27, %s72_s27 }
  0x2d   :  { %p5382_p11 = scmp.ne.s32.totalorder %s72_s27, %s5381_s28  ;;  %p5387_p13 = scmp.lt.s32.totalorder %s5381_s28, %s5381_s28 }
  0x2f   :  { %p5388_p0 = por %p5387_p13, %p5386_p12 }
  0x31   :  { %p5389_p1 = pnand %p5388_p0, %p5382_p11 }
  0x33   :  { %5392 = shalt.err (!%p5389_p1)
}
  0x34   :  { %s5792_s0 = smov 128   ;;  %s5793_s24 = smov 8  }
  0x35   :  { %77 = dma.hbm_to_vmem [thread:$0]  %s6789_s3, 1024, %s72_s27, [#allocation9], %s5792_s0, %s5792_s0, %s5793_s24  }
  0x36   :  { %s5393_s1 = scalar_lea.hbm %s6791_s5, 16 }
  0x37   :  { %p5394_p2 = scmp.ne.s32.totalorder %s6791_s5, %s5393_s1  ;;  %p5397_p3 = scmp.lt.u32.totalorder %s5393_s1, %s6791_s5 }
  0x39   :  { %p5399_p4 = pnand %p5397_p3, %p5394_p2 }
  0x3b   :  { %5402 = shalt.err (!%p5399_p4)
}
  0x3c   :  { %s5403_s23 = scalar_lea.vmem %s95_s30, 16  ;;  %s5407_s28 = scalar_lea.vmem %s95_s30, 32 }
  0x3d   :  { %p5404_p5 = scmp.ne.s32.totalorder %s95_s30, %s5403_s23  ;;  %p5408_p6 = scmp.lt.s32.totalorder %s95_s30, %s95_s30 }
  0x3e   :  { %p5409_p7 = scmp.lt.s32.totalorder %s5407_s28, %s5403_s23 }
  0x40   :  { %p5410_p8 = por %p5409_p7, %p5408_p6 }
  0x42   :  { %p5411_p9 = pnand %p5410_p8, %p5404_p5 }
  0x44   :  { %5414 = shalt.err (!%p5411_p9)
}
  0x45   :  { %97 = dma.hbm_to_vmem [thread:$0]  %s6791_s5, 16, %s95_s30, [#allocation12]  }
  0x46   :  { %s5794_s25 = smov [#allocation14]   ;;  %s5795_s29 = smov [#allocation17]  }
  0x47   :  { %s114_s26 = sshll.u32 %s5794_s25, 4  ;;  %s135_s19 = sshll.u32 %s5795_s29, 4  ;;  %s115_s26 = int_to_ptr.vmem [resolvable:$true] %s114_s26  ;;  %s136_s19 = int_to_ptr.vmem [resolvable:$true] %s135_s19 }
  0x48   :  { %s5415_s21 = scalar_lea.hbm %s6793_s7, 16 }
  0x49   :  { %p5416_p10 = scmp.ne.s32.totalorder %s6793_s7, %s5415_s21  ;;  %p5419_p11 = scmp.lt.u32.totalorder %s5415_s21, %s6793_s7 }
  0x4b   :  { %p5421_p12 = pnand %p5419_p11, %p5416_p10 }
  0x4d   :  { %5424 = shalt.err (!%p5421_p12)
}
  0x4e   :  { %s5425_s5 = scalar_lea.vmem %s115_s26, 16  ;;  %s5429_s30 = scalar_lea.vmem %s115_s26, 32 }
  0x4f   :  { %p5426_p13 = scmp.ne.s32.totalorder %s115_s26, %s5425_s5  ;;  %p5430_p0 = scmp.lt.s32.totalorder %s115_s26, %s115_s26 }
  0x50   :  { %p5431_p1 = scmp.lt.s32.totalorder %s5429_s30, %s5425_s5 }
  0x52   :  { %p5432_p2 = por %p5431_p1, %p5430_p0 }
  0x54   :  { %p5433_p3 = pnand %p5432_p2, %p5426_p13 }
  0x56   :  { %5436 = shalt.err (!%p5433_p3)
}
  0x57   :  { %117 = dma.hbm_to_vmem [thread:$0]  %s6793_s7, 16, %s115_s26, [#allocation15]  }
  0x58   :  { %s5437_s1 = scalar_lea.hbm %s6795_s9, 3072 }
  0x59   :  { %p5438_p4 = scmp.ne.s32.totalorder %s6795_s9, %s5437_s1  ;;  %p5441_p5 = scmp.lt.u32.totalorder %s5437_s1, %s6795_s9 }
  0x5b   :  { %p5443_p6 = pnand %p5441_p5, %p5438_p4 }
  0x5d   :  { %5446 = shalt.err (!%p5443_p6)
}
  0x5e   :  { %s5447_s23 = scalar_lea.vmem %s136_s19, 3072  ;;  %p5452_p8 = scmp.lt.s32.totalorder %s136_s19, %s136_s19 }
  0x5f   :  { %p5448_p7 = scmp.ne.s32.totalorder %s136_s19, %s5447_s23  ;;  %p5453_p9 = scmp.lt.s32.totalorder %s5447_s23, %s5447_s23 }
  0x61   :  { %p5454_p10 = por %p5453_p9, %p5452_p8 }
  0x63   :  { %p5455_p11 = pnand %p5454_p10, %p5448_p7 }
  0x65   :  { %5458 = shalt.err (!%p5455_p11)
}
  0x66   :  { %141 = dma.hbm_to_vmem [thread:$0]  %s6795_s9, 3072, %s136_s19, [#allocation18], %s5792_s0, %s5792_s0, %s5793_s24  }
  0x67   :  { %s5796_s28 = smov [#allocation20]   ;;  %s5797_s30 = smov [#allocation23]  }
  0x68   :  { %s159_s5 = sshll.u32 %s5796_s28, 4  ;;  %s182_s3 = sshll.u32 %s5797_s30, 4  ;;  %s160_s5 = int_to_ptr.vmem [resolvable:$true] %s159_s5  ;;  %s183_s3 = int_to_ptr.vmem [resolvable:$true] %s182_s3 }
  0x69   :  { %s5459_s29 = scalar_lea.hbm %s6797_s11, 1024 }
  0x6a   :  { %p5460_p12 = scmp.ne.s32.totalorder %s6797_s11, %s5459_s29  ;;  %p5463_p13 = scmp.lt.u32.totalorder %s5459_s29, %s6797_s11 }
  0x6c   :  { %p5465_p0 = pnand %p5463_p13, %p5460_p12 }
  0x6e   :  { %5468 = shalt.err (!%p5465_p0)
}
  0x6f   :  { %s5469_s9 = scalar_lea.vmem %s160_s5, 1024  ;;  %p5474_p2 = scmp.lt.s32.totalorder %s160_s5, %s160_s5 }
  0x70   :  { %p5470_p1 = scmp.ne.s32.totalorder %s160_s5, %s5469_s9  ;;  %p5475_p3 = scmp.lt.s32.totalorder %s5469_s9, %s5469_s9 }
  0x72   :  { %p5476_p4 = por %p5475_p3, %p5474_p2 }
  0x74   :  { %p5477_p5 = pnand %p5476_p4, %p5470_p1 }
  0x76   :  { %5480 = shalt.err (!%p5477_p5)
}
  0x77   :  { %165 = dma.hbm_to_vmem [thread:$0]  %s6797_s11, 1024, %s160_s5, [#allocation21], %s5792_s0, %s5792_s0, %s5793_s24  }
  0x78   :  { %s5481_s26 = scalar_lea.hbm %s6799_s13, 16 }
  0x79   :  { %p5482_p6 = scmp.ne.s32.totalorder %s6799_s13, %s5481_s26  ;;  %p5485_p7 = scmp.lt.u32.totalorder %s5481_s26, %s6799_s13 }
  0x7b   :  { %p5487_p8 = pnand %p5485_p7, %p5482_p6 }
  0x7d   :  { %5490 = shalt.err (!%p5487_p8)
}
  0x7e   :  { %s5491_s29 = scalar_lea.vmem %s183_s3, 16  ;;  %s5495_s1 = scalar_lea.vmem %s183_s3, 32 }
  0x7f   :  { %p5492_p9 = scmp.ne.s32.totalorder %s183_s3, %s5491_s29  ;;  %p5496_p10 = scmp.lt.s32.totalorder %s183_s3, %s183_s3 }
  0x80   :  { %p5497_p11 = scmp.lt.s32.totalorder %s5495_s1, %s5491_s29 }
  0x82   :  { %p5498_p12 = por %p5497_p11, %p5496_p10 }
  0x84   :  { %p5499_p13 = pnand %p5498_p12, %p5492_p9 }
  0x86   :  { %5502 = shalt.err (!%p5499_p13)
}
  0x87   :  { %185 = dma.hbm_to_vmem [thread:$0]  %s6799_s13, 16, %s183_s3, [#allocation24]  }
  0x88   :  { %s5798_s20 = smov [#allocation26]   ;;  %s5799_s22 = smov [#allocation2]  }
  0x89   :  { %s204_s21 = sshll.u32 %s5798_s20, 4  ;;  %s39_s9 = sshll.u32 %s5799_s22, 4  ;;  %s205_s21 = int_to_ptr.vmem [resolvable:$true] %s204_s21  ;;  %s40_s9 = int_to_ptr.vmem [resolvable:$true] %s39_s9 }
  0x8a   :  { %s5503_s23 = scalar_lea.hbm %s6801_s15, 32 }
  0x8b   :  { %p5504_p0 = scmp.ne.s32.totalorder %s6801_s15, %s5503_s23  ;;  %p5507_p1 = scmp.lt.u32.totalorder %s5503_s23, %s6801_s15 }
  0x8d   :  { %p5509_p2 = pnand %p5507_p1, %p5504_p0 }
  0x8f   :  { %5512 = shalt.err (!%p5509_p2)
}
  0x90   :  { %s5513_s13 = scalar_lea.vmem %s205_s21, 32  ;;  %p5518_p4 = scmp.lt.s32.totalorder %s205_s21, %s205_s21 }
  0x91   :  { %p5514_p3 = scmp.ne.s32.totalorder %s205_s21, %s5513_s13  ;;  %p5519_p5 = scmp.lt.s32.totalorder %s5513_s13, %s5513_s13 }
  0x93   :  { %p5520_p6 = por %p5519_p5, %p5518_p4 }
  0x95   :  { %p5521_p7 = pnand %p5520_p6, %p5514_p3 }
  0x97   :  { %5524 = shalt.err (!%p5521_p7)
}
  0x98   :  { %207 = dma.hbm_to_vmem [thread:$0]  %s6801_s15, 32, %s205_s21, [#allocation27]  }
  0x99   :  { %s6812_s1 = sld [smem:[#allocation43_spill]] }
  0x9f   :  { %s5525_s11 = scalar_lea.hbm %s6812_s1, 512 }
  0xa0   :  { %p5526_p8 = scmp.ne.s32.totalorder %s6812_s1, %s5525_s11  ;;  %p5529_p9 = scmp.lt.u32.totalorder %s5525_s11, %s6812_s1 }
  0xa2   :  { %p5531_p10 = pnand %p5529_p9, %p5526_p8 }
  0xa4   :  { %5534 = shalt.err (!%p5531_p10)
}
  0xa5   :  { %s5535_s2 = scalar_lea.vmem %s40_s9, 512  ;;  %p5540_p12 = scmp.lt.s32.totalorder %s40_s9, %s40_s9 }
  0xa6   :  { %p5536_p11 = scmp.ne.s32.totalorder %s40_s9, %s5535_s2  ;;  %p5541_p13 = scmp.lt.s32.totalorder %s5535_s2, %s5535_s2 }
  0xa8   :  { %p5542_p0 = por %p5541_p13, %p5540_p12 }
  0xaa   :  { %p5543_p1 = pnand %p5542_p0, %p5536_p11 }
  0xac   :  { %5546 = shalt.err (!%p5543_p1)
}
  0xad   :  { %45 = dma.hbm_to_vmem [thread:$0]  %s6812_s1, 512, %s40_s9, [#allocation3], %s5792_s0, %s5792_s0, %s5793_s24  }
  0xae   :  { %s5800_s23 = smov [#allocation7]   ;;  %s5801_s26 = smov [#allocation10]  }
  0xaf   :  { %s62_s7 = sshll.u32 %s5800_s23, 4  ;;  %s84_s28 = sshll.u32 %s5801_s26, 4  ;;  %s63_s7 = int_to_ptr.vmem [resolvable:$true] %s62_s7  ;;  %s85_s28 = int_to_ptr.vmem [resolvable:$true] %s84_s28 }
  0xb0   :  { %s6813_s3 = sld [smem:[#allocation45_spill]] }
  0xb6   :  { %s5547_s27 = scalar_lea.hbm %s6813_s3, 16 }
  0xb7   :  { %p5548_p2 = scmp.ne.s32.totalorder %s6813_s3, %s5547_s27  ;;  %p5551_p3 = scmp.lt.u32.totalorder %s5547_s27, %s6813_s3 }
  0xb9   :  { %p5553_p4 = pnand %p5551_p3, %p5548_p2 }
  0xbb   :  { %5556 = shalt.err (!%p5553_p4)
}
  0xbc   :  { %s5557_s9 = scalar_lea.vmem %s63_s7, 16  ;;  %s5561_s1 = scalar_lea.vmem %s63_s7, 32 }
  0xbd   :  { %p5558_p5 = scmp.ne.s32.totalorder %s63_s7, %s5557_s9  ;;  %p5562_p6 = scmp.lt.s32.totalorder %s63_s7, %s63_s7 }
  0xbe   :  { %p5563_p7 = scmp.lt.s32.totalorder %s5561_s1, %s5557_s9 }
  0xc0   :  { %p5564_p8 = por %p5563_p7, %p5562_p6 }
  0xc2   :  { %p5565_p9 = pnand %p5564_p8, %p5558_p5 }
  0xc4   :  { %5568 = shalt.err (!%p5565_p9)
}
  0xc5   :  { %65 = dma.hbm_to_vmem [thread:$0]  %s6813_s3, 16, %s63_s7, [#allocation6]  }
  0xc6   :  { %s5569_s15 = scalar_lea.hbm %s6790_s4, 16 }
  0xc7   :  { %p5570_p10 = scmp.ne.s32.totalorder %s6790_s4, %s5569_s15  ;;  %p5573_p11 = scmp.lt.u32.totalorder %s5569_s15, %s6790_s4 }
  0xc9   :  { %p5575_p12 = pnand %p5573_p11, %p5570_p10 }
  0xcb   :  { %5578 = shalt.err (!%p5575_p12)
}
  0xcc   :  { %s5579_s13 = scalar_lea.vmem %s85_s28, 16  ;;  %s5583_s27 = scalar_lea.vmem %s85_s28, 32 }
  0xcd   :  { %p5580_p13 = scmp.ne.s32.totalorder %s85_s28, %s5579_s13  ;;  %p5584_p0 = scmp.lt.s32.totalorder %s85_s28, %s85_s28 }
  0xce   :  { %p5585_p1 = scmp.lt.s32.totalorder %s5583_s27, %s5579_s13 }
  0xd0   :  { %p5586_p2 = por %p5585_p1, %p5584_p0 }
  0xd2   :  { %p5587_p3 = pnand %p5586_p2, %p5580_p13 }
  0xd4   :  { %5590 = shalt.err (!%p5587_p3)
}
  0xd5   :  { %87 = dma.hbm_to_vmem [thread:$0]  %s6790_s4, 16, %s85_s28, [#allocation9]  }
  0xd6   :  { %s5802_s25 = smov [#allocation13]   ;;  %s5803_s11 = smov [#allocation16]  }
  0xd7   :  { %s104_s29 = sshll.u32 %s5802_s25, 4  ;;  %s123_s5 = sshll.u32 %s5803_s11, 4  ;;  %s105_s29 = int_to_ptr.vmem [resolvable:$true] %s104_s29  ;;  %s124_s5 = int_to_ptr.vmem [resolvable:$true] %s123_s5 }
  0xd8   :  { %s5591_s20 = scalar_lea.hbm %s6792_s6, 16 }
  0xd9   :  { %p5592_p4 = scmp.ne.s32.totalorder %s6792_s6, %s5591_s20  ;;  %p5595_p5 = scmp.lt.u32.totalorder %s5591_s20, %s6792_s6 }
  0xdb   :  { %p5597_p6 = pnand %p5595_p5, %p5592_p4 }
  0xdd   :  { %5600 = shalt.err (!%p5597_p6)
}
  0xde   :  { %s5601_s4 = scalar_lea.vmem %s105_s29, 16  ;;  %s5605_s28 = scalar_lea.vmem %s105_s29, 32 }
  0xdf   :  { %p5602_p7 = scmp.ne.s32.totalorder %s105_s29, %s5601_s4  ;;  %p5606_p8 = scmp.lt.s32.totalorder %s105_s29, %s105_s29 }
  0xe0   :  { %p5607_p9 = scmp.lt.s32.totalorder %s5605_s28, %s5601_s4 }
  0xe2   :  { %p5608_p10 = por %p5607_p9, %p5606_p8 }
  0xe4   :  { %p5609_p11 = pnand %p5608_p10, %p5602_p7 }
  0xe6   :  { %5612 = shalt.err (!%p5609_p11)
}
  0xe7   :  { %107 = dma.hbm_to_vmem [thread:$0]  %s6792_s6, 16, %s105_s29, [#allocation12]  }
  0xe8   :  { %s5613_s13 = scalar_lea.hbm %s6794_s8, 2048 }
  0xe9   :  { %p5614_p12 = scmp.ne.s32.totalorder %s6794_s8, %s5613_s13  ;;  %p5617_p13 = scmp.lt.u32.totalorder %s5613_s13, %s6794_s8 }
  0xeb   :  { %p5619_p0 = pnand %p5617_p13, %p5614_p12 }
  0xed   :  { %5622 = shalt.err (!%p5619_p0)
}
  0xee   :  { %s5623_s11 = scalar_lea.vmem %s124_s5, 2048  ;;  %p5628_p2 = scmp.lt.s32.totalorder %s124_s5, %s124_s5 }
  0xef   :  { %p5624_p1 = scmp.ne.s32.totalorder %s124_s5, %s5623_s11  ;;  %p5629_p3 = scmp.lt.s32.totalorder %s5623_s11, %s5623_s11 }
  0xf1   :  { %p5630_p4 = por %p5629_p3, %p5628_p2 }
  0xf3   :  { %p5631_p5 = pnand %p5630_p4, %p5624_p1 }
  0xf5   :  { %5634 = shalt.err (!%p5631_p5)
}
  0xf6   :  { %129 = dma.hbm_to_vmem [thread:$0]  %s6794_s8, 2048, %s124_s5, [#allocation15], %s5792_s0, %s5792_s0, %s5793_s24  }
  0xf7   :  { %s5804_s9 = smov [#allocation19]   ;;  %s5805_s20 = smov [#allocation22]  }
  0xf8   :  { %s147_s1 = sshll.u32 %s5804_s9, 4  ;;  %s172_s22 = sshll.u32 %s5805_s20, 4  ;;  %s148_s1 = int_to_ptr.vmem [resolvable:$true] %s147_s1  ;;  %s173_s22 = int_to_ptr.vmem [resolvable:$true] %s172_s22 }
  0xf9   :  { %s5635_s15 = scalar_lea.hbm %s6796_s10, 3072 }
  0xfa   :  { %p5636_p6 = scmp.ne.s32.totalorder %s6796_s10, %s5635_s15  ;;  %p5639_p7 = scmp.lt.u32.totalorder %s5635_s15, %s6796_s10 }
  0xfc   :  { %p5641_p8 = pnand %p5639_p7, %p5636_p6 }
  0xfe   :  { %5644 = shalt.err (!%p5641_p8)
}
  0xff   :  { %s5645_s8 = scalar_lea.vmem %s148_s1, 3072  ;;  %p5650_p10 = scmp.lt.s32.totalorder %s148_s1, %s148_s1 }
 0x100   :  { %p5646_p9 = scmp.ne.s32.totalorder %s148_s1, %s5645_s8  ;;  %p5651_p11 = scmp.lt.s32.totalorder %s5645_s8, %s5645_s8 }
 0x102   :  { %p5652_p12 = por %p5651_p11, %p5650_p10 }
 0x104   :  { %p5653_p13 = pnand %p5652_p12, %p5646_p9 }
 0x106   :  { %5656 = shalt.err (!%p5653_p13)
}
 0x107   :  { %153 = dma.hbm_to_vmem [thread:$0]  %s6796_s10, 3072, %s148_s1, [#allocation18], %s5792_s0, %s5792_s0, %s5793_s24  }
 0x108   :  { %s5657_s27 = scalar_lea.hbm %s6798_s12, 16 }
 0x109   :  { %p5658_p0 = scmp.ne.s32.totalorder %s6798_s12, %s5657_s27  ;;  %p5661_p1 = scmp.lt.u32.totalorder %s5657_s27, %s6798_s12 }
 0x10b   :  { %p5663_p2 = pnand %p5661_p1, %p5658_p0 }
 0x10d   :  { %5666 = shalt.err (!%p5663_p2)
}
 0x10e   :  { %s5667_s6 = scalar_lea.vmem %s173_s22, 16  ;;  %s5671_s29 = scalar_lea.vmem %s173_s22, 32 }
 0x10f   :  { %p5668_p3 = scmp.ne.s32.totalorder %s173_s22, %s5667_s6  ;;  %p5672_p4 = scmp.lt.s32.totalorder %s173_s22, %s173_s22 }
 0x110   :  { %p5673_p5 = scmp.lt.s32.totalorder %s5671_s29, %s5667_s6 }
 0x112   :  { %p5674_p6 = por %p5673_p5, %p5672_p4 }
 0x114   :  { %p5675_p7 = pnand %p5674_p6, %p5668_p3 }
 0x116   :  { %5678 = shalt.err (!%p5675_p7)
}
 0x117   :  { %175 = dma.hbm_to_vmem [thread:$0]  %s6798_s12, 16, %s173_s22, [#allocation21]  }
 0x118   :  { %s5806_s1 = smov [#allocation25]   ;;  %s5679_s15 = scalar_lea.hbm %s6800_s14, 2048 }
 0x119   :  { %s191_s20 = sshll.u32 %s5806_s1, 4  ;;  %p5680_p8 = scmp.ne.s32.totalorder %s6800_s14, %s5679_s15  ;;  %s192_s20 = int_to_ptr.vmem [resolvable:$true] %s191_s20 }
 0x11a   :  { %p5683_p9 = scmp.lt.u32.totalorder %s5679_s15, %s6800_s14 }
 0x11c   :  { %p5685_p10 = pnand %p5683_p9, %p5680_p8 }
 0x11e   :  { %5688 = shalt.err (!%p5685_p10)
}
 0x11f   :  { %s5689_s8 = scalar_lea.vmem %s192_s20, 2048  ;;  %p5694_p12 = scmp.lt.s32.totalorder %s192_s20, %s192_s20 }
 0x120   :  { %p5690_p11 = scmp.ne.s32.totalorder %s192_s20, %s5689_s8  ;;  %p5695_p13 = scmp.lt.s32.totalorder %s5689_s8, %s5689_s8 }
 0x122   :  { %p5696_p0 = por %p5695_p13, %p5694_p12 }
 0x124   :  { %p5697_p1 = pnand %p5696_p0, %p5690_p11 }
 0x126   :  { %5700 = shalt.err (!%p5697_p1)
}
 0x127   :  { %s5807_s12 = smov 256   ;;  %s5808_s22 = smov 16  }
 0x128   :  { %197 = dma.hbm_to_vmem [thread:$0]  %s6800_s14, 2048, %s192_s20, [#allocation24], %s5807_s12, %s5807_s12, %s5808_s22  }
 0x129   :  { %s5809_s30 = smov [#allocation28]   ;;  %s5810_s27 = smov [#allocation29]  }
 0x12a   :  { %s213_s13 = sshll.u32 %s5809_s30, 4  ;;  %s226_s7 = sshll.u32 %s5810_s27, 4  ;;  %s214_s13 = int_to_ptr.vmem [resolvable:$true] %s213_s13  ;;  %s227_s7 = int_to_ptr.vmem [resolvable:$true] %s226_s7 }
 0x12b   :  { %s5701_s11 = scalar_lea.hbm %s6802_s16, 4096 }
 0x12c   :  { %p5702_p2 = scmp.ne.s32.totalorder %s6802_s16, %s5701_s11  ;;  %p5705_p3 = scmp.lt.u32.totalorder %s5701_s11, %s6802_s16 }
 0x12e   :  { %p5707_p4 = pnand %p5705_p3, %p5702_p2 }
 0x130   :  { %5710 = shalt.err (!%p5707_p4)
}
 0x131   :  { %s5711_s14 = scalar_lea.vmem %s214_s13, 4096  ;;  %p5716_p6 = scmp.lt.s32.totalorder %s214_s13, %s214_s13 }
 0x132   :  { %p5712_p5 = scmp.ne.s32.totalorder %s214_s13, %s5711_s14  ;;  %p5717_p7 = scmp.lt.s32.totalorder %s5711_s14, %s5711_s14 }
 0x134   :  { %p5718_p8 = por %p5717_p7, %p5716_p6 }
 0x136   :  { %p5719_p9 = pnand %p5718_p8, %p5712_p5 }
 0x138   :  { %5722 = shalt.err (!%p5719_p9)
}
 0x139   :  { %219 = dma.hbm_to_vmem [thread:$0]  %s6802_s16, 4096, %s214_s13, [#allocation27], %s5792_s0, %s5792_s0, %s5793_s24  }
 0x13a   :  { %s5723_s15 = scalar_lea.hbm %s6803_s17, 16 }
 0x13b   :  { %p5724_p10 = scmp.ne.s32.totalorder %s6803_s17, %s5723_s15  ;;  %p5727_p11 = scmp.lt.u32.totalorder %s5723_s15, %s6803_s17 }
 0x13d   :  { %p5729_p12 = pnand %p5727_p11, %p5724_p10 }
 0x13f   :  { %5732 = shalt.err (!%p5729_p12)
}
 0x140   :  { %s5733_s8 = scalar_lea.vmem %s227_s7, 16  ;;  %s5737_s12 = scalar_lea.vmem %s227_s7, 32 }
 0x141   :  { %p5734_p13 = scmp.ne.s32.totalorder %s227_s7, %s5733_s8  ;;  %p5738_p0 = scmp.lt.s32.totalorder %s227_s7, %s227_s7 }
 0x142   :  { %p5739_p1 = scmp.lt.s32.totalorder %s5737_s12, %s5733_s8 }
 0x144   :  { %p5740_p2 = por %p5739_p1, %p5738_p0 }
 0x146   :  { %p5741_p3 = pnand %p5740_p2, %p5734_p13 }
 0x148   :  { %5744 = shalt.err (!%p5741_p3)
}
 0x149   :  { %229 = dma.hbm_to_vmem [thread:$0]  %s6803_s17, 16, %s227_s7, [#allocation30]  }
 0x14a   :  { %5767 = dma.done.wait [#allocation3], 512  }
 0x14b   :  { %5768 = vsyncadd [#allocation3], 4294966784 }
 0x14c   :  { %5769 = dma.done.wait [#allocation6], 32  }
 0x14d   :  { %5770 = vsyncadd [#allocation6], 4294967264 }
 0x14e   :  { %5771 = dma.done.wait [#allocation9], 1040  }
 0x14f   :  { %5772 = vsyncadd [#allocation9], 4294966256 }
 0x150   :  { %5773 = dma.done.wait [#allocation12], 32  }
 0x151   :  { %5774 = vsyncadd [#allocation12], 4294967264 }
 0x152   :  { %5775 = dma.done.wait [#allocation15], 2064  }
 0x153   :  { %5776 = vsyncadd [#allocation15], 4294965232 }
 0x154   :  { %5777 = dma.done.wait [#allocation18], 6144  }
 0x155   :  { %5778 = vsyncadd [#allocation18], 4294961152 }
 0x156   :  { %5779 = dma.done.wait [#allocation21], 1040  }
 0x157   :  { %5780 = vsyncadd [#allocation21], 4294966256 }
 0x158   :  { %5781 = dma.done.wait [#allocation24], 2064  }
 0x159   :  { %5782 = vsyncadd [#allocation24], 4294965232 }
 0x15a   :  { %5783 = dma.done.wait [#allocation27], 4128  }
 0x15b   :  { %5784 = vsyncadd [#allocation27], 4294963168 }
 0x15c   :  { %5785 = dma.done.wait [#allocation30], 16  }
 0x15d   :  { %5786 = vsyncadd [#allocation30], 4294967280  ;;  %vm290_vm0 = vcmask 523264   ;;  %v284_v0 = vld [vmem:[#allocation2] sm:$0xff]  ;;  %v286_v1 = vld [vmem:[#allocation2 + $0x10] sm:$0xff]  ;;  %s5811_s17 = smov 96  }
 0x15e   :  { %v285_v2 = vld [vmem:[#allocation2 + $0x8] sm:$0xff]  ;;  %v291_v3 = vsel %vm290_vm0, %v284_v0, 0.0  ;;  %v297_v4 = vsel %vm290_vm0, %v286_v1, 0.0  ;;  %v287_v5 = vld [vmem:[#allocation2 + $0x18] sm:$0xff]  ;;  %v4150_v53 = vld [vmem:[#allocation5] ss:$0 sm:$0xff] }
 0x15f   :  { %292 = vadd.xlane.f32.xlu0 %v291_v3  ;;  %298 = vadd.xlane.f32.xlu1 %v297_v4  ;;  %v294_v6 = vsel %vm290_vm0, %v285_v2, 0.0  ;;  %v300_v7 = vsel %vm290_vm0, %v287_v5, 0.0  ;;  %v364_v28 = vld [vmem:[#allocation8] sm:$0xff]  ;;  %v365_v29 = vld [vmem:[#allocation8 + $0x8] sm:$0xff]  ;;  %v366_v31 = vld [vmem:[#allocation8 + $0x10] sm:$0xff]  ;;  %vm563_vm1 = vcmask 343040  }
 0x160   :  { %v4917_v30 = vpack.c.bf16 %v365_v29, %v364_v28  ;;  %v367_v32 = vld [vmem:[#allocation8 + $0x18] sm:$0xff]  ;;  %v368_v34 = vld [vmem:[#allocation8 + $0x20] sm:$0xff]  ;;  %v369_v35 = vld [vmem:[#allocation8 + $0x28] sm:$0xff]  ;;  %vm471_vm2 = vcmask 261120   ;;  %s5812_s5 = smov 32   ;;  %vm1069_vm3 = vcmask 1041408  }
 0x161   :  { %v4921_v33 = vpack.c.bf16 %v367_v32, %v366_v31  ;;  %v4925_v36 = vpack.c.bf16 %v369_v35, %v368_v34  ;;  %v370_v37 = vld [vmem:[#allocation8 + $0x30] sm:$0xff]  ;;  %v371_v38 = vld [vmem:[#allocation8 + $0x38] sm:$0xff]  ;;  %vm5813_vm4 = vmmov 1   ;;  %vm1807_vm6 = vcmask 130048   ;;  %s5816_s26 = smov [#allocation31]  }
 0x162   :  { %4918 = vmatprep.subr.bf16.mxu0 %v4917_v30  ;;  %v4929_v39 = vpack.c.bf16 %v371_v38, %v370_v37  ;;  %v4151_v55 = vld [vmem:[#allocation7] ss:$0 sm:$0xff]  ;;  %vm6283_vm5 = vmpackc.low %vm1069_vm3, %vm5813_vm4  ;;  %vm4115_vm10 = vcmask 867328   ;;  %s4129_s30 = sshll.u32 %s5816_s26, 4  ;;  %s4130_s30 = int_to_ptr.vmem [resolvable:$true] %s4129_s30 }
 0x163   :  { %295 = vadd.xlane.f32.xlu0 %v294_v6  ;;  %301 = vadd.xlane.f32.xlu1 %v300_v7  ;;  %vm6406_vm7 = vmpackc.low %vm1807_vm6, %vm1807_vm6  ;;  %s5745_s13 = scalar_lea.vmem %s4130_s30, 512  ;;  %p5750_p5 = scmp.lt.s32.totalorder %s4130_s30, %s4130_s30 }
 0x164   :  { %4920 = vmatpush3.bf16.msra.mxu0 %v4917_v30  ;;  %p5746_p4 = scmp.ne.s32.totalorder %s4130_s30, %s5745_s13  ;;  %p5751_p6 = scmp.lt.s32.totalorder %s5745_s13, %s5745_s13 }
 0x165   :  { %4922 = vmatprep.subr.bf16.mxu0 %v4921_v33 }
 0x166   :  { %p5752_p7 = por %p5751_p6, %p5750_p5 }
 0x168   :  { %4924 = vmatpush3.bf16.msra.mxu0 %v4921_v33  ;;  %p5753_p8 = pnand %p5752_p7, %p5746_p4 }
 0x169   :  { %4926 = vmatprep.subr.bf16.mxu0 %v4925_v36 }
 0x16c   :  { %4928 = vmatpush3.bf16.msra.mxu0 %v4925_v36 }
 0x16d   :  { %4930 = vmatprep.subr.bf16.mxu0 %v4929_v39 }
 0x170   :  { %4932 = vmatpush3.bf16.msra.mxu0 %v4929_v39 }
 0x1ec   :  { %v293_v8 = vpop.xlane.xlu0 %292  ;;  %v299_v9 = vpop.xlane.xlu1 %298 }
 0x1ed   :  { %v304_v10 = vmul.f32 0.015625, %v293_v8  ;;  %v306_v11 = vmul.f32 0.015625, %v299_v9 }
 0x1ef   :  { %v308_v12 = vsub.f32 %v284_v0, %v304_v10  ;;  %v6153_v13 = vsub.f32 %v286_v1, %v306_v11 }
 0x1f0   :  { %v296_v14 = vpop.xlane.xlu0 %295  ;;  %v302_v15 = vpop.xlane.xlu1 %301 }
 0x1f1   :  { %v305_v16 = vmul.f32 0.015625, %v296_v14  ;;  %v307_v17 = vmul.f32 0.015625, %v302_v15  ;;  %v312_v18 = vmul.f32 %v308_v12, %v308_v12  ;;  %v314_v19 = vmul.f32 %v6153_v13, %v6153_v13 }
 0x1f3   :  { %v309_v20 = vsub.f32 %v285_v2, %v305_v16  ;;  %v311_v21 = vsub.f32 %v287_v5, %v307_v17  ;;  %v316_v22 = vsel %vm290_vm0, %v312_v18, 0.0  ;;  %v322_v23 = vsel %vm290_vm0, %v314_v19, 0.0 }
 0x1f4   :  { %317 = vadd.xlane.f32.xlu0 %v316_v22 }
 0x1f5   :  { %v313_v24 = vmul.f32 %v309_v20, %v309_v20  ;;  %v315_v25 = vmul.f32 %v311_v21, %v311_v21 }
 0x1f7   :  { %v319_v26 = vsel %vm290_vm0, %v313_v24, 0.0  ;;  %v325_v27 = vsel %vm290_vm0, %v315_v25, 0.0 }
 0x1f8   :  { %323 = vadd.xlane.f32.xlu0 %v322_v23  ;;  %320 = vadd.xlane.f32.xlu1 %v319_v26 }
 0x1fc   :  { %326 = vadd.xlane.f32.xlu1 %v325_v27 }
 0x281   :  { %v318_v40 = vpop.xlane.xlu0 %317 }
 0x282   :  { %v328_v41 = vmul.f32 0.015625, %v318_v40 }
 0x284   :  { %v332_v42 = vadd.f32 1e-05, %v328_v41 }
 0x285   :  { %v321_v43 = vpop.xlane.xlu1 %320  ;;  %v324_v44 = vpop.xlane.xlu0 %323 }
 0x286   :  { %5249 = vrsqrt.f32 %v332_v42  ;;  %v329_v45 = vmul.f32 0.015625, %v321_v43  ;;  %v330_v46 = vmul.f32 0.015625, %v324_v44 }
 0x288   :  { %v333_v47 = vadd.f32 1e-05, %v329_v45  ;;  %v334_v48 = vadd.f32 1e-05, %v330_v46 }
 0x289   :  { %v327_v49 = vpop.xlane.xlu1 %326 }
 0x28a   :  { %5251 = vrsqrt.f32 %v333_v47  ;;  %v331_v50 = vmul.f32 0.015625, %v327_v49  ;;  %v4159_v47 = vld [vmem:[#allocation14] ss:$0 sm:$0xff] }
 0x28b   :  { %5253 = vrsqrt.f32 %v334_v48  ;;  %v4158_v48 = vld [vmem:[#allocation13] ss:$0 sm:$0xff] }
 0x28c   :  { %v335_v51 = vadd.f32 1e-05, %v331_v50 }
 0x28e   :  { %5255 = vrsqrt.f32 %v335_v51 }
 0x290   :  { %v5250_v52 = vpop.eup %5249 }
 0x291   :  { %v340_v54 = vmul.f32 %v5250_v52, %v308_v12 }
 0x293   :  { %v350_v56 = vmul.f32 %v4150_v53, %v340_v54 }
 0x294   :  { %v5252_v57 = vpop.eup %5251 }
 0x295   :  { %v5254_v58 = vpop.eup %5253  ;;  %v360_v59 = vadd.f32 %v4151_v55, %v350_v56  ;;  %v341_v60 = vmul.f32 %v5252_v57, %v309_v20 }
 0x296   :  { %v342_v61 = vmul.f32 %v5254_v58, %v6153_v13 }
 0x297   :  { %4559 = vmatprep.mubr.msk.f32.mxu0 %vm290_vm0, %v360_v59  ;;  %v351_v62 = vmul.f32 %v4150_v53, %v341_v60 }
 0x298   :  { %v5256_v63 = vpop.eup %5255  ;;  %v352_v0 = vmul.f32 %v4150_v53, %v342_v61 }
 0x299   :  { %v361_v1 = vadd.f32 %v4151_v55, %v351_v62  ;;  %v343_v2 = vmul.f32 %v5256_v63, %v311_v21 }
 0x29a   :  { %v362_v3 = vadd.f32 %v4151_v55, %v352_v0 }
 0x29b   :  { %4560 = vmatmul.mubr.msk.f32.vlgmr.msra.gmra.mrb[0].mxu0 %vm290_vm0, %v361_v1  ;;  %v353_v4 = vmul.f32 %v4150_v53, %v343_v2 }
 0x29c   :  { %4562 = vmatprep.mubr.msk.f32.mxu0 %vm290_vm0, %v362_v3 }
 0x29d   :  { %v363_v5 = vadd.f32 %v4151_v55, %v353_v4  ;;  %v657_v4 = vld [vmem:[#allocation16] sm:$0xff] }
 0x29f   :  { %4563 = vmatmul.mubr.msk.f32.gmra.mrb[2].mxu0 %vm290_vm0, %v363_v5  ;;  %v658_v5 = vld [vmem:[#allocation16 + $0x8] sm:$0xff] }
 0x36e   :  { %v6166_v6 = vpop.f32.mrb[0].mxu0 }
 0x36f   :  { %553 = vrot.lane.b32.xlu1 %v6166_v6, %s5811_s17  ;;  %v6170_v7 = vpop.f32.mrb[1].mxu0  ;;  %v475_v37 = vsel %vm471_vm2, %v6166_v6, 0.0 }
 0x370   :  { %551 = vrot.lane.b32.xlu0 %v6170_v7, %s5811_s17  ;;  %v472_v18 = vsel %vm471_vm2, %v6170_v7, 0.0 }
 0x372   :  { %v6174_v8 = vpop.f32.mrb[2].mxu0 }
 0x373   :  { %v6176_v9 = vpop.f32.mrb[3].mxu0  ;;  %v481_v36 = vsel %vm471_vm2, %v6174_v8, 0.0 }
 0x374   :  { %555 = vrot.lane.b32.xlu1 %v6176_v9, %s5811_s17  ;;  %v478_v35 = vsel %vm471_vm2, %v6176_v9, 0.0 }
 0x378   :  { %557 = vrot.lane.b32.xlu1 %v6174_v8, %s5811_s17 }
 0x3e1   :  { %v554_v10 = vpop.permute.xlu1 %553 }
 0x3e2   :  { %v552_v11 = vpop.permute.xlu0 %551  ;;  %v567_v12 = vsel %vm563_vm1, %v554_v10, 0.0  ;;  %v661_v10 = vld [vmem:[#allocation16 + $0x20] sm:$0xff] }
 0x3e3   :  { %568 = vadd.xlane.f32.xlu1 %v567_v12  ;;  %v564_v13 = vsel %vm563_vm1, %v552_v11, 0.0  ;;  %v4933_v11 = vpack.c.bf16 %v658_v5, %v657_v4  ;;  %v662_v12 = vld [vmem:[#allocation16 + $0x28] sm:$0xff]  ;;  %v4157_v5 = vld [vmem:[#allocation11] ss:$0 sm:$0xff] }
 0x3e4   :  { %565 = vadd.xlane.f32.xlu0 %v564_v13  ;;  %v4941_v13 = vpack.c.bf16 %v662_v12, %v661_v10 }
 0x3e5   :  { %4934 = vmatprep.subr.bf16.mxu0 %v4933_v11 }
 0x3e6   :  { %v556_v14 = vpop.permute.xlu1 %555  ;;  %4942 = vmatprep.subr.bf16.mxu1 %v4941_v13  ;;  %4936 = vmatpush3.bf16.msra.mxu0 %v4933_v11 }
 0x3e7   :  { %v570_v15 = vsel %vm563_vm1, %v556_v14, 0.0  ;;  %v659_v14 = vld [vmem:[#allocation16 + $0x10] sm:$0xff]  ;;  %4944 = vmatpush3.bf16.msra.mxu1 %v4941_v13 }
 0x3e8   :  { %571 = vadd.xlane.f32.xlu0 %v570_v15  ;;  %v660_v15 = vld [vmem:[#allocation16 + $0x18] sm:$0xff] }
 0x3ea   :  { %v558_v16 = vpop.permute.xlu1 %557 }
 0x3eb   :  { %v573_v17 = vsel %vm563_vm1, %v558_v16, 0.0  ;;  %v663_v16 = vld [vmem:[#allocation16 + $0x30] sm:$0xff] }
 0x3ec   :  { %574 = vadd.xlane.f32.xlu0 %v573_v17  ;;  %v4937_v17 = vpack.c.bf16 %v660_v15, %v659_v14 }
 0x3ee   :  { %4938 = vmatprep.subr.bf16.mxu0 %v4937_v17 }
 0x3ef   :  { %4940 = vmatpush3.bf16.msra.mxu0 %v4937_v17 }
 0x3f0   :  { %473 = vadd.xlane.f32.xlu0 %v472_v18  ;;  %v664_v18 = vld [vmem:[#allocation16 + $0x38] sm:$0xff] }
 0x470   :  { %v569_v19 = vpop.xlane.xlu1 %568 }
 0x471   :  { %v578_v20 = vmul.f32 0.023809524, %v569_v19  ;;  %v566_v21 = vpop.xlane.xlu0 %565  ;;  %v4945_v19 = vpack.c.bf16 %v664_v18, %v663_v16 }
 0x472   :  { %v577_v22 = vmul.f32 0.023809524, %v566_v21  ;;  %v666_v21 = vld [vmem:[#allocation16 + $0x48] sm:$0xff] }
 0x473   :  { %v6189_v23 = vsub.f32 %v6166_v6, %v578_v20  ;;  %4946 = vmatprep.subr.bf16.mxu1 %v4945_v19  ;;  %v665_v20 = vld [vmem:[#allocation16 + $0x40] sm:$0xff] }
 0x474   :  { %v6192_v24 = vsub.f32 %v6170_v7, %v577_v22  ;;  %4948 = vmatpush3.bf16.msra.mxu1 %v4945_v19  ;;  %v669_v22 = vld [vmem:[#allocation16 + $0x60] sm:$0xff] }
 0x475   :  { %v572_v25 = vpop.xlane.xlu0 %571  ;;  %v586_v26 = vmul.f32 %v6189_v23, %v6189_v23 }
 0x476   :  { %v585_v27 = vmul.f32 %v6192_v24, %v6192_v24  ;;  %v579_v29 = vmul.f32 0.023809524, %v572_v25  ;;  %v6248_v25 = vpack.c.bf16 %v666_v21, %v665_v20  ;;  %v667_v20 = vld [vmem:[#allocation16 + $0x50] sm:$0xff] }
 0x477   :  { %595 = vrot.lane.b32.xlu1 %v586_v26, %s5811_s17  ;;  %v670_v26 = vld [vmem:[#allocation16 + $0x68] sm:$0xff] }
 0x478   :  { %593 = vrot.lane.b32.xlu0 %v585_v27, %s5811_s17  ;;  %v6204_v32 = vsub.f32 %v6176_v9, %v579_v29  ;;  %v6250_v27 = vpack.c.bf16 %v670_v26, %v669_v22  ;;  %4950 = vmatprep.subr.bf16.mxu0 %v6248_v25  ;;  %v668_v22 = vld [vmem:[#allocation16 + $0x58] sm:$0xff]  ;;  %v671_v26 = vld [vmem:[#allocation16 + $0x70] sm:$0xff] }
 0x479   :  { %v575_v28 = vpop.xlane.xlu0 %574 }
 0x47a   :  { %v580_v30 = vmul.f32 0.023809524, %v575_v28  ;;  %v587_v34 = vmul.f32 %v6204_v32, %v6204_v32  ;;  %4958 = vmatprep.subr.bf16.mxu1 %v6250_v27 }
 0x47c   :  { %v6201_v31 = vsub.f32 %v6174_v8, %v580_v30 }
 0x47d   :  { %v474_v38 = vpop.xlane.xlu0 %473 }
 0x47e   :  { %v588_v33 = vmul.f32 %v6201_v31, %v6201_v31  ;;  %v485_v49 = vmul.f32 0.03125, %v474_v38 }
 0x480   :  { %599 = vrot.lane.b32.xlu1 %v588_v33, %s5811_s17  ;;  %v6225_v50 = vsub.f32 %v6170_v7, %v485_v49 }
 0x482   :  { %v493_v52 = vmul.f32 %v6225_v50, %v6225_v50 }
 0x484   :  { %597 = vrot.lane.b32.xlu1 %v587_v34, %s5811_s17  ;;  %v497_v54 = vsel %vm471_vm2, %v493_v52, 0.0 }
 0x497   :  { %479 = vadd.xlane.f32.xlu0 %v478_v35 }
 0x49b   :  { %482 = vadd.xlane.f32.xlu0 %v481_v36 }
 0x4a8   :  { %476 = vadd.xlane.f32.xlu1 %v475_v37 }
 0x4e9   :  { %v596_v39 = vpop.permute.xlu1 %595 }
 0x4ea   :  { %v594_v40 = vpop.permute.xlu0 %593  ;;  %v608_v41 = vsel %vm563_vm1, %v596_v39, 0.0 }
 0x4eb   :  { %609 = vadd.xlane.f32.xlu1 %v608_v41  ;;  %v605_v42 = vsel %vm563_vm1, %v594_v40, 0.0 }
 0x4ec   :  { %606 = vadd.xlane.f32.xlu0 %v605_v42 }
 0x4f2   :  { %v600_v43 = vpop.permute.xlu1 %599 }
 0x4f3   :  { %v614_v44 = vsel %vm563_vm1, %v600_v43, 0.0 }
 0x4f4   :  { %615 = vadd.xlane.f32.xlu1 %v614_v44 }
 0x4f6   :  { %v598_v45 = vpop.permute.xlu1 %597 }
 0x4f7   :  { %v611_v46 = vsel %vm563_vm1, %v598_v45, 0.0 }
 0x4f8   :  { %612 = vadd.xlane.f32.xlu0 %v611_v46 }
 0x505   :  { %650 = vrot.lane.b32.xlu1 %v4159_v47, %s5812_s5 }
 0x50e   :  { %638 = vrot.lane.b32.xlu0 %v4158_v48, %s5812_s5 }
 0x524   :  { %v480_v51 = vpop.xlane.xlu0 %479 }
 0x525   :  { %v487_v59 = vmul.f32 0.03125, %v480_v51 }
 0x527   :  { %v6237_v62 = vsub.f32 %v6176_v9, %v487_v59 }
 0x528   :  { %v483_v53 = vpop.xlane.xlu0 %482 }
 0x529   :  { %v488_v55 = vmul.f32 0.03125, %v483_v53  ;;  %498 = vadd.xlane.f32.xlu1 %v497_v54  ;;  %v495_v2 = vmul.f32 %v6237_v62, %v6237_v62 }
 0x52b   :  { %v6231_v56 = vsub.f32 %v6174_v8, %v488_v55  ;;  %v503_v3 = vsel %vm471_vm2, %v495_v2, 0.0 }
 0x52d   :  { %v496_v57 = vmul.f32 %v6231_v56, %v6231_v56 }
 0x52f   :  { %v506_v58 = vsel %vm471_vm2, %v496_v57, 0.0 }
 0x530   :  { %507 = vadd.xlane.f32.xlu1 %v506_v58 }
 0x535   :  { %v477_v60 = vpop.xlane.xlu1 %476 }
 0x536   :  { %v486_v61 = vmul.f32 0.03125, %v477_v60 }
 0x538   :  { %v6240_v63 = vsub.f32 %v6166_v6, %v486_v61 }
 0x53a   :  { %v494_v0 = vmul.f32 %v6240_v63, %v6240_v63 }
 0x53c   :  { %v500_v1 = vsel %vm471_vm2, %v494_v0, 0.0 }
 0x53d   :  { %501 = vadd.xlane.f32.xlu0 %v500_v1 }
 0x541   :  { %504 = vadd.xlane.f32.xlu0 %v503_v3  ;;  %v4156_v3 = vld [vmem:[#allocation10] ss:$0 sm:$0xff] }
 0x578   :  { %v610_v28 = vpop.xlane.xlu1 %609 }
 0x579   :  { %v618_v29 = vmul.f32 0.023809524, %v610_v28  ;;  %v607_v30 = vpop.xlane.xlu0 %606  ;;  %v672_v28 = vld [vmem:[#allocation16 + $0x78] sm:$0xff] }
 0x57a   :  { %v617_v33 = vmul.f32 0.023809524, %v607_v30 }
 0x57b   :  { %v622_v34 = vadd.f32 1e-05, %v618_v29 }
 0x57c   :  { %v621_v35 = vadd.f32 1e-05, %v617_v33 }
 0x57d   :  { %5257 = vrsqrt.f32 %v622_v34 }
 0x57e   :  { %5259 = vrsqrt.f32 %v621_v35  ;;  %v4953_v35 = vpack.c.bf16 %v668_v22, %v667_v20  ;;  %v1424_v22 = vld [vmem:[#allocation19 + $0x10] sm:$0xff] }
 0x581   :  { %v616_v36 = vpop.xlane.xlu1 %615 }
 0x582   :  { %v620_v37 = vmul.f32 0.023809524, %v616_v36  ;;  %v4961_v36 = vpack.c.bf16 %v672_v28, %v671_v26  ;;  %v1425_v26 = vld [vmem:[#allocation19 + $0x18] sm:$0xff]  ;;  %v1430_v28 = vld [vmem:[#allocation19 + $0x40] sm:$0xff] }
 0x584   :  { %v624_v38 = vadd.f32 1e-05, %v620_v37 }
 0x585   :  { %v613_v39 = vpop.xlane.xlu0 %612  ;;  %v651_v47 = vpop.permute.xlu1 %650 }
 0x586   :  { %v619_v40 = vmul.f32 0.023809524, %v613_v39  ;;  %5261 = vrsqrt.f32 %v624_v38  ;;  %v1031_v39 = vld [vmem:[#allocation17 + $0x30] sm:$0xff] }
 0x587   :  { %v5258_v41 = vpop.eup %5257 }
 0x588   :  { %v5260_v42 = vpop.eup %5259  ;;  %v623_v43 = vadd.f32 1e-05, %v619_v40  ;;  %v630_v44 = vmul.f32 %v5258_v41, %v6189_v23  ;;  %v1032_v40 = vld [vmem:[#allocation17 + $0x38] sm:$0xff] }
 0x589   :  { %v629_v45 = vmul.f32 %v5260_v42, %v6192_v24  ;;  %v639_v46 = vpop.permute.xlu0 %638 }
 0x58a   :  { %5263 = vrsqrt.f32 %v623_v43  ;;  %v642_v48 = vmul.f32 %v639_v46, %v630_v44  ;;  %v4979_v43 = vpack.c.bf16 %v1032_v40, %v1031_v39  ;;  %v1028_v44 = vld [vmem:[#allocation17 + $0x18] sm:$0xff]  ;;  %v1435_v39 = vld [vmem:[#allocation19 + $0x68] sm:$0xff]  ;;  %v1440_v40 = vld [vmem:[#allocation19 + $0x90] sm:$0xff] }
 0x58b   :  { %v641_v49 = vmul.f32 %v639_v46, %v629_v45  ;;  %v1034_v45 = vld [vmem:[#allocation17 + $0x48] sm:$0xff] }
 0x58c   :  { %v654_v51 = vadd.f32 %v651_v47, %v642_v48  ;;  %v1029_v48 = vld [vmem:[#allocation17 + $0x20] sm:$0xff] }
 0x58d   :  { %v653_v52 = vadd.f32 %v651_v47, %v641_v49  ;;  %v1030_v49 = vld [vmem:[#allocation17 + $0x28] sm:$0x3] }
 0x58e   :  { %1055 = vrot.lane.b32.xlu1 %v654_v51, %s5811_s17  ;;  %v1035_v51 = vld [vmem:[#allocation17 + $0x50] sm:$0xff] }
 0x58f   :  { %1053 = vrot.lane.b32.xlu0 %v653_v52, %s5811_s17  ;;  %v1036_v52 = vld [vmem:[#allocation17 + $0x58] sm:$0x3] }
 0x590   :  { %v5262_v53 = vpop.eup %5261 }
 0x591   :  { %v632_v57 = vmul.f32 %v5262_v53, %v6201_v31  ;;  %v4973_v53 = vpack.c.bf16 %v1030_v49, %v1029_v48  ;;  %v1439_v48 = vld [vmem:[#allocation19 + $0x88] sm:$0x3]  ;;  %v1444_v49 = vld [vmem:[#allocation19 + $0xb0] sm:$0xff] }
 0x593   :  { %v644_v58 = vmul.f32 %v639_v46, %v632_v57  ;;  %v1037_v57 = vld [vmem:[#allocation17 + $0x60] sm:$0xff] }
 0x594   :  { %v5264_v54 = vpop.eup %5263 }
 0x595   :  { %v631_v55 = vmul.f32 %v5264_v54, %v6204_v32  ;;  %v656_v59 = vadd.f32 %v651_v47, %v644_v58  ;;  %v1043_v58 = vld [vmem:[#allocation17 + $0x90] sm:$0xff] }
 0x597   :  { %v643_v23 = vmul.f32 %v639_v46, %v631_v55  ;;  %v4987_v55 = vpack.c.bf16 %v1036_v52, %v1035_v51  ;;  %v1445_v51 = vld [vmem:[#allocation19 + $0xb8] sm:$0x3] }
 0x599   :  { %v655_v24 = vadd.f32 %v651_v47, %v643_v23  ;;  %v1038_v23 = vld [vmem:[#allocation17 + $0x68] sm:$0xff] }
 0x59b   :  { %1057 = vrot.lane.b32.xlu1 %v655_v24, %s5811_s17  ;;  %v1044_v24 = vld [vmem:[#allocation17 + $0x98] sm:$0xff] }
 0x59f   :  { %1059 = vrot.lane.b32.xlu1 %v656_v59, %s5811_s17  ;;  %v4993_v59 = vpack.c.bf16 %v1038_v23, %v1037_v57 }
 0x5b6   :  { %v499_v60 = vpop.xlane.xlu1 %498 }
 0x5b7   :  { %v509_v61 = vmul.f32 0.03125, %v499_v60  ;;  %v5007_v60 = vpack.c.bf16 %v1044_v24, %v1043_v58 }
 0x5b9   :  { %v513_v0 = vadd.f32 1e-05, %v509_v61  ;;  %v1039_v61 = vld [vmem:[#allocation17 + $0x70] sm:$0xff] }
 0x5bb   :  { %5265 = vrsqrt.f32 %v513_v0  ;;  %v1040_v0 = vld [vmem:[#allocation17 + $0x78] sm:$0xff] }
 0x5bd   :  { %v508_v1 = vpop.xlane.xlu1 %507 }
 0x5be   :  { %v512_v4 = vmul.f32 0.03125, %v508_v1  ;;  %v1045_v1 = vld [vmem:[#allocation17 + $0xa0] sm:$0xff] }
 0x5c0   :  { %v516_v10 = vadd.f32 1e-05, %v512_v4  ;;  %v4997_v4 = vpack.c.bf16 %v1040_v0, %v1039_v61 }
 0x5c2   :  { %5267 = vrsqrt.f32 %v516_v10  ;;  %v1042_v10 = vld [vmem:[#allocation17 + $0x88] sm:$0x3] }
 0x5c5   :  { %v5266_v2 = vpop.eup %5265 }
 0x5c6   :  { %v521_v32 = vmul.f32 %v5266_v2, %v6225_v50  ;;  %v1046_v2 = vld [vmem:[#allocation17 + $0xa8] sm:$0xff] }
 0x5c8   :  { %v531_v31 = vmul.f32 %v4156_v3, %v521_v32  ;;  %v5011_v32 = vpack.c.bf16 %v1046_v2, %v1045_v1 }
 0x5ca   :  { %v502_v11 = vpop.xlane.xlu0 %501  ;;  %v541_v12 = vadd.f32 %v4157_v5, %v531_v31 }
 0x5cb   :  { %v510_v13 = vmul.f32 0.03125, %v502_v11  ;;  %v1047_v11 = vld [vmem:[#allocation17 + $0xb0] sm:$0xff] }
 0x5cc   :  { %4573 = vmatprep.mubr.msk.f32.mxu0 %vm471_vm2, %v541_v12  ;;  %4587 = vmatprep.mubr.msk.f32.mxu1 %vm471_vm2, %v541_v12  ;;  %v5268_v18 = vpop.eup %5267 }
 0x5cd   :  { %v514_v14 = vadd.f32 1e-05, %v510_v13  ;;  %v524_v21 = vmul.f32 %v5268_v18, %v6231_v56  ;;  %v1026_v56 = vld [vmem:[#allocation17 + $0x8] sm:$0xff]  ;;  %v1429_v18 = vld [vmem:[#allocation19 + $0x38] sm:$0xff] }
 0x5ce   :  { %v505_v15 = vpop.xlane.xlu0 %504 }
 0x5cf   :  { %5269 = vrsqrt.f32 %v514_v14  ;;  %v511_v16 = vmul.f32 0.03125, %v505_v15  ;;  %v534_v37 = vmul.f32 %v4156_v3, %v524_v21  ;;  %v1422_v15 = vld [vmem:[#allocation19] sm:$0xff] }
 0x5d1   :  { %v515_v17 = vadd.f32 1e-05, %v511_v16  ;;  %v1423_v16 = vld [vmem:[#allocation19 + $0x8] sm:$0xff] }
 0x5d3   :  { %5271 = vrsqrt.f32 %v515_v17  ;;  %v1428_v17 = vld [vmem:[#allocation19 + $0x30] sm:$0xff] }
 0x5d9   :  { %v5270_v19 = vpop.eup %5269 }
 0x5da   :  { %v522_v50 = vmul.f32 %v5270_v19, %v6240_v63  ;;  %v1025_v63 = vld [vmem:[#allocation17] sm:$0xff]  ;;  %v5021_v19 = vpack.c.bf16 %v1423_v16, %v1422_v15 }
 0x5db   :  { %v4965_v42 = vpack.c.bf16 %v1026_v56, %v1025_v63 }
 0x5dc   :  { %v532_v29 = vmul.f32 %v4156_v3, %v522_v50  ;;  %v5035_v50 = vpack.c.bf16 %v1429_v18, %v1428_v17 }
 0x5dd   :  { %v5272_v30 = vpop.eup %5271 }
 0x5de   :  { %v542_v33 = vadd.f32 %v4157_v5, %v532_v29  ;;  %v523_v34 = vmul.f32 %v5272_v30, %v6237_v62  ;;  %v544_v62 = vadd.f32 %v4157_v5, %v534_v37  ;;  %v1431_v29 = vld [vmem:[#allocation19 + $0x48] sm:$0xff]  ;;  %v5025_v30 = vpack.c.bf16 %v1425_v26, %v1424_v22  ;;  %v1433_v37 = vld [vmem:[#allocation19 + $0x58] sm:$0x3] }
 0x5e0   :  { %4574 = vmatmul.mubr.msk.f32.vlgmr.msra.gmra.mrb[4].mxu0 %vm471_vm2, %v542_v33  ;;  %4588 = vmatmul.mubr.msk.f32.vlgmr.msra.gmra.mrb[0].mxu1 %vm471_vm2, %v542_v33  ;;  %v533_v38 = vmul.f32 %v4156_v3, %v523_v34  ;;  %v1426_v34 = vld [vmem:[#allocation19 + $0x20] sm:$0xff] }
 0x5e1   :  { %4952 = vmatpush3.bf16.msra.mxu0 %v6248_v25  ;;  %4960 = vmatpush3.bf16.msra.mxu1 %v6250_v27  ;;  %v1027_v25 = vld [vmem:[#allocation17 + $0x10] sm:$0xff]  ;;  %v1033_v27 = vld [vmem:[#allocation17 + $0x40] sm:$0xff] }
 0x5e2   :  { %v543_v41 = vadd.f32 %v4157_v5, %v533_v38  ;;  %4954 = vmatprep.subr.bf16.mxu0 %v4953_v35  ;;  %4962 = vmatprep.subr.bf16.mxu1 %v4961_v36  ;;  %v4969_v46 = vpack.c.bf16 %v1028_v44, %v1027_v25  ;;  %v4983_v47 = vpack.c.bf16 %v1034_v45, %v1033_v27  ;;  %v1041_v5 = vld [vmem:[#allocation17 + $0x80] sm:$0xff]  ;;  %v1437_v25 = vld [vmem:[#allocation19 + $0x78] sm:$0xff]  ;;  %v1443_v27 = vld [vmem:[#allocation19 + $0xa8] sm:$0xff] }
 0x5e3   :  { %v5001_v13 = vpack.c.bf16 %v1042_v10, %v1041_v5  ;;  %v1434_v38 = vld [vmem:[#allocation19 + $0x60] sm:$0xff] }
 0x5e4   :  { %4576 = vmatprep.mubr.msk.f32.mxu0 %vm471_vm2, %v543_v41  ;;  %4590 = vmatprep.mubr.msk.f32.mxu1 %vm471_vm2, %v543_v41  ;;  %v1442_v44 = vld [vmem:[#allocation19 + $0xa0] sm:$0xff] }
 0x5e5   :  { %4577 = vmatmul.mubr.msk.f32.gmra.mrb[6].mxu0 %vm471_vm2, %v544_v62  ;;  %4591 = vmatmul.mubr.msk.f32.gmra.mrb[2].mxu1 %vm471_vm2, %v544_v62 }
 0x5e6   :  { %4956 = vmatpush3.bf16.msra.mxu0 %v4953_v35  ;;  %4601 = vmatprep.mubr.msk.f32.mxu0 %vm471_vm2, %v541_v12  ;;  %v1427_v35 = vld [vmem:[#allocation19 + $0x28] sm:$0x3] }
 0x5e7   :  { %4964 = vmatpush3.bf16.msra.mxu1 %v4961_v36  ;;  %4615 = vmatprep.mubr.msk.f32.mxu1 %vm471_vm2, %v541_v12  ;;  %v1048_v12 = vld [vmem:[#allocation17 + $0xb8] sm:$0x3]  ;;  %v1432_v36 = vld [vmem:[#allocation19 + $0x50] sm:$0xff]  ;;  %v5029_v63 = vpack.c.bf16 %v1427_v35, %v1426_v34 }
 0x5e8   :  { %4966 = vmatprep.subr.bf16.mxu0 %v4965_v42  ;;  %4980 = vmatprep.subr.bf16.mxu1 %v4979_v43  ;;  %v5015_v14 = vpack.c.bf16 %v1048_v12, %v1047_v11  ;;  %v5043_v56 = vpack.c.bf16 %v1433_v37, %v1432_v36 }
 0x5e9   :  { %4602 = vmatmul.mubr.msk.f32.vlgmr.msra.gmra.mrb[8].mxu0 %vm471_vm2, %v542_v33 }
 0x5ea   :  { %4616 = vmatmul.mubr.msk.f32.vlgmr.msra.gmra.mrb[4].mxu1 %vm471_vm2, %v542_v33  ;;  %4604 = vmatprep.mubr.msk.f32.mxu0 %vm471_vm2, %v543_v41  ;;  %v5039_v33 = vpack.c.bf16 %v1431_v29, %v1430_v28 }
 0x5eb   :  { %4618 = vmatprep.mubr.msk.f32.mxu1 %vm471_vm2, %v543_v41  ;;  %4968 = vmatpush3.bf16.msra.mxu0 %v4965_v42  ;;  %v1441_v41 = vld [vmem:[#allocation19 + $0x98] sm:$0xff] }
 0x5ec   :  { %4982 = vmatpush3.bf16.msra.mxu1 %v4979_v43  ;;  %4970 = vmatprep.subr.bf16.mxu0 %v4969_v46  ;;  %v5063_v42 = vpack.c.bf16 %v1441_v41, %v1440_v40  ;;  %v1436_v43 = vld [vmem:[#allocation19 + $0x70] sm:$0xff] }
 0x5ed   :  { %4605 = vmatmul.mubr.msk.f32.gmra.mrb[10].mxu0 %vm471_vm2, %v544_v62  ;;  %4984 = vmatprep.subr.bf16.mxu1 %v4983_v47  ;;  %v5053_v45 = vpack.c.bf16 %v1437_v25, %v1436_v43 }
 0x5ee   :  { %4619 = vmatmul.mubr.msk.f32.gmra.mrb[6].mxu1 %vm471_vm2, %v544_v62  ;;  %v5049_v62 = vpack.c.bf16 %v1435_v39, %v1434_v38 }
 0x5ef   :  { %4972 = vmatpush3.bf16.msra.mxu0 %v4969_v46  ;;  %v5067_v46 = vpack.c.bf16 %v1443_v27, %v1442_v44 }
 0x5f0   :  { %4986 = vmatpush3.bf16.msra.mxu1 %v4983_v47  ;;  %4975 = vmatprep.subr.msk.bf16.mxu0 %vm6283_vm5, %v4973_v53  ;;  %v1438_v47 = vld [vmem:[#allocation19 + $0x80] sm:$0xff] }
 0x5f1   :  { %4989 = vmatprep.subr.msk.bf16.mxu1 %vm6283_vm5, %v4987_v55  ;;  %v5057_v52 = vpack.c.bf16 %v1439_v48, %v1438_v47 }
 0x5f3   :  { %4978 = vmatpush3.bf16.msk.msra.mxu0 %vm6283_vm5, %v4973_v53  ;;  %v5071_v53 = vpack.c.bf16 %v1445_v51, %v1444_v49 }
 0x5f4   :  { %4992 = vmatpush3.bf16.msk.msra.mxu1 %vm6283_vm5, %v4987_v55  ;;  %4994 = vmatprep.subr.bf16.mxu0 %v4993_v59 }
 0x5f5   :  { %5008 = vmatprep.subr.bf16.mxu1 %v5007_v60 }
 0x600   :  { %v6298_v31 = vpop.permute.xlu1 %1055 }
 0x601   :  { %v6296_v3 = vpop.permute.xlu0 %1053 }
 0x602   :  { %4633 = vmatprep.mubr.msk.f32.mxu0 %vm563_vm1, %v6296_v3  ;;  %4651 = vmatprep.mubr.msk.f32.mxu1 %vm563_vm1, %v6296_v3 }
 0x603   :  { %4634 = vmatmul.mubr.msk.f32.vlgmr.msra.gmra.mrb[12].mxu0 %vm563_vm1, %v6298_v31  ;;  %4652 = vmatmul.mubr.msk.f32.vlgmr.msra.gmra.mrb[8].mxu1 %vm563_vm1, %v6298_v31 }
 0x604   :  { %4996 = vmatpush3.bf16.msra.mxu0 %v4993_v59  ;;  %5010 = vmatpush3.bf16.msra.mxu1 %v5007_v60 }
 0x605   :  { %4998 = vmatprep.subr.bf16.mxu0 %v4997_v4  ;;  %5012 = vmatprep.subr.bf16.mxu1 %v5011_v32 }
 0x608   :  { %5000 = vmatpush3.bf16.msra.mxu0 %v4997_v4  ;;  %5014 = vmatpush3.bf16.msra.mxu1 %v5011_v32 }
 0x609   :  { %5003 = vmatprep.subr.msk.bf16.mxu0 %vm6283_vm5, %v5001_v13  ;;  %5017 = vmatprep.subr.msk.bf16.mxu1 %vm6283_vm5, %v5015_v14 }
 0x60c   :  { %5006 = vmatpush3.bf16.msk.msra.mxu0 %vm6283_vm5, %v5001_v13  ;;  %5020 = vmatpush3.bf16.msk.msra.mxu1 %vm6283_vm5, %v5015_v14 }
 0x60d   :  { %v6316_v20 = vpop.permute.xlu1 %1057  ;;  %5022 = vmatprep.subr.bf16.mxu0 %v5021_v19  ;;  %5036 = vmatprep.subr.bf16.mxu1 %v5035_v50 }
 0x60e   :  { %4636 = vmatprep.mubr.msk.f32.mxu0 %vm563_vm1, %v6316_v20  ;;  %4654 = vmatprep.mubr.msk.f32.mxu1 %vm563_vm1, %v6316_v20 }
 0x611   :  { %v6322_v21 = vpop.permute.xlu1 %1059 }
 0x612   :  { %4637 = vmatmul.mubr.msk.f32.gmra.mrb[14].mxu0 %vm563_vm1, %v6322_v21  ;;  %4655 = vmatmul.mubr.msk.f32.gmra.mrb[10].mxu1 %vm563_vm1, %v6322_v21 }
 0x613   :  { %4669 = vmatprep.mubr.msk.f32.mxu0 %vm563_vm1, %v6296_v3  ;;  %4687 = vmatprep.mubr.msk.f32.mxu1 %vm563_vm1, %v6296_v3 }
 0x616   :  { %4670 = vmatmul.mubr.msk.f32.vlgmr.msra.gmra.mrb[16].mxu0 %vm563_vm1, %v6298_v31  ;;  %4688 = vmatmul.mubr.msk.f32.vlgmr.msra.gmra.mrb[12].mxu1 %vm563_vm1, %v6298_v31 }
 0x617   :  { %5024 = vmatpush3.bf16.msra.mxu0 %v5021_v19  ;;  %5038 = vmatpush3.bf16.msra.mxu1 %v5035_v50 }
 0x618   :  { %4672 = vmatprep.mubr.msk.f32.mxu0 %vm563_vm1, %v6316_v20  ;;  %4690 = vmatprep.mubr.msk.f32.mxu1 %vm563_vm1, %v6316_v20 }
 0x619   :  { %5026 = vmatprep.subr.bf16.mxu0 %v5025_v30  ;;  %5040 = vmatprep.subr.bf16.mxu1 %v5039_v33 }
 0x61a   :  { %4673 = vmatmul.mubr.msk.f32.gmra.mrb[18].mxu0 %vm563_vm1, %v6322_v21  ;;  %4691 = vmatmul.mubr.msk.f32.gmra.mrb[14].mxu1 %vm563_vm1, %v6322_v21 }
 0x61b   :  { %5028 = vmatpush3.bf16.msra.mxu0 %v5025_v30  ;;  %5042 = vmatpush3.bf16.msra.mxu1 %v5039_v33 }
 0x61c   :  { %4705 = vmatprep.mubr.msk.f32.mxu0 %vm563_vm1, %v6296_v3  ;;  %4723 = vmatprep.mubr.msk.f32.mxu1 %vm563_vm1, %v6296_v3 }
 0x61d   :  { %5031 = vmatprep.subr.msk.bf16.mxu0 %vm6283_vm5, %v5029_v63  ;;  %5045 = vmatprep.subr.msk.bf16.mxu1 %vm6283_vm5, %v5043_v56 }
 0x61f   :  { %5034 = vmatpush3.bf16.msk.msra.mxu0 %vm6283_vm5, %v5029_v63  ;;  %5048 = vmatpush3.bf16.msk.msra.mxu1 %vm6283_vm5, %v5043_v56 }
 0x620   :  { %5050 = vmatprep.subr.bf16.mxu0 %v5049_v62  ;;  %5064 = vmatprep.subr.bf16.mxu1 %v5063_v42 }
 0x622   :  { %4706 = vmatmul.mubr.msk.f32.vlgmr.msra.gmra.mrb[20].mxu0 %vm563_vm1, %v6298_v31  ;;  %4724 = vmatmul.mubr.msk.f32.vlgmr.msra.gmra.mrb[16].mxu1 %vm563_vm1, %v6298_v31 }
 0x623   :  { %4708 = vmatprep.mubr.msk.f32.mxu0 %vm563_vm1, %v6316_v20  ;;  %4726 = vmatprep.mubr.msk.f32.mxu1 %vm563_vm1, %v6316_v20 }
 0x624   :  { %5052 = vmatpush3.bf16.msra.mxu0 %v5049_v62  ;;  %5066 = vmatpush3.bf16.msra.mxu1 %v5063_v42 }
 0x625   :  { %5054 = vmatprep.subr.bf16.mxu0 %v5053_v45  ;;  %5068 = vmatprep.subr.bf16.mxu1 %v5067_v46 }
 0x626   :  { %4709 = vmatmul.mubr.msk.f32.gmra.mrb[22].mxu0 %vm563_vm1, %v6322_v21  ;;  %4727 = vmatmul.mubr.msk.f32.gmra.mrb[18].mxu1 %vm563_vm1, %v6322_v21 }
 0x627   :  { %4741 = vmatprep.mubr.msk.f32.mxu0 %vm563_vm1, %v6296_v3  ;;  %4759 = vmatprep.mubr.msk.f32.mxu1 %vm563_vm1, %v6296_v3 }
 0x628   :  { %5056 = vmatpush3.bf16.msra.mxu0 %v5053_v45  ;;  %5070 = vmatpush3.bf16.msra.mxu1 %v5067_v46 }
 0x629   :  { %5059 = vmatprep.subr.msk.bf16.mxu0 %vm6283_vm5, %v5057_v52  ;;  %5073 = vmatprep.subr.msk.bf16.mxu1 %vm6283_vm5, %v5071_v53 }
 0x62c   :  { %5062 = vmatpush3.bf16.msk.msra.mxu0 %vm6283_vm5, %v5057_v52  ;;  %5076 = vmatpush3.bf16.msk.msra.mxu1 %vm6283_vm5, %v5071_v53 }
 0x62f   :  { %4742 = vmatmul.mubr.msk.f32.vlgmr.msra.gmra.mrb[24].mxu0 %vm563_vm1, %v6298_v31  ;;  %4760 = vmatmul.mubr.msk.f32.vlgmr.msra.gmra.mrb[20].mxu1 %vm563_vm1, %v6298_v31 }
 0x630   :  { %4744 = vmatprep.mubr.msk.f32.mxu0 %vm563_vm1, %v6316_v20  ;;  %4762 = vmatprep.mubr.msk.f32.mxu1 %vm563_vm1, %v6316_v20 }
 0x633   :  { %4745 = vmatmul.mubr.msk.f32.gmra.mrb[26].mxu0 %vm563_vm1, %v6322_v21  ;;  %4763 = vmatmul.mubr.msk.f32.gmra.mrb[22].mxu1 %vm563_vm1, %v6322_v21 }
 0x6b3   :  { %v4575_v54 = vpop.f32.mrb[4].mxu0  ;;  %v4589_v55 = vpop.f32.mrb[0].mxu1 }
 0x6b4   :  { %v751_v57 = vpop.f32.mrb[5].mxu0  ;;  %v836_v23 = vpop.f32.mrb[1].mxu1 }
 0x6b5   :  { %4769 = vmatprep.mubr.msk.f32.mxu0 %vm1807_vm6, %v751_v57 }
 0x6b8   :  { %v4578_v58 = vpop.f32.mrb[6].mxu0  ;;  %v6393_v24 = vpop.f32.mrb[2].mxu1 }
 0x6b9   :  { %v761_v59 = vpop.f32.mrb[7].mxu0  ;;  %v846_v60 = vpop.f32.mrb[3].mxu1 }
 0x6ba   :  { %4776 = vmatprep.mubr.msk.f32.mxu1 %vm1807_vm6, %v761_v59 }
 0x6bc   :  { %v4603_v61 = vpop.f32.mrb[8].mxu0 }
 0x6bd   :  { %v6396_v0 = vpop.f32.mrb[4].mxu1  ;;  %v921_v1 = vpop.f32.mrb[9].mxu0 }
 0x6be   :  { %v1006_v2 = vpop.f32.mrb[5].mxu1 }
 0x6c0   :  { %v6398_v3 = vpop.f32.mrb[10].mxu0 }
 0x6c1   :  { %v6400_v4 = vpop.f32.mrb[6].mxu1  ;;  %v931_v32 = vpop.f32.mrb[11].mxu0 }
 0x6c2   :  { %v6402_v5 = vpop.f32.mrb[7].mxu1 }
 0x6d6   :  { %v4635_v31 = vpop.f32.mrb[12].mxu0  ;;  %v4653_v10 = vpop.f32.mrb[8].mxu1 }
 0x6d7   :  { %v1139_v11 = vpop.f32.mrb[13].mxu0  ;;  %v1227_v12 = vpop.f32.mrb[9].mxu1 }
 0x6d8   :  { %v5077_v14 = vpack.c.bf16 %v4635_v31, %v1139_v11  ;;  %v5089_v15 = vpack.c.bf16 %v4653_v10, %v1227_v12 }
 0x6da   :  { %5079 = vmatprep.subr.msk.bf16.mxu0 %vm6406_vm7, %v5077_v14 }
 0x6db   :  { %5082 = vmatpush3.bf16.xpose.msk.msra.mxu0 %vm6406_vm7, %v5077_v14 }
 0x6dc   :  { %5091 = vmatprep.subr.msk.bf16.mxu0 %vm6406_vm7, %v5089_v15 }
 0x6e2   :  { %4770 = vmatmul.mubr.msk.f32.vlgmr.msra.gmra.mrb[28].mxu0 %vm1807_vm6, %v4575_v54 }
 0x6e3   :  { %5094 = vmatpush3.bf16.xpose.msk.msra.mxu0 %vm6406_vm7, %v5089_v15  ;;  %4783 = vmatprep.mubr.msk.f32.mxu0 %vm1807_vm6, %v836_v23 }
 0x6e5   :  { %v4638_v16 = vpop.f32.mrb[14].mxu0  ;;  %v4656_v17 = vpop.f32.mrb[10].mxu1 }
 0x6e6   :  { %v1149_v18 = vpop.f32.mrb[15].mxu0  ;;  %v1237_v19 = vpop.f32.mrb[11].mxu1 }
 0x6e7   :  { %v5083_v50 = vpack.c.bf16 %v4638_v16, %v1149_v18  ;;  %v5095_v20 = vpack.c.bf16 %v4656_v17, %v1237_v19 }
 0x6e9   :  { %v4671_v21 = vpop.f32.mrb[16].mxu0  ;;  %v4689_v22 = vpop.f32.mrb[12].mxu1  ;;  %5085 = vmatprep.subr.msk.bf16.mxu1 %vm6406_vm7, %v5083_v50 }
 0x6ea   :  { %v1315_v26 = vpop.f32.mrb[17].mxu0  ;;  %v1403_v28 = vpop.f32.mrb[13].mxu1  ;;  %5088 = vmatpush3.bf16.xpose.msk.msra.mxu1 %vm6406_vm7, %v5083_v50  ;;  %4784 = vmatmul.mubr.msk.f32.vlgmr.msra.gmra.mrb[30].mxu0 %vm1807_vm6, %v4589_v55 }
 0x6eb   :  { %v5101_v29 = vpack.c.bf16 %v4671_v21, %v1315_v26  ;;  %v5113_v30 = vpack.c.bf16 %v4689_v22, %v1403_v28  ;;  %5097 = vmatprep.subr.msk.bf16.mxu1 %vm6406_vm7, %v5095_v20  ;;  %4797 = vmatprep.mubr.msk.f32.mxu0 %vm1807_vm6, %v921_v1 }
 0x6ed   :  { %v4674_v33 = vpop.f32.mrb[18].mxu0  ;;  %v4692_v34 = vpop.f32.mrb[14].mxu1  ;;  %5103 = vmatprep.subr.msk.bf16.mxu0 %vm6406_vm7, %v5101_v29 }
 0x6ee   :  { %v1325_v35 = vpop.f32.mrb[19].mxu0  ;;  %v1413_v36 = vpop.f32.mrb[15].mxu1  ;;  %5106 = vmatpush3.bf16.xpose.msk.msra.mxu0 %vm6406_vm7, %v5101_v29 }
 0x6ef   :  { %v5107_v37 = vpack.c.bf16 %v4674_v33, %v1325_v35  ;;  %v5119_v38 = vpack.c.bf16 %v4692_v34, %v1413_v36  ;;  %5115 = vmatprep.subr.msk.bf16.mxu0 %vm6406_vm7, %v5113_v30 }
 0x6f1   :  { %4777 = vmatmul.mubr.msk.f32.vlgmr.msra.gmra.mrb[24].mxu1 %vm1807_vm6, %v4578_v58 }
 0x6f2   :  { %5100 = vmatpush3.bf16.xpose.msk.msra.mxu1 %vm6406_vm7, %v5095_v20  ;;  %4790 = vmatprep.mubr.msk.f32.mxu1 %vm1807_vm6, %v846_v60 }
 0x6f3   :  { %5109 = vmatprep.subr.msk.bf16.mxu1 %vm6406_vm7, %v5107_v37 }
 0x6f5   :  { %v4707_v63 = vpop.f32.mrb[20].mxu0  ;;  %v4725_v56 = vpop.f32.mrb[16].mxu1  ;;  %4798 = vmatmul.mubr.msk.f32.vlgmr.msra.gmra.mrb[32].mxu0 %vm1807_vm6, %v4603_v61 }
 0x6f6   :  { %v1515_v39 = vpop.f32.mrb[21].mxu0  ;;  %v1603_v40 = vpop.f32.mrb[17].mxu1  ;;  %5118 = vmatpush3.bf16.xpose.msk.msra.mxu0 %vm6406_vm7, %v5113_v30  ;;  %4811 = vmatprep.mubr.msk.f32.mxu0 %vm1807_vm6, %v1006_v2 }
 0x6f7   :  { %v5125_v41 = vpack.c.bf16 %v4707_v63, %v1515_v39  ;;  %v6444_v62 = vpack.c.bf16 %v4725_v56, %v1603_v40 }
 0x6f9   :  { %v4710_v42 = vpop.f32.mrb[22].mxu0  ;;  %v4728_v43 = vpop.f32.mrb[18].mxu1  ;;  %5126 = vmatprep.subr.bf16.mxu0 %v5125_v41  ;;  %4791 = vmatmul.mubr.msk.f32.vlgmr.msra.gmra.mrb[26].mxu1 %vm1807_vm6, %v6393_v24  ;;  %v1798_v24 = vlaneseq }
 0x6fa   :  { %v1525_v25 = vpop.f32.mrb[23].mxu0  ;;  %v1613_v44 = vpop.f32.mrb[19].mxu1  ;;  %5112 = vmatpush3.bf16.xpose.msk.msra.mxu1 %vm6406_vm7, %v5107_v37  ;;  %4804 = vmatprep.mubr.msk.f32.mxu1 %vm1807_vm6, %v931_v32 }
 0x6fb   :  { %v5129_v27 = vpack.c.bf16 %v4710_v42, %v1525_v25  ;;  %v6451_v45 = vpack.c.bf16 %v4728_v43, %v1613_v44  ;;  %5121 = vmatprep.subr.msk.bf16.mxu1 %vm6406_vm7, %v5119_v38  ;;  %v6475_v59 = vshrl.u32 %v1798_v24, 7  ;;  %v1802_v61 = vand.u32 127, %v1798_v24 }
 0x6fd   :  { %4812 = vmatmul.mubr.msk.f32.vlgmr.msra.gmra.mrb[34].mxu0 %vm1807_vm6, %v6396_v0  ;;  %v1800_v60 = vadd.s32 8, %v6475_v59  ;;  %vm1803_vm9 = vcmp.le.s32.totalorder %v1802_v61, %v6475_v59  ;;  %v5814_v0 = vmov -1e+30  }
 0x6fe   :  { %5128 = vmatpush3.bf16.msra.mxu0 %v5125_v41  ;;  %v1805_v2 = vsel %vm1803_vm9, 0.0, %v5814_v0 }
 0x6ff   :  { %5134 = vmatprep.subr.bf16.mxu0 %v6444_v62  ;;  %vm1804_vm8 = vcmp.le.s32.totalorder %v1802_v61, %v1800_v60 }
 0x700   :  { %v1806_v1 = vsel %vm1804_vm8, 0.0, %v5814_v0 }
 0x701   :  { %4805 = vmatmul.mubr.msk.f32.vlgmr.msra.gmra.mrb[28].mxu1 %vm1807_vm6, %v6398_v3 }
 0x702   :  { %v4743_v46 = vpop.f32.mrb[24].mxu0  ;;  %v4761_v47 = vpop.f32.mrb[20].mxu1  ;;  %5124 = vmatpush3.bf16.xpose.msk.msra.mxu1 %vm6406_vm7, %v5119_v38  ;;  %4818 = vmatprep.mubr.msk.f32.mxu1 %vm1807_vm6, %v6402_v5 }
 0x703   :  { %v1691_v48 = vpop.f32.mrb[25].mxu0  ;;  %v1779_v49 = vpop.f32.mrb[21].mxu1  ;;  %5130 = vmatprep.subr.bf16.mxu1 %v5129_v27 }
 0x704   :  { %v6464_v51 = vpack.c.bf16 %v4743_v46, %v1691_v48  ;;  %v6466_v52 = vpack.c.bf16 %v4761_v47, %v1779_v49 }
 0x706   :  { %v4746_v53 = vpop.f32.mrb[26].mxu0  ;;  %v4764_v54 = vpop.f32.mrb[22].mxu1 }
 0x707   :  { %v1701_v55 = vpop.f32.mrb[27].mxu0  ;;  %v1789_v57 = vpop.f32.mrb[23].mxu1 }
 0x708   :  { %v6468_v23 = vpack.c.bf16 %v4746_v53, %v1701_v55  ;;  %v6470_v58 = vpack.c.bf16 %v4764_v54, %v1789_v57 }
 0x709   :  { %4819 = vmatmul.mubr.msk.f32.vlgmr.msra.gmra.mrb[30].mxu1 %vm1807_vm6, %v6400_v4 }
 0x70a   :  { %5132 = vmatpush3.bf16.msra.mxu1 %v5129_v27 }
 0x70b   :  { %5138 = vmatprep.subr.bf16.mxu1 %v6451_v45 }
 0x7b5   :  { %v4771_v3 = vpop.f32.mrb[28].mxu0 }
 0x7b6   :  { %v6479_v32 = vadd.f32 %v4771_v3, %v1806_v1  ;;  %v1886_v5 = vpop.f32.mrb[29].mxu0 }
 0x7b7   :  { %v6481_v4 = vadd.f32 %v1886_v5, %v1805_v2 }
 0x7b8   :  { %v2507_v31 = vsel %vm1807_vm6, %v6479_v32, -inf }
 0x7b9   :  { %2508 = vmax.xlane.f32.xlu1 %v2507_v31  ;;  %v2504_v10 = vsel %vm1807_vm6, %v6481_v4, -inf }
 0x7ba   :  { %2505 = vmax.xlane.f32.xlu0 %v2504_v10 }
 0x7bd   :  { %v4785_v11 = vpop.f32.mrb[30].mxu0 }
 0x7be   :  { %v6487_v12 = vadd.f32 %v4785_v11, %v1806_v1  ;;  %v2060_v13 = vpop.f32.mrb[31].mxu0 }
 0x7bf   :  { %v6499_v22 = vadd.f32 %v2060_v13, %v1805_v2 }
 0x7c0   :  { %v2519_v14 = vsel %vm1807_vm6, %v6487_v12, -inf }
 0x7c1   :  { %2520 = vmax.xlane.f32.xlu1 %v2519_v14  ;;  %v2516_v35 = vsel %vm1807_vm6, %v6499_v22, -inf }
 0x7c4   :  { %v4778_v15 = vpop.f32.mrb[24].mxu1 }
 0x7c5   :  { %v6491_v16 = vadd.f32 %v4778_v15, %v1806_v1  ;;  %v1973_v17 = vpop.f32.mrb[25].mxu1 }
 0x7c6   :  { %v6493_v18 = vadd.f32 %v1973_v17, %v1805_v2 }
 0x7c7   :  { %v2513_v19 = vsel %vm1807_vm6, %v6491_v16, -inf }
 0x7c8   :  { %v4799_v50 = vpop.f32.mrb[32].mxu0  ;;  %2514 = vmax.xlane.f32.xlu0 %v2513_v19  ;;  %v2510_v26 = vsel %vm1807_vm6, %v6493_v18, -inf }
 0x7c9   :  { %v2234_v20 = vpop.f32.mrb[33].mxu0  ;;  %v6503_v28 = vadd.f32 %v4799_v50, %v1806_v1 }
 0x7ca   :  { %v6497_v21 = vadd.f32 %v2234_v20, %v1805_v2 }
 0x7cb   :  { %v2531_v37 = vsel %vm1807_vm6, %v6503_v28, -inf }
 0x7cc   :  { %v4792_v29 = vpop.f32.mrb[26].mxu1  ;;  %2511 = vmax.xlane.f32.xlu0 %v2510_v26  ;;  %v2528_v30 = vsel %vm1807_vm6, %v6497_v21, -inf }
 0x7cd   :  { %v2147_v33 = vpop.f32.mrb[27].mxu1  ;;  %2529 = vmax.xlane.f32.xlu1 %v2528_v30  ;;  %v6507_v34 = vadd.f32 %v4792_v29, %v1806_v1 }
 0x7ce   :  { %v6515_v56 = vadd.f32 %v2147_v33, %v1805_v2 }
 0x7cf   :  { %v2525_v39 = vsel %vm1807_vm6, %v6507_v34, -inf }
 0x7d0   :  { %v4813_v36 = vpop.f32.mrb[34].mxu0  ;;  %2517 = vmax.xlane.f32.xlu0 %v2516_v35  ;;  %v2522_v44 = vsel %vm1807_vm6, %v6515_v56, -inf }
 0x7d1   :  { %v6513_v38 = vadd.f32 %v4813_v36, %v1806_v1  ;;  %v2408_v63 = vpop.f32.mrb[35].mxu0  ;;  %2532 = vmax.xlane.f32.xlu1 %v2531_v37 }
 0x7d2   :  { %v6523_v25 = vadd.f32 %v2408_v63, %v1805_v2 }
 0x7d3   :  { %v2543_v40 = vsel %vm1807_vm6, %v6513_v38, -inf }
 0x7d4   :  { %v4806_v41 = vpop.f32.mrb[28].mxu1  ;;  %2526 = vmax.xlane.f32.xlu0 %v2525_v39  ;;  %v2540_v47 = vsel %vm1807_vm6, %v6523_v25, -inf }
 0x7d5   :  { %v6521_v42 = vadd.f32 %v4806_v41, %v1806_v1  ;;  %v2321_v43 = vpop.f32.mrb[29].mxu1  ;;  %2544 = vmax.xlane.f32.xlu1 %v2543_v40 }
 0x7d6   :  { %v6529_v46 = vadd.f32 %v2321_v43, %v1805_v2 }
 0x7d7   :  { %v2537_v27 = vsel %vm1807_vm6, %v6521_v42, -inf }
 0x7d8   :  { %2523 = vmax.xlane.f32.xlu0 %v2522_v44  ;;  %v2534_v57 = vsel %vm1807_vm6, %v6529_v46, -inf }
 0x7d9   :  { %2538 = vmax.xlane.f32.xlu1 %v2537_v27 }
 0x7dc   :  { %v4820_v48 = vpop.f32.mrb[30].mxu1  ;;  %2541 = vmax.xlane.f32.xlu0 %v2540_v47 }
 0x7dd   :  { %v6533_v49 = vadd.f32 %v4820_v48, %v1806_v1  ;;  %v2495_v53 = vpop.f32.mrb[31].mxu1 }
 0x7de   :  { %v6535_v54 = vadd.f32 %v2495_v53, %v1805_v2 }
 0x7df   :  { %v2549_v55 = vsel %vm1807_vm6, %v6533_v49, -inf }
 0x7e0   :  { %2550 = vmax.xlane.f32.xlu1 %v2549_v55  ;;  %2535 = vmax.xlane.f32.xlu0 %v2534_v57  ;;  %v2546_v24 = vsel %vm1807_vm6, %v6535_v54, -inf }
 0x7e4   :  { %2547 = vmax.xlane.f32.xlu0 %v2546_v24 }
 0x846   :  { %v2509_v60 = vpop.xlane.xlu1 %2508 }
 0x847   :  { %v2553_v61 = vsub.f32 %v6479_v32, %v2509_v60  ;;  %v2506_v0 = vpop.xlane.xlu0 %2505 }
 0x848   :  { %v2552_v1 = vsub.f32 %v6481_v4, %v2506_v0 }
 0x849   :  { %v2570_v2 = vmul.f32 1.442695, %v2553_v61 }
 0x84a   :  { %v2568_v3 = vmul.f32 1.442695, %v2552_v1 }
 0x84b   :  { %5273 = vpow2.f32 %v2570_v2 }
 0x84c   :  { %5275 = vpow2.f32 %v2568_v3 }
 0x84e   :  { %v2521_v5 = vpop.xlane.xlu1 %2520 }
 0x84f   :  { %v2557_v31 = vsub.f32 %v6487_v12, %v2521_v5 }
 0x851   :  { %v2578_v10 = vmul.f32 1.442695, %v2557_v31 }
 0x853   :  { %5277 = vpow2.f32 %v2578_v10 }
 0x855   :  { %v6546_v11 = vpop.eup %5273  ;;  %v2515_v13 = vpop.xlane.xlu0 %2514 }
 0x856   :  { %v6548_v14 = vpop.eup %5275  ;;  %v2555_v15 = vsub.f32 %v6491_v16, %v2515_v13  ;;  %v2603_v32 = vsel %vm1807_vm6, %v6546_v11, 0.0 }
 0x857   :  { %2604 = vadd.xlane.f32.xlu1 %v2603_v32  ;;  %v2600_v4 = vsel %vm1807_vm6, %v6548_v14, 0.0 }
 0x858   :  { %v2574_v17 = vmul.f32 1.442695, %v2555_v15  ;;  %2601 = vadd.xlane.f32.xlu0 %v2600_v4 }
 0x859   :  { %v2512_v19 = vpop.xlane.xlu0 %2511 }
 0x85a   :  { %5279 = vpow2.f32 %v2574_v17  ;;  %v2554_v12 = vsub.f32 %v6493_v18, %v2512_v19  ;;  %v2530_v50 = vpop.xlane.xlu1 %2529 }
 0x85b   :  { %v2560_v26 = vsub.f32 %v6497_v21, %v2530_v50 }
 0x85c   :  { %v2572_v20 = vmul.f32 1.442695, %v2554_v12 }
 0x85d   :  { %v6557_v29 = vpop.eup %5277  ;;  %v2518_v16 = vpop.xlane.xlu0 %2517  ;;  %v2584_v36 = vmul.f32 1.442695, %v2560_v26 }
 0x85e   :  { %5281 = vpow2.f32 %v2572_v20  ;;  %v2556_v30 = vsub.f32 %v6499_v22, %v2518_v16  ;;  %v2533_v33 = vpop.xlane.xlu1 %2532  ;;  %v2615_v35 = vsel %vm1807_vm6, %v6557_v29, 0.0 }
 0x85f   :  { %2616 = vadd.xlane.f32.xlu1 %v2615_v35  ;;  %v2561_v63 = vsub.f32 %v6503_v28, %v2533_v33 }
 0x860   :  { %v2576_v37 = vmul.f32 1.442695, %v2556_v30 }
 0x861   :  { %v2527_v18 = vpop.xlane.xlu0 %2526  ;;  %v2586_v41 = vmul.f32 1.442695, %v2561_v63 }
 0x862   :  { %5283 = vpow2.f32 %v2576_v37  ;;  %v2559_v39 = vsub.f32 %v6507_v34, %v2527_v18  ;;  %v2545_v21 = vpop.xlane.xlu1 %2544 }
 0x863   :  { %5285 = vpow2.f32 %v2584_v36  ;;  %v2565_v22 = vsub.f32 %v6513_v38, %v2545_v21 }
 0x864   :  { %v6564_v40 = vpop.eup %5279  ;;  %v2582_v43 = vmul.f32 1.442695, %v2559_v39 }
 0x865   :  { %v2524_v44 = vpop.xlane.xlu0 %2523  ;;  %v2609_v27 = vsel %vm1807_vm6, %v6564_v40, 0.0  ;;  %v2594_v34 = vmul.f32 1.442695, %v2565_v22 }
 0x866   :  { %5287 = vpow2.f32 %v2582_v43  ;;  %v2558_v47 = vsub.f32 %v6515_v56, %v2524_v44  ;;  %v2539_v28 = vpop.xlane.xlu1 %2538  ;;  %2610 = vadd.xlane.f32.xlu0 %v2609_v27 }
 0x867   :  { %5289 = vpow2.f32 %v2586_v41  ;;  %v2563_v55 = vsub.f32 %v6521_v42, %v2539_v28 }
 0x868   :  { %v6570_v48 = vpop.eup %5281  ;;  %v2580_v53 = vmul.f32 1.442695, %v2558_v47 }
 0x869   :  { %v2542_v57 = vpop.xlane.xlu0 %2541  ;;  %v2606_v38 = vsel %vm1807_vm6, %v6570_v48, 0.0  ;;  %v2590_v56 = vmul.f32 1.442695, %v2563_v55 }
 0x86a   :  { %5291 = vpow2.f32 %v2580_v53  ;;  %v2564_v24 = vsub.f32 %v6523_v25, %v2542_v57  ;;  %2607 = vadd.xlane.f32.xlu0 %v2606_v38 }
 0x86b   :  { %5293 = vpow2.f32 %v2594_v34 }
 0x86c   :  { %v6576_v60 = vpop.eup %5283  ;;  %v2592_v61 = vmul.f32 1.442695, %v2564_v24 }
 0x86d   :  { %v2551_v0 = vpop.xlane.xlu1 %2550  ;;  %v2536_v1 = vpop.xlane.xlu0 %2535  ;;  %v2612_v2 = vsel %vm1807_vm6, %v6576_v60, 0.0 }
 0x86e   :  { %v6580_v3 = vpop.eup %5285  ;;  %5295 = vpow2.f32 %v2592_v61  ;;  %v2567_v42 = vsub.f32 %v6533_v49, %v2551_v0  ;;  %v2562_v5 = vsub.f32 %v6529_v46, %v2536_v1  ;;  %2613 = vadd.xlane.f32.xlu1 %v2612_v2 }
 0x86f   :  { %5297 = vpow2.f32 %v2590_v56  ;;  %v2624_v15 = vsel %vm1807_vm6, %v6580_v3, 0.0 }
 0x870   :  { %v6584_v25 = vpop.eup %5287  ;;  %v2598_v31 = vmul.f32 1.442695, %v2567_v42  ;;  %v2588_v10 = vmul.f32 1.442695, %v2562_v5  ;;  %v3328_v5 = vld [vmem:[#allocation20] sm:$0xff] }
 0x871   :  { %v2548_v13 = vpop.xlane.xlu0 %2547  ;;  %v2621_v32 = vsel %vm1807_vm6, %v6584_v25, 0.0  ;;  %v6590_v4 = vpop.eup %5289 }
 0x872   :  { %v2566_v17 = vsub.f32 %v6535_v54, %v2548_v13  ;;  %2625 = vadd.xlane.f32.xlu1 %v2624_v15  ;;  %2622 = vadd.xlane.f32.xlu0 %v2621_v32  ;;  %5299 = vpow2.f32 %v2588_v10  ;;  %v2627_v19 = vsel %vm1807_vm6, %v6590_v4, 0.0 }
 0x873   :  { %5301 = vpow2.f32 %v2598_v31 }
 0x874   :  { %v6593_v46 = vpop.eup %5291  ;;  %v2596_v49 = vmul.f32 1.442695, %v2566_v17 }
 0x875   :  { %v2618_v12 = vsel %vm1807_vm6, %v6593_v46, 0.0  ;;  %v6599_v50 = vpop.eup %5293 }
 0x876   :  { %5303 = vpow2.f32 %v2596_v49  ;;  %2628 = vadd.xlane.f32.xlu1 %v2627_v19  ;;  %2619 = vadd.xlane.f32.xlu0 %v2618_v12  ;;  %v2639_v54 = vsel %vm1807_vm6, %v6599_v50, 0.0 }
 0x878   :  { %v6601_v20 = vpop.eup %5295 }
 0x879   :  { %v2636_v26 = vsel %vm1807_vm6, %v6601_v20, 0.0  ;;  %v6607_v16 = vpop.eup %5297 }
 0x87a   :  { %2640 = vadd.xlane.f32.xlu1 %v2639_v54  ;;  %2637 = vadd.xlane.f32.xlu0 %v2636_v26  ;;  %v2633_v33 = vsel %vm1807_vm6, %v6607_v16, 0.0 }
 0x87c   :  { %v6609_v30 = vpop.eup %5299 }
 0x87d   :  { %v6613_v35 = vpop.eup %5301  ;;  %v2630_v36 = vsel %vm1807_vm6, %v6609_v30, 0.0 }
 0x87e   :  { %2634 = vadd.xlane.f32.xlu1 %v2633_v33  ;;  %2631 = vadd.xlane.f32.xlu0 %v2630_v36  ;;  %v2645_v63 = vsel %vm1807_vm6, %v6613_v35, 0.0  ;;  %v3331_v36 = vld [vmem:[#allocation20 + $0x18] sm:$0xff] }
 0x880   :  { %v6617_v37 = vpop.eup %5303 }
 0x881   :  { %v2642_v18 = vsel %vm1807_vm6, %v6617_v37, 0.0 }
 0x882   :  { %2646 = vadd.xlane.f32.xlu1 %v2645_v63  ;;  %2643 = vadd.xlane.f32.xlu0 %v2642_v18  ;;  %v3332_v63 = vld [vmem:[#allocation20 + $0x20] sm:$0xff]  ;;  %v3333_v18 = vld [vmem:[#allocation20 + $0x28] sm:$0xff] }
 0x8e4   :  { %v2605_v39 = vpop.xlane.xlu1 %2604 }
 0x8e5   :  { %5305 = vrcp.f32 %v2605_v39  ;;  %v2602_v21 = vpop.xlane.xlu0 %2601  ;;  %v5165_v39 = vpack.c.bf16 %v3333_v18, %v3332_v63 }
 0x8e6   :  { %5307 = vrcp.f32 %v2602_v21  ;;  %v3335_v21 = vld [vmem:[#allocation20 + $0x38] sm:$0xff] }
 0x8ec   :  { %v2617_v47 = vpop.xlane.xlu1 %2616 }
 0x8ef   :  { %v5306_v41 = vpop.eup %5305 }
 0x8f0   :  { %v5308_v43 = vpop.eup %5307  ;;  %v2665_v44 = vmul.f32 %v5306_v41, %v6546_v11 }
 0x8f1   :  { %v2664_v22 = vmul.f32 %v5308_v43, %v6548_v14 }
 0x8f3   :  { %4825 = vmatprep.mubr.msk.f32.mxu0 %vm1807_vm6, %v2664_v22  ;;  %v2611_v27 = vpop.xlane.xlu0 %2610 }
 0x8f4   :  { %4826 = vmatmul.mubr.msk.f32.vlgmr.msra.gmra.mrb[36].mxu0 %vm1807_vm6, %v2665_v44  ;;  %5309 = vrcp.f32 %v2611_v27 }
 0x8f5   :  { %5136 = vmatpush3.bf16.msra.mxu0 %v6444_v62 }
 0x8f6   :  { %5142 = vmatprep.subr.bf16.mxu0 %v6464_v51 }
 0x8f7   :  { %v2608_v28 = vpop.xlane.xlu0 %2607 }
 0x8f8   :  { %5311 = vrcp.f32 %v2608_v28 }
 0x8f9   :  { %5313 = vrcp.f32 %v2617_v47 }
 0x8fb   :  { %v2614_v34 = vpop.xlane.xlu1 %2613 }
 0x8fc   :  { %5315 = vrcp.f32 %v2614_v34 }
 0x8fe   :  { %v5310_v11 = vpop.eup %5309 }
 0x8ff   :  { %v2626_v53 = vpop.xlane.xlu1 %2625  ;;  %v2623_v14 = vpop.xlane.xlu0 %2622  ;;  %v2667_v62 = vmul.f32 %v5310_v11, %v6564_v40 }
 0x900   :  { %5317 = vrcp.f32 %v2626_v53 }
 0x901   :  { %5319 = vrcp.f32 %v2623_v14 }
 0x902   :  { %v5312_v55 = vpop.eup %5311 }
 0x903   :  { %v2629_v57 = vpop.xlane.xlu1 %2628  ;;  %v2620_v38 = vpop.xlane.xlu0 %2619  ;;  %v2666_v24 = vmul.f32 %v5312_v55, %v6570_v48 }
 0x904   :  { %5321 = vrcp.f32 %v2629_v57  ;;  %v5314_v56 = vpop.eup %5313 }
 0x905   :  { %5323 = vrcp.f32 %v2620_v38  ;;  %4832 = vmatprep.mubr.msk.f32.mxu1 %vm1807_vm6, %v2666_v24  ;;  %v2669_v42 = vmul.f32 %v5314_v56, %v6557_v29  ;;  %v3329_v29 = vld [vmem:[#allocation20 + $0x8] sm:$0xff] }
 0x906   :  { %v5316_v61 = vpop.eup %5315  ;;  %4833 = vmatmul.mubr.msk.f32.vlgmr.msra.gmra.mrb[32].mxu1 %vm1807_vm6, %v2667_v62  ;;  %v5157_v17 = vpack.c.bf16 %v3329_v29, %v3328_v5 }
 0x907   :  { %5140 = vmatpush3.bf16.msra.mxu1 %v6451_v45  ;;  %v2641_v0 = vpop.xlane.xlu1 %2640  ;;  %v2638_v1 = vpop.xlane.xlu0 %2637  ;;  %v2668_v2 = vmul.f32 %v5316_v61, %v6576_v60 }
 0x908   :  { %5325 = vrcp.f32 %v2641_v0  ;;  %5146 = vmatprep.subr.bf16.mxu1 %v6468_v23 }
 0x909   :  { %5327 = vrcp.f32 %v2638_v1  ;;  %4839 = vmatprep.mubr.msk.f32.mxu0 %vm1807_vm6, %v2668_v2 }
 0x90a   :  { %v5318_v40 = vpop.eup %5317  ;;  %4840 = vmatmul.mubr.msk.f32.vlgmr.msra.gmra.mrb[38].mxu0 %vm1807_vm6, %v2669_v42 }
 0x90b   :  { %5144 = vmatpush3.bf16.msra.mxu0 %v6464_v51  ;;  %v2635_v48 = vpop.xlane.xlu1 %2634  ;;  %v2672_v45 = vmul.f32 %v5318_v40, %v6580_v3  ;;  %v2632_v60 = vpop.xlane.xlu0 %2631 }
 0x90c   :  { %5329 = vrcp.f32 %v2635_v48  ;;  %5150 = vmatprep.subr.bf16.mxu0 %v6466_v52  ;;  %v5320_v31 = vpop.eup %5319 }
 0x90d   :  { %5331 = vrcp.f32 %v2632_v60  ;;  %4853 = vmatprep.mubr.msk.f32.mxu0 %vm1807_vm6, %v2672_v45  ;;  %v2671_v49 = vmul.f32 %v5320_v31, %v6584_v25 }
 0x90e   :  { %v5322_v10 = vpop.eup %5321 }
 0x90f   :  { %v5324_v13 = vpop.eup %5323  ;;  %v2673_v15 = vmul.f32 %v5322_v10, %v6590_v4  ;;  %v2647_v32 = vpop.xlane.xlu1 %2646 }
 0x910   :  { %5333 = vrcp.f32 %v2647_v32  ;;  %v2644_v51 = vpop.xlane.xlu0 %2643  ;;  %v2670_v3 = vmul.f32 %v5324_v13, %v6593_v46 }
 0x911   :  { %5335 = vrcp.f32 %v2644_v51  ;;  %4854 = vmatmul.mubr.msk.f32.vlgmr.msra.gmra.mrb[40].mxu0 %vm1807_vm6, %v2673_v15 }
 0x912   :  { %v5326_v19 = vpop.eup %5325  ;;  %4846 = vmatprep.mubr.msk.f32.mxu1 %vm1807_vm6, %v2670_v3  ;;  %5152 = vmatpush3.bf16.msra.mxu0 %v6466_v52 }
 0x913   :  { %v5328_v12 = vpop.eup %5327  ;;  %v2677_v54 = vmul.f32 %v5326_v19, %v6599_v50  ;;  %4847 = vmatmul.mubr.msk.f32.vlgmr.msra.gmra.mrb[34].mxu1 %vm1807_vm6, %v2671_v49  ;;  %5158 = vmatprep.subr.bf16.mxu0 %v5157_v17 }
 0x914   :  { %5148 = vmatpush3.bf16.msra.mxu1 %v6468_v23  ;;  %v2676_v4 = vmul.f32 %v5328_v12, %v6601_v20 }
 0x915   :  { %5154 = vmatprep.subr.bf16.mxu1 %v6470_v58 }
 0x916   :  { %v5330_v25 = vpop.eup %5329  ;;  %4867 = vmatprep.mubr.msk.f32.mxu0 %vm1807_vm6, %v2676_v4 }
 0x917   :  { %v5332_v46 = vpop.eup %5331  ;;  %v2675_v26 = vmul.f32 %v5330_v25, %v6607_v16  ;;  %4868 = vmatmul.mubr.msk.f32.vlgmr.msra.gmra.mrb[42].mxu0 %vm1807_vm6, %v2677_v54  ;;  %v3330_v16 = vld [vmem:[#allocation20 + $0x10] sm:$0xff] }
 0x918   :  { %v2674_v52 = vmul.f32 %v5332_v46, %v6609_v30  ;;  %5160 = vmatpush3.bf16.msra.mxu0 %v5157_v17  ;;  %v5161_v30 = vpack.c.bf16 %v3331_v36, %v3330_v16  ;;  %v5346_v36 = vld [vmem:[#allocation2] sm:$0xff] }
 0x919   :  { %5166 = vmatprep.subr.bf16.mxu0 %v5165_v39 }
 0x91a   :  { %v5334_v50 = vpop.eup %5333  ;;  %4860 = vmatprep.mubr.msk.f32.mxu1 %vm1807_vm6, %v2674_v52 }
 0x91b   :  { %v5336_v33 = vpop.eup %5335  ;;  %v2679_v23 = vmul.f32 %v5334_v50, %v6613_v35  ;;  %4861 = vmatmul.mubr.msk.f32.vlgmr.msra.gmra.mrb[36].mxu1 %vm1807_vm6, %v2675_v26  ;;  %v3334_v35 = vld [vmem:[#allocation20 + $0x30] sm:$0xff] }
 0x91c   :  { %5156 = vmatpush3.bf16.msra.mxu1 %v6470_v58  ;;  %v2678_v20 = vmul.f32 %v5336_v33, %v6617_v37  ;;  %v5169_v41 = vpack.c.bf16 %v3335_v21, %v3334_v35 }
 0x91d   :  { %5162 = vmatprep.subr.bf16.mxu1 %v5161_v30 }
 0x91e   :  { %4874 = vmatprep.mubr.msk.f32.mxu1 %vm1807_vm6, %v2678_v20 }
 0x91f   :  { %4875 = vmatmul.mubr.msk.f32.vlgmr.msra.gmra.mrb[38].mxu1 %vm1807_vm6, %v2679_v23  ;;  %v5345_v23 = vld [vmem:[#allocation2 + $0x8] sm:$0xff] }
 0x920   :  { %5164 = vmatpush3.bf16.msra.mxu1 %v5161_v30 }
 0x921   :  { %5170 = vmatprep.subr.bf16.mxu1 %v5169_v41 }
 0x9c7   :  { %v4827_v58 = vpop.f32.mrb[36].mxu0 }
 0x9c8   :  { %v2752_v43 = vpop.f32.mrb[37].mxu0 }
 0x9c9   :  { %4881 = vmatprep.mubr.msk.f32.mxu0 %vm1807_vm6, %v2752_v43 }
 0x9ca   :  { %4882 = vmatmul.mubr.msk.f32.vlgmr.msra.gmra.mrb[44].mxu0 %vm1807_vm6, %v4827_v58 }
 0x9cb   :  { %5168 = vmatpush3.bf16.msra.mxu0 %v5165_v39 }
 0x9d9   :  { %v4834_v37 = vpop.f32.mrb[32].mxu1 }
 0x9da   :  { %v2833_v22 = vpop.f32.mrb[33].mxu1 }
 0x9db   :  { %4884 = vmatprep.mubr.msk.f32.mxu0 %vm1807_vm6, %v2833_v22 }
 0x9dc   :  { %4885 = vmatmul.mubr.msk.f32.gmra.mrb[46].mxu0 %vm1807_vm6, %v4834_v37 }
 0x9dd   :  { %v4841_v44 = vpop.f32.mrb[38].mxu0 }
 0x9de   :  { %v2914_v27 = vpop.f32.mrb[39].mxu0 }
 0x9df   :  { %4891 = vmatprep.mubr.msk.f32.mxu1 %vm1807_vm6, %v2914_v27 }
 0x9e0   :  { %4892 = vmatmul.mubr.msk.f32.vlgmr.msra.gmra.mrb[40].mxu1 %vm1807_vm6, %v4841_v44 }
 0x9e1   :  { %5172 = vmatpush3.bf16.msra.mxu1 %v5169_v41 }
 0x9e4   :  { %v4855_v47 = vpop.f32.mrb[40].mxu0 }
 0x9e5   :  { %v3076_v28 = vpop.f32.mrb[41].mxu0 }
 0x9e6   :  { %v4848_v34 = vpop.f32.mrb[34].mxu1  ;;  %4901 = vmatprep.mubr.msk.f32.mxu0 %vm1807_vm6, %v3076_v28  ;;  %v5347_v28 = vld [vmem:[#allocation2 + $0x18] sm:$0xff] }
 0x9e7   :  { %v2995_v53 = vpop.f32.mrb[35].mxu1  ;;  %4902 = vmatmul.mubr.msk.f32.vlgmr.msra.gmra.mrb[48].mxu0 %vm1807_vm6, %v4855_v47 }
 0x9e8   :  { %4894 = vmatprep.mubr.msk.f32.mxu1 %vm1807_vm6, %v2995_v53  ;;  %v5348_v53 = vld [vmem:[#allocation2 + $0x10] sm:$0xff] }
 0x9e9   :  { %4895 = vmatmul.mubr.msk.f32.gmra.mrb[42].mxu1 %vm1807_vm6, %v4848_v34 }
 0x9ea   :  { %v4869_v14 = vpop.f32.mrb[42].mxu0 }
 0x9eb   :  { %v3238_v11 = vpop.f32.mrb[43].mxu0 }
 0x9ec   :  { %4911 = vmatprep.mubr.msk.f32.mxu1 %vm1807_vm6, %v3238_v11 }
 0x9ed   :  { %4912 = vmatmul.mubr.msk.f32.vlgmr.msra.gmra.mrb[44].mxu1 %vm1807_vm6, %v4869_v14 }
 0x9ee   :  { %v4862_v55 = vpop.f32.mrb[36].mxu1 }
 0x9ef   :  { %v3157_v57 = vpop.f32.mrb[37].mxu1 }
 0x9f0   :  { %4904 = vmatprep.mubr.msk.f32.mxu0 %vm1807_vm6, %v3157_v57 }
 0x9f1   :  { %4905 = vmatmul.mubr.msk.f32.gmra.mrb[50].mxu0 %vm1807_vm6, %v4862_v55 }
 0x9f2   :  { %v4876_v38 = vpop.f32.mrb[38].mxu1 }
 0x9f3   :  { %v3319_v24 = vpop.f32.mrb[39].mxu1 }
 0x9f4   :  { %4914 = vmatprep.mubr.msk.f32.mxu1 %vm1807_vm6, %v3319_v24 }
 0x9f5   :  { %4915 = vmatmul.mubr.msk.f32.gmra.mrb[46].mxu1 %vm1807_vm6, %v4876_v38 }
 0xa9d   :  { %v4883_v62 = vpop.f32.mrb[44].mxu0 }
 0xa9e   :  { %v3414_v56 = vpop.f32.mrb[45].mxu0  ;;  %v3731_v2 = vsel %vm290_vm0, %v4883_v62, 0.0 }
 0xa9f   :  { %v3724_v48 = vsel %vm290_vm0, %v3414_v56, 0.0 }
 0xaaf   :  { %v4886_v61 = vpop.f32.mrb[46].mxu0 }
 0xab0   :  { %v3424_v0 = vpop.f32.mrb[47].mxu0  ;;  %v3745_v17 = vsel %vm290_vm0, %v4886_v61, 0.0 }
 0xab1   :  { %v3738_v19 = vsel %vm290_vm0, %v3424_v0, 0.0 }
 0xab3   :  { %v4893_v1 = vpop.f32.mrb[40].mxu1 }
 0xab4   :  { %v3732_v42 = vsel %vm290_vm0, %v4893_v1, 0.0  ;;  %v3511_v40 = vpop.f32.mrb[41].mxu1 }
 0xab5   :  { %v3733_v45 = vadd.f32 %v3732_v42, %v3731_v2  ;;  %v3725_v60 = vsel %vm290_vm0, %v3511_v40, 0.0 }
 0xab6   :  { %v3726_v5 = vadd.f32 %v3725_v60, %v3724_v48 }
 0xaba   :  { %v4903_v29 = vpop.f32.mrb[48].mxu0 }
 0xabb   :  { %v3734_v31 = vsel %vm290_vm0, %v4903_v29, 0.0  ;;  %v3608_v10 = vpop.f32.mrb[49].mxu0 }
 0xabc   :  { %v3735_v13 = vadd.f32 %v3734_v31, %v3733_v45  ;;  %v4896_v15 = vpop.f32.mrb[42].mxu1  ;;  %v3727_v32 = vsel %vm290_vm0, %v3608_v10, 0.0 }
 0xabd   :  { %v3746_v51 = vsel %vm290_vm0, %v4896_v15, 0.0  ;;  %v3728_v3 = vadd.f32 %v3727_v32, %v3726_v5  ;;  %v3521_v49 = vpop.f32.mrb[43].mxu1  ;;  %v3831_v32 = vld [vmem:[#allocation25 + $0x8] sm:$0xff] }
 0xabe   :  { %v3747_v12 = vadd.f32 %v3746_v51, %v3745_v17  ;;  %v3739_v54 = vsel %vm290_vm0, %v3521_v49, 0.0  ;;  %v3833_v17 = vld [vmem:[#allocation25 + $0x18] sm:$0xff]  ;;  %v3830_v51 = vld [vmem:[#allocation25] sm:$0xff] }
 0xabf   :  { %v3740_v4 = vadd.f32 %v3739_v54, %v3738_v19  ;;  %v5173_v49 = vpack.c.bf16 %v3833_v17, %v3831_v32  ;;  %v3837_v54 = vld [vmem:[#allocation25 + $0x38] sm:$0xff] }
 0xac0   :  { %v4913_v25 = vpop.f32.mrb[44].mxu1  ;;  %v3994_v32 = vld [vmem:[#allocation28 + $0xd8] sm:$0xff] }
 0xac1   :  { %v3736_v46 = vsel %vm290_vm0, %v4913_v25, 0.0  ;;  %v3705_v26 = vpop.f32.mrb[45].mxu1  ;;  %5174 = vmatprep.subr.bf16.mxu0 %v5173_v49  ;;  %v3834_v25 = vld [vmem:[#allocation25 + $0x20] sm:$0xff] }
 0xac2   :  { %v3737_v52 = vadd.f32 %v3736_v46, %v3735_v13  ;;  %v3729_v50 = vsel %vm290_vm0, %v3705_v26, 0.0  ;;  %v3836_v46 = vld [vmem:[#allocation25 + $0x30] sm:$0xff]  ;;  %v3978_v49 = vld [vmem:[#allocation28 + $0x58] sm:$0xff] }
 0xac3   :  { %v3730_v33 = vadd.f32 %v3729_v50, %v3728_v3  ;;  %v3832_v3 = vld [vmem:[#allocation25 + $0x10] sm:$0xff]  ;;  %v5179_v26 = vpack.c.bf16 %v3836_v46, %v3834_v25  ;;  %v3841_v50 = vld [vmem:[#allocation25 + $0x58] sm:$0xff] }
 0xac4   :  { %v6693_v20 = vadd.f32 %v5345_v23, %v3737_v52  ;;  %v4906_v16 = vpop.f32.mrb[50].mxu0  ;;  %v5175_v19 = vpack.c.bf16 %v3832_v3, %v3830_v51  ;;  %v3839_v52 = vld [vmem:[#allocation25 + $0x48] sm:$0xff]  ;;  %v3838_v23 = vld [vmem:[#allocation25 + $0x40] sm:$0xff]  ;;  %v3977_v3 = vld [vmem:[#allocation28 + $0x50] sm:$0xff] }
 0xac5   :  { %v6695_v30 = vadd.f32 %v5346_v36, %v3730_v33  ;;  %v3748_v63 = vsel %vm290_vm0, %v4906_v16, 0.0  ;;  %v3618_v18 = vpop.f32.mrb[51].mxu0  ;;  %v5181_v33 = vpack.c.bf16 %v3841_v50, %v3839_v52  ;;  %v3840_v16 = vld [vmem:[#allocation25 + $0x50] sm:$0xff] }
 0xac6   :  { %v3749_v39 = vadd.f32 %v3748_v63, %v3747_v12  ;;  %v3741_v35 = vsel %vm290_vm0, %v3618_v18, 0.0  ;;  %v3761_v21 = vsel %vm290_vm0, %v6693_v20, 0.0  ;;  %v3835_v12 = vld [vmem:[#allocation25 + $0x28] sm:$0xff]  ;;  %5176 = vmatpush1.bf16.msra.mxu0 %v5175_v19  ;;  %v5183_v36 = vpack.c.bf16 %v3840_v16, %v3838_v23  ;;  %v3845_v18 = vld [vmem:[#allocation25 + $0x78] sm:$0xff] }
 0xac7   :  { %v3742_v41 = vadd.f32 %v3741_v35, %v3740_v4  ;;  %3762 = vadd.xlane.f32.xlu1 %v3761_v21  ;;  %v3758_v58 = vsel %vm290_vm0, %v6695_v30, 0.0  ;;  %v5177_v4 = vpack.c.bf16 %v3837_v54, %v3835_v12  ;;  %v3843_v63 = vld [vmem:[#allocation25 + $0x68] sm:$0xff]  ;;  %v3844_v35 = vld [vmem:[#allocation25 + $0x70] sm:$0xff]  ;;  %v5211_v54 = vpack.c.bf16 %v3978_v49, %v3977_v3 }
 0xac8   :  { %3759 = vadd.xlane.f32.xlu0 %v3758_v58  ;;  %v4916_v43 = vpop.f32.mrb[46].mxu1  ;;  %v3984_v58 = vld [vmem:[#allocation28 + $0x88] sm:$0xff]  ;;  %v3995_v19 = vld [vmem:[#allocation28 + $0xe0] sm:$0xff] }
 0xac9   :  { %v3750_v37 = vsel %vm290_vm0, %v4916_v43, 0.0  ;;  %v3715_v22 = vpop.f32.mrb[47].mxu1  ;;  %5178 = vmatprep.subr.bf16.mxu0 %v5177_v4  ;;  %v3967_v43 = vld [vmem:[#allocation28] sm:$0xff]  ;;  %v3996_v12 = vld [vmem:[#allocation28 + $0xe8] sm:$0xff] }
 0xaca   :  { %v3751_v44 = vadd.f32 %v3750_v37, %v3749_v39  ;;  %v3743_v27 = vsel %vm290_vm0, %v3715_v22, 0.0  ;;  %5180 = vmatpush1.bf16.msra.mxu0 %v5179_v26  ;;  %v5185_v39 = vpack.c.bf16 %v3845_v18, %v3843_v63  ;;  %v3968_v22 = vld [vmem:[#allocation28 + $0x8] sm:$0xff]  ;;  %v5213_v4 = vpack.c.bf16 %v3996_v12, %v3995_v19 }
 0xacb   :  { %v3744_v47 = vadd.f32 %v3743_v27, %v3742_v41  ;;  %5182 = vmatprep.subr.bf16.mxu0 %v5181_v33  ;;  %v5815_v41 = vmov 0.0   ;;  %v5191_v27 = vpack.c.bf16 %v3968_v22, %v3967_v43  ;;  %v4281_v43 = vld [vmem:[#allocation23] ss:$0 sm:$0xff] }
 0xacc   :  { %v6705_v34 = vadd.f32 %v5347_v28, %v3751_v44  ;;  %3934 = vmatprep.mubr.f32.mxu0 %v5815_v41  ;;  %v3985_v44 = vld [vmem:[#allocation28 + $0x90] sm:$0xff] }
 0xacd   :  { %v6707_v14 = vadd.f32 %v5348_v53, %v3744_v47  ;;  %v3969_v28 = vld [vmem:[#allocation28 + $0x10] sm:$0xff]  ;;  %v3970_v53 = vld [vmem:[#allocation28 + $0x18] sm:$0xff] }
 0xace   :  { %v3767_v11 = vsel %vm290_vm0, %v6705_v34, 0.0  ;;  %5184 = vmatpush1.bf16.msra.mxu0 %v5183_v36 }
 0xacf   :  { %3768 = vadd.xlane.f32.xlu1 %v3767_v11  ;;  %v3764_v55 = vsel %vm290_vm0, %v6707_v14, 0.0  ;;  %5186 = vmatprep.subr.bf16.mxu0 %v5185_v39  ;;  %v3987_v11 = vld [vmem:[#allocation28 + $0xa0] sm:$0xff] }
 0xad0   :  { %3765 = vadd.xlane.f32.xlu0 %v3764_v55  ;;  %v3988_v55 = vld [vmem:[#allocation28 + $0xa8] sm:$0xff] }
 0xb54   :  { %v3763_v57 = vpop.xlane.xlu1 %3762 }
 0xb55   :  { %v3771_v38 = vmul.f32 0.015625, %v3763_v57  ;;  %v3760_v24 = vpop.xlane.xlu0 %3759  ;;  %v5197_v57 = vpack.c.bf16 %v3988_v55, %v3987_v11 }
 0xb56   :  { %v3770_v62 = vmul.f32 0.015625, %v3760_v24  ;;  %v3972_v24 = vld [vmem:[#allocation28 + $0x28] sm:$0xff] }
 0xb57   :  { %v6714_v56 = vsub.f32 %v6693_v20, %v3771_v38  ;;  %v3971_v38 = vld [vmem:[#allocation28 + $0x20] sm:$0xff] }
 0xb58   :  { %v6717_v61 = vsub.f32 %v6695_v30, %v3770_v62  ;;  %v3989_v62 = vld [vmem:[#allocation28 + $0xb0] sm:$0xff] }
 0xb59   :  { %v3779_v0 = vmul.f32 %v6714_v56, %v6714_v56 }
 0xb5a   :  { %v3778_v1 = vmul.f32 %v6717_v61, %v6717_v61 }
 0xb5b   :  { %v3785_v2 = vsel %vm290_vm0, %v3779_v0, 0.0  ;;  %v3990_v0 = vld [vmem:[#allocation28 + $0xb8] sm:$0xff] }
 0xb5c   :  { %3786 = vadd.xlane.f32.xlu1 %v3785_v2  ;;  %v3769_v42 = vpop.xlane.xlu1 %3768  ;;  %v3782_v40 = vsel %vm290_vm0, %v3778_v1, 0.0  ;;  %v5199_v1 = vpack.c.bf16 %v3972_v24, %v3971_v38  ;;  %v5201_v2 = vpack.c.bf16 %v3990_v0, %v3989_v62  ;;  %v3981_v62 = vld [vmem:[#allocation28 + $0x70] sm:$0xff]  ;;  %v3982_v0 = vld [vmem:[#allocation28 + $0x78] sm:$0xff] }
 0xb5d   :  { %v3773_v48 = vmul.f32 0.015625, %v3769_v42  ;;  %3783 = vadd.xlane.f32.xlu0 %v3782_v40  ;;  %v3766_v45 = vpop.xlane.xlu0 %3765  ;;  %v3973_v42 = vld [vmem:[#allocation28 + $0x30] sm:$0xff]  ;;  %v3974_v40 = vld [vmem:[#allocation28 + $0x38] sm:$0xff] }
 0xb5e   :  { %v3772_v60 = vmul.f32 0.015625, %v3766_v45  ;;  %v3992_v45 = vld [vmem:[#allocation28 + $0xc8] sm:$0xff] }
 0xb5f   :  { %v6726_v5 = vsub.f32 %v6705_v34, %v3773_v48  ;;  %v3991_v48 = vld [vmem:[#allocation28 + $0xc0] sm:$0xff] }
 0xb60   :  { %v6729_v29 = vsub.f32 %v6707_v14, %v3772_v60  ;;  %v5203_v60 = vpack.c.bf16 %v3974_v40, %v3973_v42  ;;  %v3846_v42 = vld [vmem:[#allocation26] sm:$0x3] }
 0xb61   :  { %v3781_v31 = vmul.f32 %v6726_v5, %v6726_v5 }
 0xb62   :  { %v3780_v10 = vmul.f32 %v6729_v29, %v6729_v29 }
 0xb63   :  { %v3791_v13 = vsel %vm290_vm0, %v3781_v31, 0.0  ;;  %v5205_v31 = vpack.c.bf16 %v3992_v45, %v3991_v48 }
 0xb64   :  { %3792 = vadd.xlane.f32.xlu1 %v3791_v13  ;;  %v3788_v15 = vsel %vm290_vm0, %v3780_v10, 0.0  ;;  %v3975_v10 = vld [vmem:[#allocation28 + $0x40] sm:$0xff]  ;;  %v3976_v13 = vld [vmem:[#allocation28 + $0x48] sm:$0xff] }
 0xb65   :  { %3789 = vadd.xlane.f32.xlu0 %v3788_v15  ;;  %v3993_v15 = vld [vmem:[#allocation28 + $0xd0] sm:$0xff]  ;;  %v5207_v17 = vpack.c.bf16 %v3976_v13, %v3975_v10 }
 0xb66   :  { %v5209_v51 = vpack.c.bf16 %v3994_v32, %v3993_v15 }
 0xb75   :  { %4101 = vrot.lane.b32.xlu1 %v6166_v6, %s5812_s5  ;;  %v3842_v6 = vld [vmem:[#allocation25 + $0x60] sm:$0xff] }
 0xb76   :  { %v5187_v21 = vpack.c.bf16 %v3844_v35, %v3842_v6 }
 0xb78   :  { %5188 = vmatpush1.bf16.msra.mxu0 %v5187_v21  ;;  %v4280_v21 = vld [vmem:[#allocation22] ss:$0 sm:$0xff] }
 0xb79   :  { %4103 = vrot.lane.b32.xlu1 %v6176_v9, %s5812_s5  ;;  %v3983_v9 = vld [vmem:[#allocation28 + $0x80] sm:$0xff] }
 0xb7a   :  { %v5189_v37 = vpack.c.bf16 %v3984_v58, %v3983_v9 }
 0xb7b   :  { %4099 = vrot.lane.b32.xlu0 %v6170_v7, %s5812_s5  ;;  %v3986_v7 = vld [vmem:[#allocation28 + $0x98] sm:$0xff] }
 0xb7c   :  { %v5193_v47 = vpack.c.bf16 %v3986_v7, %v3985_v44  ;;  %5190 = vmatprep.subr.bf16.mxu1 %v5189_v37 }
 0xb7d   :  { %4105 = vrot.lane.b32.xlu1 %v6174_v8, %s5812_s5  ;;  %5192 = vmatpush3.bf16.msra.mxu1 %v5191_v27  ;;  %v5195_v8 = vpack.c.bf16 %v3970_v53, %v3969_v28 }
 0xb7e   :  { %5194 = vmatprep.subr.bf16.mxu1 %v5193_v47 }
 0xb81   :  { %5196 = vmatpush3.bf16.msra.mxu1 %v5195_v8  ;;  %v3979_v8 = vld [vmem:[#allocation28 + $0x60] sm:$0xff] }
 0xb82   :  { %5198 = vmatprep.subr.bf16.mxu1 %v5197_v57  ;;  %v3980_v57 = vld [vmem:[#allocation28 + $0x68] sm:$0xff] }
 0xb83   :  { %v5215_v38 = vpack.c.bf16 %v3980_v57, %v3979_v8 }
 0xb85   :  { %5200 = vmatpush3.bf16.msra.mxu1 %v5199_v1  ;;  %v5219_v1 = vpack.c.bf16 %v3982_v0, %v3981_v62 }
 0xb86   :  { %5202 = vmatprep.subr.bf16.mxu1 %v5201_v2  ;;  %v3850_v2 = vsub.s32 0, %v6475_v59 }
 0xb88   :  { %v3851_v40 = vrot.slane %v3846_v42, %v3850_v2 }
 0xb89   :  { %5204 = vmatpush3.bf16.msra.mxu1 %v5203_v60 }
 0xb8a   :  { %5206 = vmatprep.subr.bf16.mxu1 %v5205_v31 }
 0xb8d   :  { %5208 = vmatpush3.bf16.msra.mxu1 %v5207_v17 }
 0xb8e   :  { %5210 = vmatprep.subr.bf16.mxu1 %v5209_v51 }
 0xb91   :  { %5212 = vmatpush3.bf16.msra.mxu1 %v5211_v54 }
 0xb92   :  { %5214 = vmatprep.subr.bf16.mxu1 %v5213_v4 }
 0xb95   :  { %5216 = vmatpush3.bf16.msra.mxu1 %v5215_v38 }
 0xbe9   :  { %v3787_v25 = vpop.xlane.xlu1 %3786 }
 0xbea   :  { %v3795_v46 = vmul.f32 0.015625, %v3787_v25  ;;  %v3784_v26 = vpop.xlane.xlu0 %3783 }
 0xbeb   :  { %v3794_v52 = vmul.f32 0.015625, %v3784_v26 }
 0xbec   :  { %v3799_v50 = vadd.f32 1e-05, %v3795_v46 }
 0xbed   :  { %v3798_v33 = vadd.f32 1e-05, %v3794_v52 }
 0xbee   :  { %5337 = vrsqrt.f32 %v3799_v50 }
 0xbef   :  { %5339 = vrsqrt.f32 %v3798_v33 }
 0xbf1   :  { %v3793_v23 = vpop.xlane.xlu1 %3792 }
 0xbf2   :  { %v3797_v16 = vmul.f32 0.015625, %v3793_v23  ;;  %v3790_v36 = vpop.xlane.xlu0 %3789 }
 0xbf3   :  { %v3796_v63 = vmul.f32 0.015625, %v3790_v36 }
 0xbf4   :  { %v3801_v18 = vadd.f32 1e-05, %v3797_v16 }
 0xbf5   :  { %v3800_v39 = vadd.f32 1e-05, %v3796_v63 }
 0xbf6   :  { %5341 = vrsqrt.f32 %v3801_v18 }
 0xbf7   :  { %5343 = vrsqrt.f32 %v3800_v39  ;;  %v4286_v39 = vld [vmem:[#allocation29] ss:$0 sm:$0xff] }
 0xbf8   :  { %v5338_v6 = vpop.eup %5337 }
 0xbf9   :  { %v5340_v35 = vpop.eup %5339  ;;  %v3807_v58 = vmul.f32 %v5338_v6, %v6714_v56 }
 0xbfa   :  { %v3806_v9 = vmul.f32 %v5340_v35, %v6717_v61 }
 0xbfb   :  { %v3817_v44 = vmul.f32 %v4280_v21, %v3807_v58 }
 0xbfc   :  { %v3816_v37 = vmul.f32 %v4280_v21, %v3806_v9 }
 0xbfd   :  { %v3827_v47 = vadd.f32 %v4281_v43, %v3817_v44 }
 0xbfe   :  { %v3826_v22 = vadd.f32 %v4281_v43, %v3816_v37  ;;  %v4100_v37 = vpop.permute.xlu0 %4099 }
 0xc00   :  { %v5342_v7 = vpop.eup %5341  ;;  %4282 = vmatmul.mubr.msk.f32.vlgmr.msra.gmra.mrb[52].mxu0 %vm290_vm0, %v3826_v22 }
 0xc01   :  { %v5344_v27 = vpop.eup %5343  ;;  %3940 = vmatprep.mubr.f32.mxu0 %v5815_v41  ;;  %v3809_v53 = vmul.f32 %v5342_v7, %v6726_v5  ;;  %v3998_v5 = vld [vmem:[#allocation28 + $0xf8] sm:$0xff] }
 0xc02   :  { %v3808_v28 = vmul.f32 %v5344_v27, %v6729_v29  ;;  %v3997_v29 = vld [vmem:[#allocation28 + $0xf0] sm:$0xff] }
 0xc03   :  { %v3819_v11 = vmul.f32 %v4280_v21, %v3809_v53  ;;  %v5217_v24 = vpack.c.bf16 %v3998_v5, %v3997_v29 }
 0xc04   :  { %4283 = vmatmul.mubr.msk.f32.gmra.mrb[54].mxu0 %vm290_vm0, %v3827_v47  ;;  %v3818_v61 = vmul.f32 %v4280_v21, %v3808_v28 }
 0xc05   :  { %3946 = vmatprep.mubr.f32.mxu0 %v5815_v41  ;;  %v3829_v55 = vadd.f32 %v4281_v43, %v3819_v11  ;;  %5218 = vmatprep.subr.bf16.mxu1 %v5217_v24 }
 0xc06   :  { %v3828_v56 = vadd.f32 %v4281_v43, %v3818_v61  ;;  %5220 = vmatpush3.bf16.msra.mxu1 %v5219_v1  ;;  %v4102_v43 = vpop.permute.xlu1 %4101 }
 0xc08   :  { %4284 = vmatmul.mubr.msk.f32.gmra.mrb[56].mxu0 %vm290_vm0, %v3828_v56 }
 0xc09   :  { %3952 = vmatprep.mubr.f32.mxu0 %v5815_v41  ;;  %v3854_v41 = vsub.s32 1, %v6475_v59 }
 0xc0a   :  { %v4104_v11 = vpop.permute.xlu1 %4103 }
 0xc0b   :  { %v3855_v48 = vrot.slane %v3846_v42, %v3854_v41 }
 0xc0c   :  { %4285 = vmatmul.mubr.msk.f32.gmra.mrb[58].mxu0 %vm290_vm0, %v3829_v55 }
 0xc0e   :  { %v4106_v62 = vpop.permute.xlu1 %4105 }
 0xcd3   :  { %v3936_v45 = vpop.f32.mrb[52].mxu0 }
 0xcd4   :  { %v3937_v60 = vadd.f32 %v3936_v45, %v3851_v40  ;;  %v3938_v31 = vpop.f32.mrb[53].mxu0 }
 0xcd5   :  { %v3939_v10 = vadd.f32 %v3938_v31, %v3855_v48 }
 0xcd6   :  { %v3959_v32 = vmax.f32 %v3937_v60, 0.0 }
 0xcd7   :  { %v3960_v13 = vmax.f32 %v3939_v10, 0.0  ;;  %v3942_v15 = vpop.f32.mrb[54].mxu0 }
 0xcd8   :  { %v3943_v17 = vadd.f32 %v3942_v15, %v3851_v40  ;;  %v3944_v51 = vpop.f32.mrb[55].mxu0 }
 0xcd9   :  { %v3945_v3 = vadd.f32 %v3944_v51, %v3855_v48  ;;  %4063 = vmatprep.mubr.f32.mxu1 %v3960_v13 }
 0xcda   :  { %4064 = vmatmul.mubr.f32.vlgmr.msra.gmra.mrb[48].mxu1 %v3959_v32  ;;  %v3961_v12 = vmax.f32 %v3943_v17, 0.0 }
 0xcdb   :  { %v3962_v49 = vmax.f32 %v3945_v3, 0.0  ;;  %v3948_v19 = vpop.f32.mrb[56].mxu0 }
 0xcdc   :  { %v3949_v54 = vadd.f32 %v3948_v19, %v3851_v40  ;;  %v3950_v4 = vpop.f32.mrb[57].mxu0 }
 0xcdd   :  { %v3951_v59 = vadd.f32 %v3950_v4, %v3855_v48  ;;  %4068 = vmatprep.mubr.f32.mxu1 %v3962_v49 }
 0xcde   :  { %4069 = vmatmul.mubr.f32.gmra.mrb[50].mxu1 %v3961_v12  ;;  %v3963_v26 = vmax.f32 %v3949_v54, 0.0 }
 0xcdf   :  { %v3964_v25 = vmax.f32 %v3951_v59, 0.0  ;;  %v3954_v46 = vpop.f32.mrb[58].mxu0 }
 0xce0   :  { %v3955_v52 = vadd.f32 %v3954_v46, %v3851_v40  ;;  %v3956_v50 = vpop.f32.mrb[59].mxu0 }
 0xce1   :  { %v3957_v33 = vadd.f32 %v3956_v50, %v3855_v48  ;;  %4073 = vmatprep.mubr.f32.mxu1 %v3964_v25 }
 0xce2   :  { %4074 = vmatmul.mubr.f32.gmra.mrb[52].mxu1 %v3963_v26  ;;  %v3965_v16 = vmax.f32 %v3955_v52, 0.0 }
 0xce3   :  { %v3966_v23 = vmax.f32 %v3957_v33, 0.0 }
 0xce5   :  { %4078 = vmatprep.mubr.f32.mxu1 %v3966_v23 }
 0xce6   :  { %4079 = vmatmul.mubr.f32.gmra.mrb[54].mxu1 %v3965_v16 }
 0xdad   :  { %v4531_v36 = vpop.f32.mrb[48].mxu1 }
 0xdae   :  { %v4532_v63 = vpop.f32.mrb[49].mxu1 }
 0xdaf   :  { %v4533_v18 = vadd.f32 %v4532_v63, %v4531_v36 }
 0xdb1   :  { %v4084_v6 = vadd.f32 %v4533_v18, %v6695_v30  ;;  %v4534_v35 = vpop.f32.mrb[50].mxu1 }
 0xdb2   :  { %v4535_v21 = vpop.f32.mrb[51].mxu1 }
 0xdb3   :  { %v4095_v9 = vadd.f32 %v4286_v39, %v4084_v6  ;;  %v4536_v58 = vadd.f32 %v4535_v21, %v4534_v35 }
 0xdb5   :  { %v4111_v22 = vsel %vm290_vm0, %v4095_v9, %v4100_v37  ;;  %v4085_v44 = vadd.f32 %v4536_v58, %v6693_v20  ;;  %v4537_v7 = vpop.f32.mrb[52].mxu1 }
 0xdb6   :  { %v4538_v27 = vpop.f32.mrb[53].mxu1  ;;  %v4116_v47 = vsel %vm4115_vm10, %v4111_v22, 0.0 }
 0xdb7   :  { %v4096_v28 = vadd.f32 %v4286_v39, %v4085_v44  ;;  %v4539_v53 = vadd.f32 %v4538_v27, %v4537_v7  ;;  %4120 = vst [vmem:[#allocation31] sm:$0xff] %v4116_v47 }
 0xdb9   :  { %v4112_v30 = vsel %vm290_vm0, %v4096_v28, %v4102_v43  ;;  %v4086_v61 = vadd.f32 %v4539_v53, %v6707_v14  ;;  %v4540_v56 = vpop.f32.mrb[54].mxu1 }
 0xdba   :  { %v4541_v55 = vpop.f32.mrb[55].mxu1  ;;  %v4117_v8 = vsel %vm4115_vm10, %v4112_v30, 0.0 }
 0xdbb   :  { %v4097_v57 = vadd.f32 %v4286_v39, %v4086_v61  ;;  %v4542_v38 = vadd.f32 %v4541_v55, %v4540_v56  ;;  %4121 = vst [vmem:[#allocation31 + $0x8] sm:$0xff] %v4117_v8 }
 0xdbd   :  { %v4113_v20 = vsel %vm290_vm0, %v4097_v57, %v4104_v11  ;;  %v4087_v29 = vadd.f32 %v4542_v38, %v6705_v34 }
 0xdbe   :  { %v4118_v5 = vsel %vm4115_vm10, %v4113_v20, 0.0 }
 0xdbf   :  { %v4098_v24 = vadd.f32 %v4286_v39, %v4087_v29  ;;  %4122 = vst [vmem:[#allocation31 + $0x10] sm:$0xff] %v4118_v5 }
 0xdc1   :  { %v4114_v14 = vsel %vm290_vm0, %v4098_v24, %v4106_v62 }
 0xdc2   :  { %v4119_v0 = vsel %vm4115_vm10, %v4114_v14, 0.0 }
 0xdc3   :  { %4123 = vst [vmem:[#allocation31 + $0x18] sm:$0xff] %v4119_v0 }
 0xdc4   :  { %5756 = shalt.err (!%p5753_p8)
}
 0xdc5   :  { %s5757_s3 = scalar_lea.hbm %s6804_s18, 512 }
 0xdc6   :  { %p5758_p9 = scmp.ne.s32.totalorder %s6804_s18, %s5757_s3  ;;  %p5761_p10 = scmp.lt.u32.totalorder %s5757_s3, %s6804_s18 }
 0xdc8   :  { %p5763_p11 = pnand %p5761_p10, %p5758_p9 }
 0xdca   :  { %5766 = shalt.err (!%p5763_p11)
}
 0xdcb   :  { %4135 = dma.vmem_to_hbm [thread:$0]  %s4130_s30, 512, %s6804_s18, [#allocation4], %s5792_s0, %s5792_s0, %s5793_s24  }
 0xdcc   :  { %5787 = dma.done.wait [#allocation4], 512  }
 0xdcd   :  { %5788 = vsyncadd [#allocation4], 4294966784 }
 0xdce   :  { %4139 = vsyncpa [#allocation3], 1 }
 0xdcf   :  { %4140 = vsyncpa [#allocation6], 1 }
 0xdd0   :  { %4141 = vsyncpa [#allocation9], 1 }
 0xdd1   :  { %4142 = vsyncpa [#allocation12], 1 }
 0xdd2   :  { %4143 = vsyncpa [#allocation15], 1 }
 0xdd3   :  { %4144 = vsyncpa [#allocation18], 1 }
 0xdd4   :  { %4145 = vsyncpa [#allocation21], 1 }
 0xdd5   :  { %4146 = vsyncpa [#allocation24], 1 }
 0xdd6   :  { %4147 = vsyncpa [#allocation27], 1 }
 0xdd7   :  { %4148 = vsyncpa [#allocation30], 1 }
 0xdd8   :  { %4149 = vsyncpa [#allocation4], 1 }

</bundles_post_ra>
